<compile_context>
chip_gen: v5e
topology: v5e:2x2
jax: 0.10.0
libtpu: 0.0.40
codegen_flags: <defaults>
</compile_context>

<pallas_src>
import functools

import jax
import jax.numpy as jnp
import numpy as np
from jax.experimental import pallas as pl
from jax.experimental.pallas import tpu as pltpu

EMBED = 128    # self.embed_size
HIDDEN = 256   # self.hidden_size


def _model_kernel(channel_mix, Bb, N, T, P, mm_dtype,
                  x_ref, s_ref, emb_ref, d_ref, cbias_ref, wcm_ref,
                  win_ref, bin_ref, w1_ref, b1_ref, w2_ref, b2_ref,
                  wout_ref, bout_ref, o_ref):
    E, H = EMBED, HIDDEN
    M = Bb * N
    x = x_ref[...]                                    # (Bb, N, T) f32

    # ----- channel mixer: contraction dim N is tiny -> VPU broadcast-MAC, not MXU -----
    if channel_mix:
        wcm = wcm_ref[...]                            # (N, N): out n mixes channel m
        if N <= 8:
            cx = jnp.zeros_like(x)
            for m in range(N):                        # static unroll (N small)
                cx = cx + wcm[:, m:m + 1][None] * x[:, m:m + 1, :]
        else:
            cx = jnp.einsum('nm,bmt->bnt', wcm, x,
                            preferred_element_type=jnp.float32)
        xc = x + cx                                   # x + channel_mixer(x) contribution
    else:
        xc = x

    x2 = x.reshape(M, T)
    xc2 = xc.reshape(M, T)
    xcbar = jnp.mean(xc2, axis=1, keepdims=True)      # (M, 1) trend of (x + mixed x)

    # ----- fused tokenEmb + trend/season Linear + mixer bias + token residual -----
    # y[row, t, :] = xc*s + x*emb + mean_t(xc)*d + cbias[n]   (rank-1 along embed dim)
    s_row = s_ref[...].reshape(1, 1, E)               # emb @ W_season
    e_row = emb_ref[...].reshape(1, 1, E)             # raw embedding (token residual)
    d_row = d_ref[...]                                # (1, E): emb @ (W_trend - W_season)
    cb = jnp.broadcast_to(cbias_ref[...][None], (Bb, N, E)).reshape(M, E)
    row_const = xcbar * d_row + cb                    # (M, E)
    y3 = xc2[:, :, None] * s_row + x2[:, :, None] * e_row + row_const[:, None, :]
    y2 = y3.reshape(M, T * E)                         # (M, T*E) input to ode_input_proj

    # ----- ode_head: input proj -> one 3/8-rule RK4 step (torchdiffeq 'rk4') -> out proj
    h = jnp.dot(y2.astype(mm_dtype), win_ref[...],
                preferred_element_type=jnp.float32) + bin_ref[...]

    def f(z):
        z1 = jnp.dot(z.astype(mm_dtype), w1_ref[...],
                     preferred_element_type=jnp.float32) + b1_ref[...]
        z1 = jnp.maximum(z1, 0.0)
        return jnp.dot(z1.astype(mm_dtype), w2_ref[...],
                       preferred_element_type=jnp.float32) + b2_ref[...]

    third = 1.0 / 3.0
    k1 = f(h)
    k2 = f(h + k1 * third)
    k3 = f(h + (k2 - k1 * third))
    k4 = f(h + (k1 - k2 + k3))
    h = h + (k1 + 3.0 * (k2 + k3) + k4) * 0.125

    out = jnp.dot(h.astype(mm_dtype), wout_ref[...],
                  preferred_element_type=jnp.float32) + bout_ref[...]
    o_ref[...] = out.reshape(Bb, N, P)                # natural layout; transpose in wrapper


def _pick_block_b(B, N, T):
    """Rows per MXU call ~256, bounded by VMEM for the (M, T*E) activation, and
    keep >= 2 grid steps when B >= 2 so both v7x TensorCores get work."""
    vmem_rows = max(8, (12 * 1024 * 1024) // (T * EMBED * 6))   # f32 y2 + bf16 copy
    target = max(1, min(256 // max(N, 1), vmem_rows // max(N, 1)))
    bb = min(B, target)
    if B >= 2:
        bb = min(bb, max(1, B // 2))
    return max(1, bb)


def model_forward(x_enc, params, channel_independence='0',
                  matmul_dtype=jnp.bfloat16, block_b=None):
    B, T, N = x_enc.shape
    E, H = EMBED, HIDDEN
    P = params['w_out'].shape[1]
    channel_mix = (channel_independence != '1')

    # ---- tiny grid-invariant pre-folds (XLA, outside the hot loop) ----
    emb = params['emb'].astype(jnp.float32)                     # (1, E)
    s_coef = emb @ params['w_season']                           # (1, E)
    d_coef = emb @ (params['w_trend'] - params['w_season'])     # (1, E)
    b_ts = params['b_trend'] + params['b_season']               # (1, E)
    if channel_mix:
        wsum = jnp.sum(params['w_cm'], axis=1, keepdims=True)   # (N, 1)
        cbias = (1.0 + wsum) * b_ts + params['b_cm']            # (N, E)
    else:
        cbias = jnp.broadcast_to(b_ts, (N, E))

    # bf16 (MXU) copies of the big matmul weights; accumulation stays f32.
    mmd = matmul_dtype
    w_in = params['w_in'].astype(mmd)
    w1 = params['w1'].astype(mmd)
    w2 = params['w2'].astype(mmd)
    w_out = params['w_out'].astype(mmd)

    # ---- batch blocking ----
    Bb = _pick_block_b(B, N, T) if block_b is None else block_b
    nblk = -(-B // Bb)
    B_pad = nblk * Bb
    x_perm = jnp.transpose(x_enc, (0, 2, 1)).astype(jnp.float32)   # (B, N, T)
    if B_pad != B:
        x_perm = jnp.pad(x_perm, ((0, B_pad - B), (0, 0), (0, 0)))

    kern = functools.partial(_model_kernel, channel_mix, Bb, N, T, P, mmd)

    def inv(shape):
        zeros = (0,) * len(shape)
        return pl.BlockSpec(shape, lambda b, _z=zeros: _z)

    in_specs = [
        pl.BlockSpec((Bb, N, T), lambda b: (b, 0, 0)),   # x, per-batch block
        inv((1, E)),                                     # emb @ W_season
        inv((1, E)),                                     # emb (token residual)
        inv((1, E)),                                     # emb @ (W_trend - W_season)
        inv((N, E)),                                     # per-channel constant bias
        inv((N, N)),                                     # channel_mixer weight
        inv((T * E, H)), inv((1, H)),                    # ode_input_proj
        inv((H, H)), inv((1, H)),                        # ode_func[0]
        inv((H, H)), inv((1, H)),                        # ode_func[2]
        inv((H, P)), inv((1, P)),                        # ode_output_proj
    ]

    def _nbytes(a):
        return int(np.prod(a.shape)) * jnp.dtype(a.dtype).itemsize

    flops = 2 * B_pad * N * (T * E * H + 8 * H * H + H * P)
    bytes_accessed = (_nbytes(x_perm) + 4 * B_pad * N * P
                      + sum(_nbytes(a) for a in (s_coef, emb, d_coef, cbias,
                                                 params['w_cm'], w_in, params['b_in'],
                                                 w1, params['b1'], w2, params['b2'],
                                                 w_out, params['b_out'])))

    out = pl.pallas_call(
        kern,
        out_shape=jax.ShapeDtypeStruct((B_pad, N, P), jnp.float32),
        grid=(nblk,),
        in_specs=in_specs,
        out_specs=pl.BlockSpec((Bb, N, P), lambda b: (b, 0, 0)),
        compiler_params=pltpu.CompilerParams(
            dimension_semantics=("parallel",),
            vmem_limit_bytes=64 * 1024 * 1024),
        cost_estimate=pl.CostEstimate(flops=int(flops), transcendentals=0,
                                      bytes_accessed=int(bytes_accessed)),
    )(x_perm, s_coef, emb, d_coef, cbias, params['w_cm'],
      w_in, params['b_in'], w1, params['b1'], w2, params['b2'],
      w_out, params['b_out'])

    out = out[:B]                                # drop batch padding
    return jnp.transpose(out, (0, 2, 1))         # (B, P, N), matches PyTorch output


def reference(x_enc, params, channel_independence='0'):
    """Pure-JAX (f32) replica of the PyTorch forward."""
    B, T, N = x_enc.shape
    tok = jnp.transpose(x_enc, (0, 2, 1))[..., None] * params['emb'][0]   # (B,N,T,E)
    trend = jnp.broadcast_to(jnp.mean(tok, axis=2, keepdims=True), tok.shape)
    season = tok - trend
    y = (trend @ params['w_trend'] + params['b_trend'][0]
         + season @ params['w_season'] + params['b_season'][0])
    if channel_independence != '1':
        mixed = (jnp.einsum('nm,bmte->bnte', params['w_cm'], y)
                 + params['b_cm'][:, 0][None, :, None, None])
        y = y + mixed
    y = y + tok
    yf = y.reshape(B, N, T * EMBED)
    h = yf @ params['w_in'] + params['b_in'][0]

    def f(z):
        return (jnp.maximum(z @ params['w1'] + params['b1'][0], 0.0)
                @ params['w2'] + params['b2'][0])

    # torchdiffeq 'rk4' (3/8-rule), single fixed step over t = [0, 1]
    k1 = f(h)
    k2 = f(h + k1 / 3.0)
    k3 = f(h + (k2 - k1 / 3.0))
    k4 = f(h + (k1 - k2 + k3))
    h = h + (k1 + 3.0 * (k2 + k3) + k4) * 0.125
    out = h @ params['w_out'] + params['b_out'][0]
    return jnp.transpose(out, (0, 2, 1))


def init_params(key, T, N, P):
    ks = jax.random.split(key, 16)
    s = 0.05
    f32 = jnp.float32
    # Linear weights stored pre-transposed to (in, out); channel_mixer kept (out, in).
    return {
        'emb':      jax.random.normal(ks[0], (1, EMBED), f32),
        'w_trend':  jax.random.normal(ks[1], (EMBED, EMBED), f32) * s,
        'b_trend':  jax.random.normal(ks[2], (1, EMBED), f32) * s,
        'w_season': jax.random.normal(ks[3], (EMBED, EMBED), f32) * s,
        'b_season': jax.random.normal(ks[4], (1, EMBED), f32) * s,
        'w_cm':     jax.random.normal(ks[5], (N, N), f32) * s,
        'b_cm':     jax.random.normal(ks[6], (N, 1), f32) * s,
        'w_in':     jax.random.normal(ks[7], (T * EMBED, HIDDEN), f32) * s,
        'b_in':     jax.random.normal(ks[8], (1, HIDDEN), f32) * s,
        'w1':       jax.random.normal(ks[9], (HIDDEN, HIDDEN), f32) * s,
        'b1':       jax.random.normal(ks[10], (1, HIDDEN), f32) * s,
        'w2':       jax.random.normal(ks[11], (HIDDEN, HIDDEN), f32) * s,
        'b2':       jax.random.normal(ks[12], (1, HIDDEN), f32) * s,
        'w_out':    jax.random.normal(ks[13], (HIDDEN, P), f32) * s,
        'b_out':    jax.random.normal(ks[14], (1, P), f32) * s,
    }


if __name__ == "__main__":
    B, T, N, P = 2, 8, 4, 4           # batch, seq_len, enc_in, pred_len
    key = jax.random.PRNGKey(0)
    kx, kp = jax.random.split(key)
    x_enc = jax.random.normal(kx, (B, T, N), jnp.float32)
    params = init_params(kp, T, N, P)

    ref0 = jax.block_until_ready(reference(x_enc, params, '0'))
    ref1 = jax.block_until_ready(reference(x_enc, params, '1'))

    # f32-MXU path: tight check against the pure-JAX reference (both channel modes)
    out0_f32 = jax.block_until_ready(
        model_forward(x_enc, params, '0', matmul_dtype=jnp.float32))
    assert out0_f32.shape == (B, P, N), out0_f32.shape
    np.testing.assert_allclose(np.asarray(out0_f32), np.asarray(ref0),
                               rtol=3e-2, atol=3e-2)

    out1_f32 = jax.block_until_ready(
        model_forward(x_enc, params, '1', matmul_dtype=jnp.float32))
    np.testing.assert_allclose(np.asarray(out1_f32), np.asarray(ref1),
                               rtol=3e-2, atol=3e-2)

    # default bf16-MXU path (f32 accumulation): looser tolerance for bf16 rounding
    out0_bf16 = jax.block_until_ready(model_forward(x_enc, params, '0'))
    assert out0_bf16.shape == (B, P, N), out0_bf16.shape
    np.testing.assert_allclose(np.asarray(out0_bf16), np.asarray(ref0),
                               rtol=5e-2, atol=5e-2)

    print("KERNEL_OK")
</pallas_src>

<mosaic_0001>
module attributes {stable_mosaic.version = 11 : i64} {
  func.func @_model_kernel(%arg0: i32, %arg1: memref<1x4x8xf32, #tpu.memory_space<vmem>>, %arg2: memref<1x128xf32, #tpu.memory_space<vmem>>, %arg3: memref<1x128xf32, #tpu.memory_space<vmem>>, %arg4: memref<1x128xf32, #tpu.memory_space<vmem>>, %arg5: memref<4x128xf32, #tpu.memory_space<vmem>>, %arg6: memref<4x4xf32, #tpu.memory_space<vmem>>, %arg7: memref<1024x256xf32, #tpu.memory_space<vmem>>, %arg8: memref<1x256xf32, #tpu.memory_space<vmem>>, %arg9: memref<256x256xf32, #tpu.memory_space<vmem>>, %arg10: memref<1x256xf32, #tpu.memory_space<vmem>>, %arg11: memref<256x256xf32, #tpu.memory_space<vmem>>, %arg12: memref<1x256xf32, #tpu.memory_space<vmem>>, %arg13: memref<256x4xf32, #tpu.memory_space<vmem>>, %arg14: memref<1x4xf32, #tpu.memory_space<vmem>>, %arg15: memref<1x4x4xf32, #tpu.memory_space<vmem>>) attributes {dimension_semantics = [#tpu.dimension_semantics<parallel>], iteration_bounds = array<i64: 2>, scalar_prefetch = 0 : i64, scratch_operands = 0 : i64, tpu.core_type = #tpu.core_type<tc>, window_params = [{transform_indices = @transform_0, window_bounds = array<i64: 1, 4, 8>}, {pipeline_mode = #tpu.pipeline_mode<synchronous>, transform_indices = @transform_1, window_bounds = array<i64: 1, 128>}, {pipeline_mode = #tpu.pipeline_mode<synchronous>, transform_indices = @transform_2, window_bounds = array<i64: 1, 128>}, {pipeline_mode = #tpu.pipeline_mode<synchronous>, transform_indices = @transform_3, window_bounds = array<i64: 1, 128>}, {pipeline_mode = #tpu.pipeline_mode<synchronous>, transform_indices = @transform_4, window_bounds = array<i64: 4, 128>}, {pipeline_mode = #tpu.pipeline_mode<synchronous>, transform_indices = @transform_5, window_bounds = array<i64: 4, 4>}, {pipeline_mode = #tpu.pipeline_mode<synchronous>, transform_indices = @transform_6, window_bounds = array<i64: 1024, 256>}, {pipeline_mode = #tpu.pipeline_mode<synchronous>, transform_indices = @transform_7, window_bounds = array<i64: 1, 256>}, {pipeline_mode = #tpu.pipeline_mode<synchronous>, transform_indices = @transform_8, window_bounds = array<i64: 256, 256>}, {pipeline_mode = #tpu.pipeline_mode<synchronous>, transform_indices = @transform_9, window_bounds = array<i64: 1, 256>}, {pipeline_mode = #tpu.pipeline_mode<synchronous>, transform_indices = @transform_10, window_bounds = array<i64: 256, 256>}, {pipeline_mode = #tpu.pipeline_mode<synchronous>, transform_indices = @transform_11, window_bounds = array<i64: 1, 256>}, {pipeline_mode = #tpu.pipeline_mode<synchronous>, transform_indices = @transform_12, window_bounds = array<i64: 256, 4>}, {pipeline_mode = #tpu.pipeline_mode<synchronous>, transform_indices = @transform_13, window_bounds = array<i64: 1, 4>}, {transform_indices = @transform_14, window_bounds = array<i64: 1, 4, 4>}]} {
    %c0 = arith.constant 0 : index
    %c0_0 = arith.constant 0 : index
    %c0_1 = arith.constant 0 : index
    %0 = vector.load %arg1[%c0, %c0_0, %c0_1] : memref<1x4x8xf32, #tpu.memory_space<vmem>>, vector<1x4x8xf32>
    %c0_2 = arith.constant 0 : index
    %c0_3 = arith.constant 0 : index
    %1 = vector.load %arg6[%c0_2, %c0_3] : memref<4x4xf32, #tpu.memory_space<vmem>>, vector<4x4xf32>
    %cst = arith.constant 0.000000e+00 : f32
    %2 = vector.broadcast %cst : f32 to vector<1x4x8xf32>
    %3 = vector.extract_strided_slice %1 {offsets = [0, 0], sizes = [4, 1], strides = [1, 1]} : vector<4x4xf32> to vector<4x1xf32>
    %4 = vector.shape_cast %3 : vector<4x1xf32> to vector<1x4x1xf32>
    %5 = vector.extract_strided_slice %0 {offsets = [0, 0, 0], sizes = [1, 1, 8], strides = [1, 1, 1]} : vector<1x4x8xf32> to vector<1x1x8xf32>
    %6 = vector.broadcast %4 : vector<1x4x1xf32> to vector<1x4x8xf32>
    %7 = vector.broadcast %5 : vector<1x1x8xf32> to vector<1x4x8xf32>
    %8 = arith.mulf %6, %7 : vector<1x4x8xf32>
    %9 = arith.addf %2, %8 : vector<1x4x8xf32>
    %10 = vector.extract_strided_slice %1 {offsets = [0, 1], sizes = [4, 1], strides = [1, 1]} : vector<4x4xf32> to vector<4x1xf32>
    %11 = vector.shape_cast %10 : vector<4x1xf32> to vector<1x4x1xf32>
    %12 = vector.extract_strided_slice %0 {offsets = [0, 1, 0], sizes = [1, 1, 8], strides = [1, 1, 1]} : vector<1x4x8xf32> to vector<1x1x8xf32>
    %13 = vector.broadcast %11 : vector<1x4x1xf32> to vector<1x4x8xf32>
    %14 = vector.broadcast %12 : vector<1x1x8xf32> to vector<1x4x8xf32>
    %15 = arith.mulf %13, %14 : vector<1x4x8xf32>
    %16 = arith.addf %9, %15 : vector<1x4x8xf32>
    %17 = vector.extract_strided_slice %1 {offsets = [0, 2], sizes = [4, 1], strides = [1, 1]} : vector<4x4xf32> to vector<4x1xf32>
    %18 = vector.shape_cast %17 : vector<4x1xf32> to vector<1x4x1xf32>
    %19 = vector.extract_strided_slice %0 {offsets = [0, 2, 0], sizes = [1, 1, 8], strides = [1, 1, 1]} : vector<1x4x8xf32> to vector<1x1x8xf32>
    %20 = vector.broadcast %18 : vector<1x4x1xf32> to vector<1x4x8xf32>
    %21 = vector.broadcast %19 : vector<1x1x8xf32> to vector<1x4x8xf32>
    %22 = arith.mulf %20, %21 : vector<1x4x8xf32>
    %23 = arith.addf %16, %22 : vector<1x4x8xf32>
    %24 = vector.extract_strided_slice %1 {offsets = [0, 3], sizes = [4, 1], strides = [1, 1]} : vector<4x4xf32> to vector<4x1xf32>
    %25 = vector.shape_cast %24 : vector<4x1xf32> to vector<1x4x1xf32>
    %26 = vector.extract_strided_slice %0 {offsets = [0, 3, 0], sizes = [1, 1, 8], strides = [1, 1, 1]} : vector<1x4x8xf32> to vector<1x1x8xf32>
    %27 = vector.broadcast %25 : vector<1x4x1xf32> to vector<1x4x8xf32>
    %28 = vector.broadcast %26 : vector<1x1x8xf32> to vector<1x4x8xf32>
    %29 = arith.mulf %27, %28 : vector<1x4x8xf32>
    %30 = arith.addf %23, %29 : vector<1x4x8xf32>
    %31 = arith.addf %0, %30 : vector<1x4x8xf32>
    %32 = vector.shape_cast %0 : vector<1x4x8xf32> to vector<4x8xf32>
    %33 = vector.shape_cast %31 : vector<1x4x8xf32> to vector<4x8xf32>
    %cst_4 = arith.constant dense<0.000000e+00> : vector<4xf32>
    %34 = vector.multi_reduction <add>, %33, %cst_4 [1] : vector<4x8xf32> to vector<4xf32>
    %35 = vector.shape_cast %34 : vector<4xf32> to vector<4x1xf32>
    %cst_5 = arith.constant 8.000000e+00 : f32
    %36 = vector.broadcast %cst_5 : f32 to vector<4x1xf32>
    %37 = arith.divf %35, %36 : vector<4x1xf32>
    %c0_6 = arith.constant 0 : index
    %c0_7 = arith.constant 0 : index
    %38 = vector.load %arg2[%c0_6, %c0_7] : memref<1x128xf32, #tpu.memory_space<vmem>>, vector<1x128xf32>
    %39 = vector.shape_cast %38 : vector<1x128xf32> to vector<1x1x128xf32>
    %c0_8 = arith.constant 0 : index
    %c0_9 = arith.constant 0 : index
    %40 = vector.load %arg3[%c0_8, %c0_9] : memref<1x128xf32, #tpu.memory_space<vmem>>, vector<1x128xf32>
    %41 = vector.shape_cast %40 : vector<1x128xf32> to vector<1x1x128xf32>
    %c0_10 = arith.constant 0 : index
    %c0_11 = arith.constant 0 : index
    %42 = vector.load %arg4[%c0_10, %c0_11] : memref<1x128xf32, #tpu.memory_space<vmem>>, vector<1x128xf32>
    %c0_12 = arith.constant 0 : index
    %c0_13 = arith.constant 0 : index
    %43 = vector.load %arg5[%c0_12, %c0_13] : memref<4x128xf32, #tpu.memory_space<vmem>>, vector<4x128xf32>
    %44 = vector.shape_cast %43 : vector<4x128xf32> to vector<1x4x128xf32>
    %45 = vector.shape_cast %44 : vector<1x4x128xf32> to vector<4x128xf32>
    %46 = vector.broadcast %37 : vector<4x1xf32> to vector<4x128xf32>
    %47 = vector.broadcast %42 : vector<1x128xf32> to vector<4x128xf32>
    %48 = arith.mulf %46, %47 : vector<4x128xf32>
    %49 = arith.addf %48, %45 : vector<4x128xf32>
    %50 = vector.shape_cast %33 : vector<4x8xf32> to vector<4x8x1xf32>
    %51 = vector.broadcast %50 : vector<4x8x1xf32> to vector<4x8x128xf32>
    %52 = vector.broadcast %39 : vector<1x1x128xf32> to vector<4x8x128xf32>
    %53 = arith.mulf %51, %52 : vector<4x8x128xf32>
    %54 = vector.shape_cast %32 : vector<4x8xf32> to vector<4x8x1xf32>
    %55 = vector.broadcast %54 : vector<4x8x1xf32> to vector<4x8x128xf32>
    %56 = vector.broadcast %41 : vector<1x1x128xf32> to vector<4x8x128xf32>
    %57 = arith.mulf %55, %56 : vector<4x8x128xf32>
    %58 = arith.addf %53, %57 : vector<4x8x128xf32>
    %59 = vector.shape_cast %49 : vector<4x128xf32> to vector<4x1x128xf32>
    %60 = vector.broadcast %59 : vector<4x1x128xf32> to vector<4x8x128xf32>
    %61 = arith.addf %58, %60 : vector<4x8x128xf32>
    %62 = vector.shape_cast %61 : vector<4x8x128xf32> to vector<4x1024xf32>
    %c0_14 = arith.constant 0 : index
    %c0_15 = arith.constant 0 : index
    %63 = vector.load %arg7[%c0_14, %c0_15] : memref<1024x256xf32, #tpu.memory_space<vmem>>, vector<1024x256xf32>
    %cst_16 = arith.constant dense<0.000000e+00> : vector<4x256xf32>
    %64 = tpu.matmul %62, %63, %cst_16 {dimension_numbers = #tpu.dot_dimension_numbers<[1], [0], [0], [1], [0, 0, 1, 1], [], []>} : vector<4x1024xf32>, vector<1024x256xf32>, vector<4x256xf32> -> vector<4x256xf32>
    %c0_17 = arith.constant 0 : index
    %c0_18 = arith.constant 0 : index
    %65 = vector.load %arg8[%c0_17, %c0_18] : memref<1x256xf32, #tpu.memory_space<vmem>>, vector<1x256xf32>
    %66 = vector.broadcast %65 : vector<1x256xf32> to vector<4x256xf32>
    %67 = arith.addf %64, %66 : vector<4x256xf32>
    %c0_19 = arith.constant 0 : index
    %c0_20 = arith.constant 0 : index
    %68 = vector.load %arg9[%c0_19, %c0_20] : memref<256x256xf32, #tpu.memory_space<vmem>>, vector<256x256xf32>
    %cst_21 = arith.constant dense<0.000000e+00> : vector<4x256xf32>
    %69 = tpu.matmul %67, %68, %cst_21 {dimension_numbers = #tpu.dot_dimension_numbers<[1], [0], [0], [1], [0, 0, 1, 1], [], []>} : vector<4x256xf32>, vector<256x256xf32>, vector<4x256xf32> -> vector<4x256xf32>
    %c0_22 = arith.constant 0 : index
    %c0_23 = arith.constant 0 : index
    %70 = vector.load %arg10[%c0_22, %c0_23] : memref<1x256xf32, #tpu.memory_space<vmem>>, vector<1x256xf32>
    %71 = vector.broadcast %70 : vector<1x256xf32> to vector<4x256xf32>
    %72 = arith.addf %69, %71 : vector<4x256xf32>
    %cst_24 = arith.constant 0.000000e+00 : f32
    %73 = vector.broadcast %cst_24 : f32 to vector<4x256xf32>
    %74 = arith.maximumf %72, %73 : vector<4x256xf32>
    %c0_25 = arith.constant 0 : index
    %c0_26 = arith.constant 0 : index
    %75 = vector.load %arg11[%c0_25, %c0_26] : memref<256x256xf32, #tpu.memory_space<vmem>>, vector<256x256xf32>
    %cst_27 = arith.constant dense<0.000000e+00> : vector<4x256xf32>
    %76 = tpu.matmul %74, %75, %cst_27 {dimension_numbers = #tpu.dot_dimension_numbers<[1], [0], [0], [1], [0, 0, 1, 1], [], []>} : vector<4x256xf32>, vector<256x256xf32>, vector<4x256xf32> -> vector<4x256xf32>
    %c0_28 = arith.constant 0 : index
    %c0_29 = arith.constant 0 : index
    %77 = vector.load %arg12[%c0_28, %c0_29] : memref<1x256xf32, #tpu.memory_space<vmem>>, vector<1x256xf32>
    %78 = vector.broadcast %77 : vector<1x256xf32> to vector<4x256xf32>
    %79 = arith.addf %76, %78 : vector<4x256xf32>
    %cst_30 = arith.constant 0.333333343 : f32
    %80 = vector.broadcast %cst_30 : f32 to vector<4x256xf32>
    %81 = arith.mulf %79, %80 : vector<4x256xf32>
    %82 = arith.addf %67, %81 : vector<4x256xf32>
    %c0_31 = arith.constant 0 : index
    %c0_32 = arith.constant 0 : index
    %83 = vector.load %arg9[%c0_31, %c0_32] : memref<256x256xf32, #tpu.memory_space<vmem>>, vector<256x256xf32>
    %cst_33 = arith.constant dense<0.000000e+00> : vector<4x256xf32>
    %84 = tpu.matmul %82, %83, %cst_33 {dimension_numbers = #tpu.dot_dimension_numbers<[1], [0], [0], [1], [0, 0, 1, 1], [], []>} : vector<4x256xf32>, vector<256x256xf32>, vector<4x256xf32> -> vector<4x256xf32>
    %c0_34 = arith.constant 0 : index
    %c0_35 = arith.constant 0 : index
    %85 = vector.load %arg10[%c0_34, %c0_35] : memref<1x256xf32, #tpu.memory_space<vmem>>, vector<1x256xf32>
    %86 = vector.broadcast %85 : vector<1x256xf32> to vector<4x256xf32>
    %87 = arith.addf %84, %86 : vector<4x256xf32>
    %cst_36 = arith.constant 0.000000e+00 : f32
    %88 = vector.broadcast %cst_36 : f32 to vector<4x256xf32>
    %89 = arith.maximumf %87, %88 : vector<4x256xf32>
    %c0_37 = arith.constant 0 : index
    %c0_38 = arith.constant 0 : index
    %90 = vector.load %arg11[%c0_37, %c0_38] : memref<256x256xf32, #tpu.memory_space<vmem>>, vector<256x256xf32>
    %cst_39 = arith.constant dense<0.000000e+00> : vector<4x256xf32>
    %91 = tpu.matmul %89, %90, %cst_39 {dimension_numbers = #tpu.dot_dimension_numbers<[1], [0], [0], [1], [0, 0, 1, 1], [], []>} : vector<4x256xf32>, vector<256x256xf32>, vector<4x256xf32> -> vector<4x256xf32>
    %c0_40 = arith.constant 0 : index
    %c0_41 = arith.constant 0 : index
    %92 = vector.load %arg12[%c0_40, %c0_41] : memref<1x256xf32, #tpu.memory_space<vmem>>, vector<1x256xf32>
    %93 = vector.broadcast %92 : vector<1x256xf32> to vector<4x256xf32>
    %94 = arith.addf %91, %93 : vector<4x256xf32>
    %cst_42 = arith.constant 0.333333343 : f32
    %95 = vector.broadcast %cst_42 : f32 to vector<4x256xf32>
    %96 = arith.mulf %79, %95 : vector<4x256xf32>
    %97 = arith.subf %94, %96 : vector<4x256xf32>
    %98 = arith.addf %67, %97 : vector<4x256xf32>
    %c0_43 = arith.constant 0 : index
    %c0_44 = arith.constant 0 : index
    %99 = vector.load %arg9[%c0_43, %c0_44] : memref<256x256xf32, #tpu.memory_space<vmem>>, vector<256x256xf32>
    %cst_45 = arith.constant dense<0.000000e+00> : vector<4x256xf32>
    %100 = tpu.matmul %98, %99, %cst_45 {dimension_numbers = #tpu.dot_dimension_numbers<[1], [0], [0], [1], [0, 0, 1, 1], [], []>} : vector<4x256xf32>, vector<256x256xf32>, vector<4x256xf32> -> vector<4x256xf32>
    %c0_46 = arith.constant 0 : index
    %c0_47 = arith.constant 0 : index
    %101 = vector.load %arg10[%c0_46, %c0_47] : memref<1x256xf32, #tpu.memory_space<vmem>>, vector<1x256xf32>
    %102 = vector.broadcast %101 : vector<1x256xf32> to vector<4x256xf32>
    %103 = arith.addf %100, %102 : vector<4x256xf32>
    %cst_48 = arith.constant 0.000000e+00 : f32
    %104 = vector.broadcast %cst_48 : f32 to vector<4x256xf32>
    %105 = arith.maximumf %103, %104 : vector<4x256xf32>
    %c0_49 = arith.constant 0 : index
    %c0_50 = arith.constant 0 : index
    %106 = vector.load %arg11[%c0_49, %c0_50] : memref<256x256xf32, #tpu.memory_space<vmem>>, vector<256x256xf32>
    %cst_51 = arith.constant dense<0.000000e+00> : vector<4x256xf32>
    %107 = tpu.matmul %105, %106, %cst_51 {dimension_numbers = #tpu.dot_dimension_numbers<[1], [0], [0], [1], [0, 0, 1, 1], [], []>} : vector<4x256xf32>, vector<256x256xf32>, vector<4x256xf32> -> vector<4x256xf32>
    %c0_52 = arith.constant 0 : index
    %c0_53 = arith.constant 0 : index
    %108 = vector.load %arg12[%c0_52, %c0_53] : memref<1x256xf32, #tpu.memory_space<vmem>>, vector<1x256xf32>
    %109 = vector.broadcast %108 : vector<1x256xf32> to vector<4x256xf32>
    %110 = arith.addf %107, %109 : vector<4x256xf32>
    %111 = arith.subf %79, %94 : vector<4x256xf32>
    %112 = arith.addf %111, %110 : vector<4x256xf32>
    %113 = arith.addf %67, %112 : vector<4x256xf32>
    %c0_54 = arith.constant 0 : index
    %c0_55 = arith.constant 0 : index
    %114 = vector.load %arg9[%c0_54, %c0_55] : memref<256x256xf32, #tpu.memory_space<vmem>>, vector<256x256xf32>
    %cst_56 = arith.constant dense<0.000000e+00> : vector<4x256xf32>
    %115 = tpu.matmul %113, %114, %cst_56 {dimension_numbers = #tpu.dot_dimension_numbers<[1], [0], [0], [1], [0, 0, 1, 1], [], []>} : vector<4x256xf32>, vector<256x256xf32>, vector<4x256xf32> -> vector<4x256xf32>
    %c0_57 = arith.constant 0 : index
    %c0_58 = arith.constant 0 : index
    %116 = vector.load %arg10[%c0_57, %c0_58] : memref<1x256xf32, #tpu.memory_space<vmem>>, vector<1x256xf32>
    %117 = vector.broadcast %116 : vector<1x256xf32> to vector<4x256xf32>
    %118 = arith.addf %115, %117 : vector<4x256xf32>
    %cst_59 = arith.constant 0.000000e+00 : f32
    %119 = vector.broadcast %cst_59 : f32 to vector<4x256xf32>
    %120 = arith.maximumf %118, %119 : vector<4x256xf32>
    %c0_60 = arith.constant 0 : index
    %c0_61 = arith.constant 0 : index
    %121 = vector.load %arg11[%c0_60, %c0_61] : memref<256x256xf32, #tpu.memory_space<vmem>>, vector<256x256xf32>
    %cst_62 = arith.constant dense<0.000000e+00> : vector<4x256xf32>
    %122 = tpu.matmul %120, %121, %cst_62 {dimension_numbers = #tpu.dot_dimension_numbers<[1], [0], [0], [1], [0, 0, 1, 1], [], []>} : vector<4x256xf32>, vector<256x256xf32>, vector<4x256xf32> -> vector<4x256xf32>
    %c0_63 = arith.constant 0 : index
    %c0_64 = arith.constant 0 : index
    %123 = vector.load %arg12[%c0_63, %c0_64] : memref<1x256xf32, #tpu.memory_space<vmem>>, vector<1x256xf32>
    %124 = vector.broadcast %123 : vector<1x256xf32> to vector<4x256xf32>
    %125 = arith.addf %122, %124 : vector<4x256xf32>
    %126 = arith.addf %94, %110 : vector<4x256xf32>
    %cst_65 = arith.constant 3.000000e+00 : f32
    %127 = vector.broadcast %cst_65 : f32 to vector<4x256xf32>
    %128 = arith.mulf %127, %126 : vector<4x256xf32>
    %129 = arith.addf %79, %128 : vector<4x256xf32>
    %130 = arith.addf %129, %125 : vector<4x256xf32>
    %cst_66 = arith.constant 1.250000e-01 : f32
    %131 = vector.broadcast %cst_66 : f32 to vector<4x256xf32>
    %132 = arith.mulf %130, %131 : vector<4x256xf32>
    %133 = arith.addf %67, %132 : vector<4x256xf32>
    %c0_67 = arith.constant 0 : index
    %c0_68 = arith.constant 0 : index
    %134 = vector.load %arg13[%c0_67, %c0_68] : memref<256x4xf32, #tpu.memory_space<vmem>>, vector<256x4xf32>
    %cst_69 = arith.constant dense<0.000000e+00> : vector<4x4xf32>
    %135 = tpu.matmul %133, %134, %cst_69 {dimension_numbers = #tpu.dot_dimension_numbers<[1], [0], [0], [1], [0, 0, 1, 1], [], []>} : vector<4x256xf32>, vector<256x4xf32>, vector<4x4xf32> -> vector<4x4xf32>
    %c0_70 = arith.constant 0 : index
    %c0_71 = arith.constant 0 : index
    %136 = vector.load %arg14[%c0_70, %c0_71] : memref<1x4xf32, #tpu.memory_space<vmem>>, vector<1x4xf32>
    %137 = vector.broadcast %136 : vector<1x4xf32> to vector<4x4xf32>
    %138 = arith.addf %135, %137 : vector<4x4xf32>
    %139 = vector.shape_cast %138 : vector<4x4xf32> to vector<1x4x4xf32>
    %c0_72 = arith.constant 0 : index
    %c0_73 = arith.constant 0 : index
    %c0_74 = arith.constant 0 : index
    %140 = vector.load %arg15[%c0_72, %c0_73, %c0_74] : memref<1x4x4xf32, #tpu.memory_space<vmem>>, vector<1x4x4xf32>
    tpu.vector_store %arg15[%c0_72, %c0_73, %c0_74], %139 {strides = array<i32>} : memref<1x4x4xf32, #tpu.memory_space<vmem>>, vector<1x4x4xf32>,
    return
  }
  func.func @transform_0(%arg0: i32) -> (i32, i32, i32) {
    %c0_i32 = arith.constant 0 : i32
    %c0_i32_0 = arith.constant 0 : i32
    %c0_i32_1 = arith.constant 0 : i32
    return %arg0, %c0_i32, %c0_i32_0 : i32, i32, i32
  }
  func.func @transform_1(%arg0: i32) -> (i32, i32) {
    %c0_i32 = arith.constant 0 : i32
    %c0_i32_0 = arith.constant 0 : i32
    %c0_i32_1 = arith.constant 0 : i32
    return %c0_i32, %c0_i32_0 : i32, i32
  }
  func.func @transform_2(%arg0: i32) -> (i32, i32) {
    %c0_i32 = arith.constant 0 : i32
    %c0_i32_0 = arith.constant 0 : i32
    %c0_i32_1 = arith.constant 0 : i32
    return %c0_i32, %c0_i32_0 : i32, i32
  }
  func.func @transform_3(%arg0: i32) -> (i32, i32) {
    %c0_i32 = arith.constant 0 : i32
    %c0_i32_0 = arith.constant 0 : i32
    %c0_i32_1 = arith.constant 0 : i32
    return %c0_i32, %c0_i32_0 : i32, i32
  }
  func.func @transform_4(%arg0: i32) -> (i32, i32) {
    %c0_i32 = arith.constant 0 : i32
    %c0_i32_0 = arith.constant 0 : i32
    %c0_i32_1 = arith.constant 0 : i32
    return %c0_i32, %c0_i32_0 : i32, i32
  }
  func.func @transform_5(%arg0: i32) -> (i32, i32) {
    %c0_i32 = arith.constant 0 : i32
    %c0_i32_0 = arith.constant 0 : i32
    %c0_i32_1 = arith.constant 0 : i32
    return %c0_i32, %c0_i32_0 : i32, i32
  }
  func.func @transform_6(%arg0: i32) -> (i32, i32) {
    %c0_i32 = arith.constant 0 : i32
    %c0_i32_0 = arith.constant 0 : i32
    %c0_i32_1 = arith.constant 0 : i32
    return %c0_i32, %c0_i32_0 : i32, i32
  }
  func.func @transform_7(%arg0: i32) -> (i32, i32) {
    %c0_i32 = arith.constant 0 : i32
    %c0_i32_0 = arith.constant 0 : i32
    %c0_i32_1 = arith.constant 0 : i32
    return %c0_i32, %c0_i32_0 : i32, i32
  }
  func.func @transform_8(%arg0: i32) -> (i32, i32) {
    %c0_i32 = arith.constant 0 : i32
    %c0_i32_0 = arith.constant 0 : i32
    %c0_i32_1 = arith.constant 0 : i32
    return %c0_i32, %c0_i32_0 : i32, i32
  }
  func.func @transform_9(%arg0: i32) -> (i32, i32) {
    %c0_i32 = arith.constant 0 : i32
    %c0_i32_0 = arith.constant 0 : i32
    %c0_i32_1 = arith.constant 0 : i32
    return %c0_i32, %c0_i32_0 : i32, i32
  }
  func.func @transform_10(%arg0: i32) -> (i32, i32) {
    %c0_i32 = arith.constant 0 : i32
    %c0_i32_0 = arith.constant 0 : i32
    %c0_i32_1 = arith.constant 0 : i32
    return %c0_i32, %c0_i32_0 : i32, i32
  }
  func.func @transform_11(%arg0: i32) -> (i32, i32) {
    %c0_i32 = arith.constant 0 : i32
    %c0_i32_0 = arith.constant 0 : i32
    %c0_i32_1 = arith.constant 0 : i32
    return %c0_i32, %c0_i32_0 : i32, i32
  }
  func.func @transform_12(%arg0: i32) -> (i32, i32) {
    %c0_i32 = arith.constant 0 : i32
    %c0_i32_0 = arith.constant 0 : i32
    %c0_i32_1 = arith.constant 0 : i32
    return %c0_i32, %c0_i32_0 : i32, i32
  }
  func.func @transform_13(%arg0: i32) -> (i32, i32) {
    %c0_i32 = arith.constant 0 : i32
    %c0_i32_0 = arith.constant 0 : i32
    %c0_i32_1 = arith.constant 0 : i32
    return %c0_i32, %c0_i32_0 : i32, i32
  }
  func.func @transform_14(%arg0: i32) -> (i32, i32, i32) {
    %c0_i32 = arith.constant 0 : i32
    %c0_i32_0 = arith.constant 0 : i32
    %c0_i32_1 = arith.constant 0 : i32
    return %arg0, %c0_i32, %c0_i32_0 : i32, i32, i32
  }
}

</mosaic_0001>

<bundles_post_ra>
// kernel: tpu_custom_call.1
= control target key start
LH: loop header
LB: loop body
LE: loop exit
PB: predicated region body
PF: predicated region fallthrough
CT: control target
= control target key end

     0   :  { %s3852_s0 = inlined_call_operand.vmem [shape: f32[2,4,8], index: 0, kind: input, shape index: {}]   ;;  %s3853_s1 = inlined_call_operand.vmem [shape: f32[1,128], index: 1, kind: input, shape index: {}]   ;;  %s3854_s2 = inlined_call_operand.vmem [shape: f32[1,128], index: 2, kind: input, shape index: {}]   ;;  %s3855_s3 = inlined_call_operand.vmem [shape: f32[1,128], index: 3, kind: input, shape index: {}]   ;;  %s3856_s4 = inlined_call_operand.vmem [shape: f32[4,128], index: 4, kind: input, shape index: {}]   ;;  %s3857_s5 = inlined_call_operand.vmem [shape: f32[4,4], index: 5, kind: input, shape index: {}]   ;;  %s3858_s6 = inlined_call_operand.hbm [shape: f32[1024,256], index: 6, kind: input, shape index: {}]   ;;  %s3859_s7 = inlined_call_operand.vmem [shape: f32[1,256], index: 7, kind: input, shape index: {}]   ;;  %s3860_s8 = inlined_call_operand.hbm [shape: f32[256,256], index: 8, kind: input, shape index: {}]   ;;  %s3861_s9 = inlined_call_operand.vmem [shape: f32[1,256], index: 9, kind: input, shape index: {}]   ;;  %s3862_s10 = inlined_call_operand.hbm [shape: f32[256,256], index: 10, kind: input, shape index: {}]   ;;  %s3863_s11 = inlined_call_operand.vmem [shape: f32[1,256], index: 11, kind: input, shape index: {}]   ;;  %s3864_s12 = inlined_call_operand.vmem [shape: f32[256,4], index: 12, kind: input, shape index: {}]   ;;  %s3865_s13 = inlined_call_operand.vmem [shape: f32[1,4], index: 13, kind: input, shape index: {}]   ;;  %s3866_s14 = inlined_call_operand.hbm [shape: f32[2,4,4], index: 14, kind: output, shape index: {}]  }
   0x1   :  { %4053 = sst [smem:[#allocation118_spill]] %s3858_s6 }
   0x2   :  { %4054 = sst [smem:[#allocation119_spill]] %s3860_s8 }
   0x3   :  { %19 = vsyncpa [#allocation3], 0 }
   0x4   :  { %20 = vsyncpa [#allocation6], 0 }
   0x5   :  { %21 = vsyncpa [#allocation4], 0 }
   0x6   :  { %23 = vsyncpa [#allocation4 + $0x1], 0  ;;  %s2749_s29 = smov 0   ;;  %s2751_s30 = smov 0  }
   0x7   :  { %s2753_s15 = smov 0   ;;  %s2755_s16 = smov 0  }
   0x8 LB: > { %4055 = sst [smem:[#allocation12_spill]] %s2648_s29  ;;  %s2770_s17 = sadd.s32 4294967295, %s2660_s16   ;;  %s2660_s16 = sphi %s2755_s16, %s4319_s16   ;;  %s2656_s15 = sphi %s2753_s15, %s4324_s15   ;;  %s2652_s30 = sphi %s2751_s30, %s4323_s30   ;;  %s2648_s29 = sphi %s2749_s29, %s4322_s29  }
   0x9   : > { %4056 = sst [smem:[#allocation13_spill]] %s2656_s15  ;;  %s2289_s18 = sadd.s32 4294967294, %s2660_s16  }
   0xa   : > { %4057 = sst [smem:[#allocation14_spill]] %s2660_s16  ;;  %s2774_s19 = sadd.s32 1, %s2660_s16  }
   0xb   : > { %4058 = sst [smem:[#allocation15_spill]] %s2774_s19  ;;  %s335_s20 = sadd.s32 1, %s2656_s15 }
   0xc   : > { %s332_s21 = ssub.s32 %s2660_s16, %s2774_s19  ;;  %p345_p0 = scmp.ne.s32.totalorder %s2656_s15, %s2652_s30 }
   0xd   : > { %p333_p1 = scmp.eq.s32.totalorder %s332_s21, 0  ;;  %p346_p2 = scmp.eq.s32.totalorder %s2770_s17, 1 }
   0xe   : > { %p351_p3 = scmp.ne.s32.totalorder %s2652_s30, %s2648_s29  ;;  %p352_p4 = scmp.eq.s32.totalorder %s2289_s18, 1 }
   0xf   : > { %s2785_s22 = scalar_select %p333_p1, %s2656_s15, %s335_s20  }
  0x10   : > { %p2787_p5 = por %p346_p2, %p345_p0  ;;  %p2791_p6 = por %p352_p4, %p351_p3 }
  0x11   : > { %4059 = sst [smem:[#allocation16_spill]] %s2785_s22  ;;  %p2290_p7 = scmp.ge.s32.totalorder %s2660_s16, 1 }
  0x12   : > { %s4061_s24 = scalar_select %p2791_p6, 1, 0 }
  0x13   : > { %p359_p8 = scmp.lt.s32.totalorder %s2660_s16, 3  ;;  %p2349_p9 = scmp.eq.s32.totalorder %s2770_s17, 0 }
  0x14   : > { %4062 = sst [smem:[#allocation17_spill]] %s4061_s24  ;;  %s2662_s15 = smov [#allocation5]  }
  0x15   : > { %p2798_p10 = pnand %p2290_p7, %p359_p8  ;;  %s4064_s8 = sld [smem:[#allocation119_spill]] }
  0x16   : > { %s4065_s6 = sld [smem:[#allocation118_spill]]  ;;  %s404_s19 = sshll.u32 %s2662_s15, 4  ;;  %s405_s19 = int_to_ptr.vmem [resolvable:$true] %s404_s19 }
  0x17   : > { %p2335_p11 = pneg %p2798_p10  ;;  %s2663_s26 = smov 256  }
  0x18   : > { %s2664_s27 = smov 16   ;;  %s2666_s29 = smov [#allocation7]  }
  0x19   : > { %p2812_p12 = pnand %p2349_p9, %p2335_p11  ;;  %s421_s16 = sshll.u32 %s2666_s29, 4  ;;  %s422_s16 = int_to_ptr.vmem [resolvable:$true] %s421_s16 }
  0x1b   : > { %s402_s28 = sshll.u32 %s4064_s8, 4  ;;  %s2665_s8 = smov [#allocation2]   ;;  %s403_s28 = int_to_ptr.hbm [resolvable:$true] %s402_s28 }
  0x1c   : > { %s385_s21 = sshll.u32 %s4065_s6, 4  ;;  %s387_s24 = sshll.u32 %s2665_s8, 4  ;;  %s386_s21 = int_to_ptr.hbm [resolvable:$true] %s385_s21  ;;  %s388_s24 = int_to_ptr.vmem [resolvable:$true] %s387_s24 }
  0x1d   : > { %2341 = dma.hbm_to_vmem [thread:$0]  (!%p2812_p12), %s403_s28, 8192, %s405_s19, [#allocation6], %s2663_s26, %s2663_s26, %s2664_s27  }
  0x1e   : > { %s419_s6 = sshll.u32 %s3862_s10, 4  ;;  %453 = sbr.rel (%p2798_p10) target bundleno = 1756 (0x6dc), region = 76  ;;  %s420_s6 = int_to_ptr.hbm [resolvable:$true] %s419_s6 }
  0x1f   : > { %2338 = dma.hbm_to_vmem [thread:$0]  (!%p2812_p12), %s386_s21, 32768, %s388_s24, [#allocation3], %s2663_s26, %s2663_s26, %s2664_s27  }
  0x20   : > { %2344 = dma.hbm_to_vmem [thread:$0]  (!%p2812_p12), %s420_s6, 8192, %s422_s16, [#allocation6], %s2663_s26, %s2663_s26, %s2664_s27  }
  0x23   : > { %2635 = dma.done.wait (%p2349_p9), [#allocation3], 32768  }
  0x24   : > { %2637 = vsyncadd (%p2349_p9), [#allocation3], 4294934528 }
  0x25   : > { %2639 = dma.done.wait (%p2349_p9), [#allocation6], 16384  }
  0x26   : > { %2641 = vsyncadd (%p2349_p9), [#allocation6], 4294950912  ;;  %v2667_v0 = vmov 0   ;;  %v2668_v1 = vmov 2   ;;  %v567_v2 = vlaneseq  ;;  %v514_v4 = vld [vmem:[%s3857_s5] sm:$0xf] }
  0x27   : > { %2400 = vset.pattern.permute.xlu0 %v2667_v0  ;;  %2402 = vset.pattern.permute.xlu1 %v2668_v1  ;;  %v2669_v5 = vmov 1   ;;  %v2670_v6 = vmov 3   ;;  %p509_p13 = scmp.lt.s32.totalorder %s2770_s17, 1  ;;  %vm545_vm0 = vcmask 60416   ;;  %v803_v27 = vld [vmem:[#allocation2 + $0x2f0] sm:$0xff]  ;;  %v801_v29 = vld [vmem:[#allocation2 + $0x2e0] sm:$0xff] }
  0x28   : > { %v568_v3 = vshrl.u32 %v567_v2, 7  ;;  %517 = vperm.xlu0 %2400, %v514_v4   ;;  %531 = vperm.xlu1 %2402, %v514_v4   ;;  %v739_v28 = vld [vmem:[#allocation2 + $0xf0] sm:$0xff]  ;;  %v737_v31 = vld [vmem:[#allocation2 + $0xe0] sm:$0xff]  ;;  %vm653_vm2 = vcmask 1047556   ;;  %s506_s21 = sand.u32 1, %s2652_s30   ;;  %s2318_s27 = sshll.u32 %s2770_s17, 2 }
  0x29   : > { %s510_s29 = scalar_select %p509_p13, %s2770_s17, 1  ;;  %v835_v30 = vld [vmem:[#allocation2 + $0x3f0] sm:$0xff]  ;;  %1011 = vmatpush.msra.mxu2 %v803_v27  ;;  %971 = vmatpush.msra.mxu0 %v739_v28  ;;  %v833_v33 = vld [vmem:[#allocation2 + $0x3e0] sm:$0xff]  ;;  %vm2895_vm3 = vmneg %vm653_vm2  ;;  %vm2181_vm4 = vcmask 27648  }
  0x2a   : > { %2405 = vset.pattern.permute.xlu2 %v568_v3  ;;  %v771_v32 = vld [vmem:[#allocation2 + $0x1f0] sm:$0xff]  ;;  %1031 = vmatpush.msra.mxu3 %v835_v30  ;;  %v769_v36 = vld [vmem:[#allocation2 + $0x1e0] sm:$0xff]  ;;  %s2299_s26 = sshll.u32 %s506_s21, 2  ;;  %s2184_s17 = scalar_lea.sflag [#allocation4], %s506_s21 }
  0x2b   : > { %s2300_s15 = sshll.u32 %s510_s29, 2  ;;  %991 = vmatpush.msra.mxu1 %v771_v32  ;;  %v799_v34 = vld [vmem:[#allocation2 + $0x2d0] sm:$0xff]  ;;  %1012 = vmatpush.msra.mxu2 %v801_v29  ;;  %v797_v39 = vld [vmem:[#allocation2 + $0x2c0] sm:$0xff]  ;;  %s2194_s29 = scalar_lea.hbm %s3866_s14, %s2318_s27 }
  0x2c   : > { %s512_s22 = scalar_lea.vmem %s3852_s0, %s2300_s15  ;;  %v735_v35 = vld [vmem:[#allocation2 + $0xd0] sm:$0xff]  ;;  %972 = vmatpush.msra.mxu0 %v737_v31  ;;  %1032 = vmatpush.msra.mxu3 %v833_v33  ;;  %v733_v40 = vld [vmem:[#allocation2 + $0xc0] sm:$0xff]  ;;  %s508_s15 = scalar_lea.vmem [#allocation8], %s2299_s26 }
  0x2d   : > { %v2843_v7 = vld [vmem:[%s512_s22] sm:$0xf]  ;;  %v831_v37 = vld [vmem:[#allocation2 + $0x3d0] sm:$0xff]  ;;  %992 = vmatpush.msra.mxu1 %v769_v36  ;;  %1013 = vmatpush.msra.mxu2 %v799_v34  ;;  %s2196_s16 = sshll.u32 %s508_s15, 4  ;;  %s2198_s19 = sshll.u32 %s2194_s29, 4  ;;  %s2197_s16 = int_to_ptr.vmem [resolvable:$true] %s2196_s16  ;;  %s2199_s19 = int_to_ptr.hbm [resolvable:$true] %s2198_s19 }
  0x2e   : > { %v534_v8 = vperm.slane %v2843_v7, 2  ;;  %v520_v9 = vperm.slane %v2843_v7, 0  ;;  %v527_v12 = vperm.slane %v2843_v7, 1  ;;  %v541_v13 = vperm.slane %v2843_v7, 3  ;;  %v767_v38 = vld [vmem:[#allocation2 + $0x1d0] sm:$0xff]  ;;  %973 = vmatpush.msra.mxu0 %v735_v35  ;;  %1033 = vmatpush.msra.mxu3 %v831_v37  ;;  %v829_v43 = vld [vmem:[#allocation2 + $0x3c0] sm:$0xff] }
  0x2f   : > { %993 = vmatpush.msra.mxu1 %v767_v38  ;;  %v795_v42 = vld [vmem:[#allocation2 + $0x2b0] sm:$0xff]  ;;  %1014 = vmatpush.msra.mxu2 %v797_v39  ;;  %v765_v45 = vld [vmem:[#allocation2 + $0x1c0] sm:$0xff]  ;;  %v2671_v37 = vmov 8.0   ;;  %s2604_s22 = sshra.s32 %s2199_s19, 4  ;;  %s2610_s26 = scalar_lea.hbm %s3866_s14, 8  ;;  %s2605_s22 = int_to_ptr.hbm [resolvable:$true] %s2604_s22 }
  0x30   : > { %2401 = vset.pattern.permute.xlu0 %v2669_v5  ;;  %2403 = vset.pattern.permute.xlu1 %v2670_v6  ;;  %v731_v44 = vld [vmem:[#allocation2 + $0xb0] sm:$0xff]  ;;  %v793_v46 = vld [vmem:[#allocation2 + $0x2a0] sm:$0xff]  ;;  %2411 = vrcp.f32 %v2671_v37  ;;  %s2606_s24 = scalar_lea.hbm %s2605_s22, 4  ;;  %p2611_p3 = scmp.lt.s32.totalorder %s2605_s22, %s3866_s14 }
  0x31   : > { %524 = vperm.xlu0 %2401, %v514_v4   ;;  %538 = vperm.xlu1 %2403, %v514_v4   ;;  %v827_v47 = vld [vmem:[#allocation2 + $0x3b0] sm:$0xff]  ;;  %v729_v48 = vld [vmem:[#allocation2 + $0xa0] sm:$0xff]  ;;  %p2607_p0 = scmp.ne.s32.totalorder %s2605_s22, %s2606_s24  ;;  %p2612_p4 = scmp.lt.s32.totalorder %s2610_s26, %s2606_s24 }
  0x32   : > { %974 = vmatpush.msra.mxu0 %v733_v40  ;;  %1015 = vmatpush.msra.mxu2 %v795_v42  ;;  %v763_v49 = vld [vmem:[#allocation2 + $0x1b0] sm:$0xff]  ;;  %v825_v51 = vld [vmem:[#allocation2 + $0x3a0] sm:$0xff] }
  0x33   : > { %1034 = vmatpush.msra.mxu3 %v829_v43  ;;  %994 = vmatpush.msra.mxu1 %v765_v45  ;;  %v791_v50 = vld [vmem:[#allocation2 + $0x290] sm:$0xff]  ;;  %v761_v53 = vld [vmem:[#allocation2 + $0x1a0] sm:$0xff]  ;;  %p2608_p1 = pnand %p2607_p0, %p2787_p5  ;;  %p2613_p7 = por %p2612_p4, %p2611_p3 }
  0x34   : > { %975 = vmatpush.msra.mxu0 %v731_v44  ;;  %1016 = vmatpush.msra.mxu2 %v793_v46  ;;  %v727_v52 = vld [vmem:[#allocation2 + $0x90] sm:$0xff]  ;;  %v789_v54 = vld [vmem:[#allocation2 + $0x280] sm:$0xff] }
  0x35   : > { %1035 = vmatpush.msra.mxu3 %v827_v47  ;;  %995 = vmatpush.msra.mxu1 %v763_v49  ;;  %v823_v55 = vld [vmem:[#allocation2 + $0x390] sm:$0xff]  ;;  %v725_v57 = vld [vmem:[#allocation2 + $0x80] sm:$0xff]  ;;  %p2609_p2 = pneg %p2608_p1 }
  0x36   : > { %976 = vmatpush.msra.mxu0 %v729_v48  ;;  %1017 = vmatpush.msra.mxu2 %v791_v50  ;;  %v759_v58 = vld [vmem:[#allocation2 + $0x190] sm:$0xff]  ;;  %v821_v60 = vld [vmem:[#allocation2 + $0x380] sm:$0xff]  ;;  %v2861_v50 = vpop.eup %2411 }
  0x37   : > { %1036 = vmatpush.msra.mxu3 %v825_v51  ;;  %996 = vmatpush.msra.mxu1 %v761_v53  ;;  %v787_v59 = vld [vmem:[#allocation2 + $0x270] sm:$0xff]  ;;  %v757_v62 = vld [vmem:[#allocation2 + $0x180] sm:$0xff]  ;;  %vm554_vm1 = vweird.f32 %v2861_v50  ;;  %p2614_p8 = pnand %p2613_p7, %p2609_p2 }
  0x38   : > { %977 = vmatpush.msra.mxu0 %v727_v52  ;;  %1018 = vmatpush.msra.mxu2 %v789_v54  ;;  %v723_v61 = vld [vmem:[#allocation2 + $0x70] sm:$0xff]  ;;  %v785_v63 = vld [vmem:[#allocation2 + $0x260] sm:$0xff] }
  0x39   : > { %2404 = vset.pattern.permute.xlu1 %v568_v3  ;;  %2406 = vset.pattern.permute.xlu0 %v568_v3  ;;  %v819_v0 = vld [vmem:[#allocation2 + $0x370] sm:$0xff]  ;;  %v721_v1 = vld [vmem:[#allocation2 + $0x60] sm:$0xff] }
  0x3a   : > { %1037 = vmatpush.msra.mxu3 %v823_v55  ;;  %978 = vmatpush.msra.mxu0 %v725_v57  ;;  %v755_v2 = vld [vmem:[#allocation2 + $0x170] sm:$0xff]  ;;  %v817_v4 = vld [vmem:[#allocation2 + $0x360] sm:$0xff] }
  0x3b   : > { %997 = vmatpush.msra.mxu1 %v759_v58  ;;  %1019 = vmatpush.msra.mxu2 %v787_v59  ;;  %v783_v3 = vld [vmem:[#allocation2 + $0x250] sm:$0xff]  ;;  %v753_v6 = vld [vmem:[#allocation2 + $0x160] sm:$0xff]  ;;  %v550_v59 = vmul.f32 8.0, %v2861_v50 }
  0x3c   : > { %1038 = vmatpush.msra.mxu3 %v821_v60  ;;  %979 = vmatpush.msra.mxu0 %v723_v61  ;;  %v719_v5 = vld [vmem:[#allocation2 + $0x50] sm:$0xff]  ;;  %v805_v28 = vld [vmem:[#allocation2 + $0x300] sm:$0xff] }
  0x3d   : > { %998 = vmatpush.msra.mxu1 %v757_v62  ;;  %1020 = vmatpush.msra.mxu2 %v785_v63  ;;  %v743_v27 = vld [vmem:[#allocation2 + $0x110] sm:$0xff]  ;;  %v929_v30 = vld [vmem:[#allocation2 + $0x6e0] sm:$0xff] }
  0x3e   : > { %1039 = vmatpush.msra.mxu3 %v819_v0  ;;  %980 = vmatpush.msra.mxu0 %v721_v1  ;;  %v867_v29 = vld [vmem:[#allocation2 + $0x4f0] sm:$0xff]  ;;  %v741_v32 = vld [vmem:[#allocation2 + $0x100] sm:$0xff]  ;;  %v551_v1 = vsub.f32 1.0, %v550_v59 }
  0x3f   : > { %999 = vmatpush.msra.mxu1 %v755_v2  ;;  %1021 = vmatpush.msra.mxu2 %v783_v3  ;;  %v963_v31 = vld [vmem:[#allocation2 + $0x7f0] sm:$0xff]  ;;  %v865_v33 = vld [vmem:[#allocation2 + $0x4e0] sm:$0xff] }
  0x40   : > { %1040 = vmatpush.msra.mxu3 %v817_v4  ;;  %981 = vmatpush.msra.mxu0 %v719_v5  ;;  %v899_v34 = vld [vmem:[#allocation2 + $0x5f0] sm:$0xff]  ;;  %v961_v36 = vld [vmem:[#allocation2 + $0x7e0] sm:$0xff] }
  0x41   : > { %617 = vperm.xlu1 %2404, %v534_v8   ;;  %1000 = vmatpush.msra.mxu1 %v753_v6  ;;  %v927_v35 = vld [vmem:[#allocation2 + $0x6d0] sm:$0xff]  ;;  %v897_v39 = vld [vmem:[#allocation2 + $0x5e0] sm:$0xff] }
  0x42   : > { %v863_v38 = vld [vmem:[#allocation2 + $0x4d0] sm:$0xff]  ;;  %v925_v40 = vld [vmem:[#allocation2 + $0x6c0] sm:$0xff] }
  0x43   : > { %v861_v42 = vld [vmem:[#allocation2 + $0x4c0] sm:$0xff]  ;;  %v895_v43 = vld [vmem:[#allocation2 + $0x5d0] sm:$0xff] }
  0x44   : > { %v923_v44 = vld [vmem:[#allocation2 + $0x6b0] sm:$0xff]  ;;  %v957_v45 = vld [vmem:[#allocation2 + $0x7c0] sm:$0xff] }
  0x45   : > { %v859_v46 = vld [vmem:[#allocation2 + $0x4b0] sm:$0xff]  ;;  %v893_v47 = vld [vmem:[#allocation2 + $0x5c0] sm:$0xff] }
  0x46   : > { %v921_v48 = vld [vmem:[#allocation2 + $0x6a0] sm:$0xff]  ;;  %v955_v49 = vld [vmem:[#allocation2 + $0x7b0] sm:$0xff] }
  0x47   : > { %v857_v52 = vld [vmem:[#allocation2 + $0x4a0] sm:$0xff]  ;;  %v891_v53 = vld [vmem:[#allocation2 + $0x5b0] sm:$0xff] }
  0x48   : > { %v919_v54 = vld [vmem:[#allocation2 + $0x690] sm:$0xff]  ;;  %v953_v55 = vld [vmem:[#allocation2 + $0x7a0] sm:$0xff] }
  0x49   : > { %605 = vperm.xlu1 %2404, %v520_v9   ;;  %v889_v57 = vld [vmem:[#allocation2 + $0x5a0] sm:$0xff]  ;;  %v951_v60 = vld [vmem:[#allocation2 + $0x790] sm:$0xff] }
  0x4a   : > { %v917_v58 = vld [vmem:[#allocation2 + $0x680] sm:$0xff]  ;;  %v887_v62 = vld [vmem:[#allocation2 + $0x590] sm:$0xff] }
  0x4b   : > { %v853_v61 = vld [vmem:[#allocation2 + $0x480] sm:$0xff]  ;;  %v915_v63 = vld [vmem:[#allocation2 + $0x670] sm:$0xff] }
  0x4c   : > { %v949_v0 = vld [vmem:[#allocation2 + $0x780] sm:$0xff]  ;;  %v851_v2 = vld [vmem:[#allocation2 + $0x470] sm:$0xff] }
  0x4d   : > { %v885_v3 = vld [vmem:[#allocation2 + $0x580] sm:$0xff]  ;;  %v947_v5 = vld [vmem:[#allocation2 + $0x770] sm:$0xff] }
  0x4e   : > { %v913_v4 = vld [vmem:[#allocation2 + $0x660] sm:$0xff] }
  0x4f   : > { %v849_v6 = vld [vmem:[#allocation2 + $0x460] sm:$0xff] }
  0x9a   : > { %v518_v10 = vpop.permute.xlu0 %517  ;;  %v532_v11 = vpop.permute.xlu1 %531 }
  0x9b   : > { %v521_v16 = vmul.f32 %v520_v9, %v518_v10  ;;  %v535_v18 = vmul.f32 %v534_v8, %v532_v11  ;;  %v815_v8 = vld [vmem:[#allocation2 + $0x350] sm:$0xff]  ;;  %v717_v9 = vld [vmem:[#allocation2 + $0x40] sm:$0xff] }
  0x9c   : > { %1041 = vmatpush.msra.mxu3 %v815_v8  ;;  %v751_v10 = vld [vmem:[#allocation2 + $0x150] sm:$0xff]  ;;  %982 = vmatpush.msra.mxu0 %v717_v9 }
  0x9d   : > { %v779_v11 = vld [vmem:[#allocation2 + $0x230] sm:$0xff]  ;;  %1001 = vmatpush.msra.mxu1 %v751_v10  ;;  %v945_v10 = vld [vmem:[#allocation2 + $0x760] sm:$0xff] }
  0x9e   : > { %v911_v8 = vld [vmem:[#allocation2 + $0x650] sm:$0xff] }
  0xa3   : > { %v525_v14 = vpop.permute.xlu0 %524  ;;  %v539_v15 = vpop.permute.xlu1 %538 }
  0xa4   : > { %v528_v17 = vmul.f32 %v527_v12, %v525_v14  ;;  %v542_v20 = vmul.f32 %v541_v13, %v539_v15  ;;  %v749_v14 = vld [vmem:[#allocation2 + $0x140] sm:$0xff] }
  0xa5   : > { %v777_v15 = vld [vmem:[#allocation2 + $0x220] sm:$0xff]  ;;  %1002 = vmatpush.msra.mxu1 %v749_v14 }
  0xa6   : > { %v529_v19 = vadd.f32 %v528_v17, %v521_v16  ;;  %v811_v16 = vld [vmem:[#allocation2 + $0x330] sm:$0xff]  ;;  %v713_v17 = vld [vmem:[#allocation2 + $0x20] sm:$0xff] }
  0xa7   : > { %v909_v14 = vld [vmem:[#allocation2 + $0x640] sm:$0xff] }
  0xa8   : > { %v536_v21 = vadd.f32 %v535_v18, %v529_v19  ;;  %v747_v18 = vld [vmem:[#allocation2 + $0x130] sm:$0xff] }
  0xa9   : > { %v775_v19 = vld [vmem:[#allocation2 + $0x210] sm:$0xff]  ;;  %1003 = vmatpush.msra.mxu1 %v747_v18 }
  0xaa   : > { %v543_v22 = vadd.f32 %v542_v20, %v536_v21  ;;  %v809_v20 = vld [vmem:[#allocation2 + $0x320] sm:$0xff]  ;;  %v711_v21 = vld [vmem:[#allocation2 + $0x10] sm:$0xff] }
  0xab   : > { %v907_v18 = vld [vmem:[#allocation2 + $0x630] sm:$0xff] }
  0xac   : > { %v2852_v23 = vadd.f32 %v543_v22, %v2843_v7  ;;  %v781_v7 = vld [vmem:[#allocation2 + $0x240] sm:$0xff] }
  0xad   : > { %1022 = vmatpush.msra.mxu2 %v781_v7  ;;  %v745_v22 = vld [vmem:[#allocation2 + $0x120] sm:$0xff]  ;;  %v883_v7 = vld [vmem:[#allocation2 + $0x570] sm:$0xff] }
  0xae   : > { %v546_v24 = vsel %vm545_vm0, %v2852_v23, 0.0  ;;  %v587_v25 = vperm.slane %v2852_v23, 3  ;;  %v566_v26 = vperm.slane %v2852_v23, 0  ;;  %v573_v41 = vperm.slane %v2852_v23, 1  ;;  %1004 = vmatpush.msra.mxu1 %v745_v22  ;;  %v905_v22 = vld [vmem:[#allocation2 + $0x620] sm:$0xff] }
  0xaf   : > { %547 = vadd.xlane.f32.xlu2 %v546_v24  ;;  %v580_v56 = vperm.slane %v2852_v23, 2  ;;  %1023 = vmatpush.msra.mxu2 %v779_v11  ;;  %v773_v23 = vld [vmem:[#allocation2 + $0x200] sm:$0xff]  ;;  %v807_v24 = vld [vmem:[#allocation2 + $0x310] sm:$0xff]  ;;  %v552_v11 = vmul.f32 %v2861_v50, %v551_v1 }
  0xb0   : > { %592 = vperm.xlu1 %2404, %v587_v25   ;;  %571 = vperm.xlu0 %2406, %v566_v26   ;;  %v931_v25 = vld [vmem:[#allocation2 + $0x6f0] sm:$0xff]  ;;  %v709_v26 = vld [vmem:[#allocation2] sm:$0xff] }
  0xb1   : > { %1024 = vmatpush.msra.mxu2 %v777_v15  ;;  %1005 = vmatpush.msra.mxu1 %v743_v27  ;;  %v943_v15 = vld [vmem:[#allocation2 + $0x750] sm:$0xff] }
  0xb2   : > { %v903_v27 = vld [vmem:[#allocation2 + $0x610] sm:$0xff] }
  0xb3   : > { %1025 = vmatpush.msra.mxu2 %v775_v19  ;;  %1006 = vmatpush.msra.mxu1 %v741_v32  ;;  %v2863_v51 = vpop.permute.xlu1 %617  ;;  %v941_v19 = vld [vmem:[#allocation2 + $0x740] sm:$0xff]  ;;  %v935_v32 = vld [vmem:[#allocation2 + $0x710] sm:$0xff] }
  0xb5   : > { %1026 = vmatpush.msra.mxu2 %v773_v23  ;;  %1071 = vmatpush.msrb.mxu1 %v899_v34  ;;  %v939_v23 = vld [vmem:[#allocation2 + $0x730] sm:$0xff] }
  0xb7   : > { %1091 = vmatpush.msrb.mxu2 %v931_v25  ;;  %1072 = vmatpush.msrb.mxu1 %v897_v39  ;;  %v841_v25 = vld [vmem:[#allocation2 + $0x420] sm:$0xff]  ;;  %v871_v39 = vld [vmem:[#allocation2 + $0x510] sm:$0xff] }
  0xb8   : > { %611 = vperm.xlu1 %2404, %v527_v12   ;;  %578 = vperm.xlu0 %2406, %v573_v41   ;;  %v813_v12 = vld [vmem:[#allocation2 + $0x340] sm:$0xff]  ;;  %v959_v41 = vld [vmem:[#allocation2 + $0x7d0] sm:$0xff] }
  0xb9   : > { %1042 = vmatpush.msra.mxu3 %v813_v12  ;;  %1092 = vmatpush.msrb.mxu2 %v929_v30  ;;  %v847_v12 = vld [vmem:[#allocation2 + $0x450] sm:$0xff]  ;;  %v873_v30 = vld [vmem:[#allocation2 + $0x520] sm:$0xff] }
  0xba   : > { %1073 = vmatpush.msrb.mxu1 %v895_v43 }
  0xbb   : > { %1043 = vmatpush.msra.mxu3 %v811_v16  ;;  %1093 = vmatpush.msrb.mxu2 %v927_v35  ;;  %v2866_v9 = vpop.permute.xlu1 %605  ;;  %v845_v16 = vld [vmem:[#allocation2 + $0x440] sm:$0xff] }
  0xbc   : > { %1074 = vmatpush.msrb.mxu1 %v893_v47  ;;  %v2408_v47 = vld [vmem:[%s3853_s1] ss:$0 sm:$0xff] }
  0xbd   : > { %1044 = vmatpush.msra.mxu3 %v809_v20  ;;  %1094 = vmatpush.msrb.mxu2 %v925_v40  ;;  %v843_v20 = vld [vmem:[#allocation2 + $0x430] sm:$0xff]  ;;  %v933_v40 = vld [vmem:[#allocation2 + $0x700] sm:$0xff] }
  0xbe   : > { %1075 = vmatpush.msrb.mxu1 %v891_v53 }
  0xbf   : > { %1045 = vmatpush.msra.mxu3 %v807_v24  ;;  %1095 = vmatpush.msrb.mxu2 %v923_v44  ;;  %v553_v24 = vadd.f32 %v2861_v50, %v552_v11  ;;  %v869_v44 = vld [vmem:[#allocation2 + $0x500] sm:$0xff] }
  0xc0   : > { %1076 = vmatpush.msrb.mxu1 %v889_v57 }
  0xc1   : > { %1046 = vmatpush.msra.mxu3 %v805_v28  ;;  %1096 = vmatpush.msrb.mxu2 %v921_v48  ;;  %v937_v28 = vld [vmem:[#allocation2 + $0x720] sm:$0xff] }
  0xc2   : > { %1077 = vmatpush.msrb.mxu1 %v887_v62 }
  0xc3   : > { %1111 = vmatpush.msrb.mxu3 %v963_v31  ;;  %1097 = vmatpush.msrb.mxu2 %v919_v54  ;;  %v901_v31 = vld [vmem:[#allocation2 + $0x600] sm:$0xff] }
  0xc4   : > { %1078 = vmatpush.msrb.mxu1 %v885_v3 }
  0xc5   : > { %1112 = vmatpush.msrb.mxu3 %v961_v36  ;;  %1098 = vmatpush.msrb.mxu2 %v917_v58  ;;  %v2409_v36 = vld [vmem:[%s3855_s3] ss:$0 sm:$0xff] }
  0xc6   : > { %1079 = vmatpush.msrb.mxu1 %v883_v7 }
  0xc7   : > { %585 = vperm.xlu2 %2405, %v580_v56   ;;  %1113 = vmatpush.msrb.mxu3 %v959_v41  ;;  %v855_v56 = vld [vmem:[#allocation2 + $0x490] sm:$0xff] }
  0xc8   : > { %1099 = vmatpush.msrb.mxu2 %v915_v63 }
  0xc9   : > { %1114 = vmatpush.msrb.mxu3 %v957_v45  ;;  %v2407_v45 = vld [vmem:[%s3854_s2] ss:$0 sm:$0xff] }
  0xca   : > { %1100 = vmatpush.msrb.mxu2 %v913_v4  ;;  %v630_v53 = vmul.f32 %v2407_v45, %v2863_v51  ;;  %v2672_v4 = vmov 1983009808  }
  0xcb   : > { %1115 = vmatpush.msrb.mxu3 %v955_v49 }
  0xcc   : > { %1101 = vmatpush.msrb.mxu2 %v911_v8 }
  0xcd   : > { %1116 = vmatpush.msrb.mxu3 %v953_v55 }
  0xce   : > { %1102 = vmatpush.msrb.mxu2 %v909_v14 }
  0xcf   : > { %623 = vperm.xlu2 %2405, %v541_v13   ;;  %v715_v13 = vld [vmem:[#allocation2 + $0x30] sm:$0xff]  ;;  %1117 = vmatpush.msrb.mxu3 %v951_v60  ;;  %v628_v60 = vmul.f32 %v2407_v45, %v2866_v9 }
  0xd0   : > { %983 = vmatpush.msra.mxu0 %v715_v13  ;;  %v881_v13 = vld [vmem:[#allocation2 + $0x560] sm:$0xff]  ;;  %1103 = vmatpush.msrb.mxu2 %v907_v18 }
  0xd1   : > { %1118 = vmatpush.msrb.mxu3 %v949_v0  ;;  %1080 = vmatpush.msrb.mxu1 %v881_v13 }
  0xd2   : > { %984 = vmatpush.msra.mxu0 %v713_v17  ;;  %v879_v17 = vld [vmem:[#allocation2 + $0x550] sm:$0xff]  ;;  %1104 = vmatpush.msrb.mxu2 %v905_v22 }
  0xd3   : > { %1119 = vmatpush.msrb.mxu3 %v947_v5  ;;  %1081 = vmatpush.msrb.mxu1 %v879_v17  ;;  %v658_v5 = vunpack.c.l.s4 %v2672_v4  ;;  %v764_v4 = vld [vmem:[#allocation2 + $0x1b8] sm:$0xff] }
  0xd4   : > { %985 = vmatpush.msra.mxu0 %v711_v21  ;;  %v877_v21 = vld [vmem:[#allocation2 + $0x540] sm:$0xff]  ;;  %1105 = vmatpush.msrb.mxu2 %v903_v27 }
  0xd5   : > { %1120 = vmatpush.msrb.mxu3 %v945_v10  ;;  %1082 = vmatpush.msrb.mxu1 %v877_v21  ;;  %v659_v14 = vunpack.c.0.s8 %v658_v5  ;;  %v792_v5 = vld [vmem:[#allocation2 + $0x298] sm:$0xff] }
  0xd6   : > { %986 = vmatpush.msra.mxu0 %v709_v26  ;;  %v875_v26 = vld [vmem:[#allocation2 + $0x530] sm:$0xff]  ;;  %1106 = vmatpush.msrb.mxu2 %v901_v31 }
  0xd7   : > { %1121 = vmatpush.msrb.mxu3 %v943_v15  ;;  %1083 = vmatpush.msrb.mxu1 %v875_v26 }
  0xd8   : > { %1051 = vmatpush.msrb.mxu0 %v867_v29  ;;  %v839_v29 = vld [vmem:[#allocation2 + $0x410] sm:$0xff] }
  0xd9   : > { %1122 = vmatpush.msrb.mxu3 %v941_v19  ;;  %1084 = vmatpush.msrb.mxu1 %v873_v30 }
  0xda   : > { %1052 = vmatpush.msrb.mxu0 %v865_v33  ;;  %v555_v33 = vsel %vm554_vm1, %v2861_v50, %v553_v24 }
  0xdb   : > { %1123 = vmatpush.msrb.mxu3 %v939_v23  ;;  %1085 = vmatpush.msrb.mxu1 %v871_v39  ;;  %v802_v39 = vld [vmem:[#allocation2 + $0x2e8] sm:$0xff] }
  0xdc   : > { %1053 = vmatpush.msrb.mxu0 %v863_v38  ;;  %v837_v38 = vld [vmem:[#allocation2 + $0x400] sm:$0xff] }
  0xdd   : > { %1124 = vmatpush.msrb.mxu3 %v937_v28  ;;  %1086 = vmatpush.msrb.mxu1 %v869_v44  ;;  %v738_v44 = vld [vmem:[#allocation2 + $0xe8] sm:$0xff] }
  0xde   : > { %1054 = vmatpush.msrb.mxu0 %v861_v42  ;;  %v560_v42 = vld [vmem:[%s3856_s4] sm:$0xf] }
  0xdf   : > { %1125 = vmatpush.msrb.mxu3 %v935_v32 }
  0xe0   : > { %1055 = vmatpush.msrb.mxu0 %v859_v46 }
  0xe1   : > { %1126 = vmatpush.msrb.mxu3 %v933_v40  ;;  %v836_v40 = vld [vmem:[#allocation2 + $0x3f8] sm:$0xff] }
  0xe2   : > { %1056 = vmatpush.msrb.mxu0 %v857_v52 }
  0xe4   : > { %1057 = vmatpush.msrb.mxu0 %v855_v56 }
  0xe6   : > { %1058 = vmatpush.msrb.mxu0 %v853_v61 }
  0xe8   : > { %1059 = vmatpush.msrb.mxu0 %v851_v2 }
  0xea   : > { %1060 = vmatpush.msrb.mxu0 %v849_v6 }
  0xec   : > { %1061 = vmatpush.msrb.mxu0 %v847_v12 }
  0xee   : > { %1062 = vmatpush.msrb.mxu0 %v845_v16 }
  0xf0   : > { %1063 = vmatpush.msrb.mxu0 %v843_v20  ;;  %v2673_v20 = vmov 1934713408  }
  0xf1   : > { %v682_v21 = vunpack.c.l.s4 %v2673_v20  ;;  %v784_v20 = vld [vmem:[#allocation2 + $0x258] sm:$0xff] }
  0xf2   : > { %1064 = vmatpush.msrb.mxu0 %v841_v25 }
  0xf3   : > { %v683_v27 = vunpack.c.0.s8 %v682_v21  ;;  %v818_v21 = vld [vmem:[#allocation2 + $0x368] sm:$0xff] }
  0xf4   : > { %1065 = vmatpush.msrb.mxu0 %v839_v29 }
  0xf6   : > { %1066 = vmatpush.msrb.mxu0 %v837_v38  ;;  %v740_v38 = vld [vmem:[#allocation2 + $0xf8] sm:$0xff] }
 0x122   : > { %v593_v34 = vpop.permute.xlu1 %592  ;;  %v572_v35 = vpop.permute.xlu0 %571 }
 0x123   : > { %v548_v37 = vpop.xlane.xlu2 %547  ;;  %v597_v55 = vmul.f32 %v2408_v47, %v572_v35  ;;  %v600_v7 = vmul.f32 %v2408_v47, %v593_v34  ;;  %v2973_v35 = vld [vmem:[#allocation5 + $0xb0] sm:$0xff] }
 0x124   : > { %v556_v41 = vmul.f32 %v555_v33, %v548_v37  ;;  %v804_v33 = vld [vmem:[#allocation2 + $0x2f8] sm:$0xff] }
 0x125   : > { %v632_v0 = vadd.f32 %v628_v60, %v597_v55 }
 0x126   : > { %v564_v43 = vmul.f32 %v2409_v36, %v556_v41 }
 0x128   : > { %v565_v46 = vadd.f32 %v564_v43, %v560_v42 }
 0x12a   : > { %v612_v48 = vpop.permute.xlu1 %611  ;;  %v638_v49 = vrot.slane %v565_v46, 2  ;;  %v579_v50 = vpop.permute.xlu0 %578  ;;  %v640_v61 = vperm.slane %v565_v46, 0  ;;  %v637_v62 = vrot.slane %v565_v46, 1  ;;  %v639_v3 = vrot.slane %v565_v46, 3  ;;  %v800_v46 = vld [vmem:[#allocation2 + $0x2d8] sm:$0xff] }
 0x12b   : > { %v586_v52 = vpop.permute.xlu2 %585  ;;  %v629_v56 = vmul.f32 %v2407_v45, %v612_v48  ;;  %v598_v57 = vmul.f32 %v2408_v47, %v579_v50  ;;  %v770_v50 = vld [vmem:[#allocation2 + $0x1e8] sm:$0xff] }
 0x12c   : > { %v599_v54 = vmul.f32 %v2408_v47, %v586_v52  ;;  %v642_v58 = vperm.slane %v638_v49, 0  ;;  %v648_v51 = vadd.f32 %v640_v61, %v632_v0  ;;  %v641_v8 = vperm.slane %v637_v62, 0  ;;  %v834_v47 = vld [vmem:[#allocation2 + $0x3e8] sm:$0xff]  ;;  %v736_v49 = vld [vmem:[#allocation2 + $0xd8] sm:$0xff] }
 0x12d   : > { %v633_v1 = vadd.f32 %v629_v56, %v598_v57  ;;  %v643_v13 = vperm.slane %v639_v3, 0  ;;  %v798_v52 = vld [vmem:[#allocation2 + $0x2c8] sm:$0xff]  ;;  %v768_v57 = vld [vmem:[#allocation2 + $0x1d8] sm:$0xff] }
 0x12e   : > { %v634_v59 = vadd.f32 %v630_v53, %v599_v54  ;;  %v655_v18 = vrot.slane %v648_v51, 4  ;;  %v832_v53 = vld [vmem:[#allocation2 + $0x3d8] sm:$0xff]  ;;  %v734_v56 = vld [vmem:[#allocation2 + $0xc8] sm:$0xff] }
 0x12f   : > { %v649_v11 = vadd.f32 %v641_v8, %v633_v1  ;;  %v732_v61 = vld [vmem:[#allocation2 + $0xb8] sm:$0xff]  ;;  %v794_v0 = vld [vmem:[#allocation2 + $0x2a8] sm:$0xff] }
 0x130   : > { %v650_v63 = vadd.f32 %v642_v58, %v634_v59  ;;  %v796_v58 = vld [vmem:[#allocation2 + $0x2b8] sm:$0xff]  ;;  %v830_v59 = vld [vmem:[#allocation2 + $0x3c8] sm:$0xff] }
 0x131   : > { %v667_v17 = vrot.slane %v649_v11, 4  ;;  %v828_v1 = vld [vmem:[#allocation2 + $0x3b8] sm:$0xff]  ;;  %v730_v3 = vld [vmem:[#allocation2 + $0xa8] sm:$0xff] }
 0x132   : > { %v652_v2 = vrot.slane %v650_v63, 4  ;;  %v656_v22 = vsel %vm653_vm2, %v650_v63, %v655_v18  ;;  %v766_v63 = vld [vmem:[#allocation2 + $0x1c8] sm:$0xff] }
 0x133   : > { %v624_v6 = vpop.permute.xlu2 %623  ;;  %v664_v28 = vperm.slane %v656_v22, %v659_v14  ;;  %v790_v8 = vld [vmem:[#allocation2 + $0x288] sm:$0xff]  ;;  %v720_v22 = vld [vmem:[#allocation2 + $0x58] sm:$0xff] }
 0x134   : > { %v631_v10 = vmul.f32 %v2407_v45, %v624_v6  ;;  %v654_v12 = vsel %vm653_vm2, %v652_v2, %v648_v51  ;;  %v772_v45 = vld [vmem:[#allocation2 + $0x1f8] sm:$0xff]  ;;  %v826_v6 = vld [vmem:[#allocation2 + $0x3a8] sm:$0xff] }
 0x135   : > { %v660_v16 = vperm.slane %v654_v12, %v659_v14  ;;  %v691_v41 = vrot.slane %v664_v28, 4  ;;  %v762_v51 = vld [vmem:[#allocation2 + $0x1a8] sm:$0xff]  ;;  %v760_v12 = vld [vmem:[#allocation2 + $0x198] sm:$0xff] }
 0x136   : > { %v635_v9 = vadd.f32 %v631_v10, %v600_v7  ;;  %v728_v7 = vld [vmem:[#allocation2 + $0x98] sm:$0xff]  ;;  %v722_v18 = vld [vmem:[#allocation2 + $0x68] sm:$0xff] }
 0x137   : > { %v679_v26 = vrot.slane %v660_v16, 4  ;;  %v824_v10 = vld [vmem:[#allocation2 + $0x398] sm:$0xff] }
 0x138   : > { %v651_v15 = vadd.f32 %v643_v13, %v635_v9  ;;  %v788_v13 = vld [vmem:[#allocation2 + $0x278] sm:$0xff]  ;;  %v822_v9 = vld [vmem:[#allocation2 + $0x388] sm:$0xff] }
 0x13a   : > { %v665_v19 = vrot.slane %v651_v15, 4  ;;  %v668_v23 = vsel %vm653_vm2, %v651_v15, %v667_v17  ;;  %v758_v15 = vld [vmem:[#allocation2 + $0x188] sm:$0xff]  ;;  %v820_v17 = vld [vmem:[#allocation2 + $0x378] sm:$0xff] }
 0x13b   : > { %v676_v31 = vperm.slane %v668_v23, %v659_v14  ;;  %v754_v23 = vld [vmem:[#allocation2 + $0x168] sm:$0xff] }
 0x13c   : > { %v666_v24 = vsel %vm653_vm2, %v665_v19, %v649_v11  ;;  %v726_v11 = vld [vmem:[#allocation2 + $0x88] sm:$0xff]  ;;  %v756_v19 = vld [vmem:[#allocation2 + $0x178] sm:$0xff] }
 0x13d   : > { %v672_v25 = vperm.slane %v666_v24, %v659_v14  ;;  %v689_v42 = vrot.slane %v676_v31, 4  ;;  %v692_v48 = vsel %vm653_vm2, %v676_v31, %v691_v41  ;;  %v724_v14 = vld [vmem:[#allocation2 + $0x78] sm:$0xff]  ;;  %v782_v24 = vld [vmem:[#allocation2 + $0x248] sm:$0xff] }
 0x13e   : > { %v2915_v55 = vperm.slane %v692_v48, %v683_v27  ;;  %v750_v31 = vld [vmem:[#allocation2 + $0x148] sm:$0xff]  ;;  %v932_v48 = vld [vmem:[#allocation2 + $0x6f8] sm:$0xff] }
 0x13f   : > { %v680_v29 = vsel %vm653_vm2, %v672_v25, %v679_v26  ;;  %v677_v30 = vrot.slane %v672_v25, 4  ;;  %v690_v54 = vsel %vm653_vm2, %v689_v42, %v664_v28  ;;  %v816_v25 = vld [vmem:[#allocation2 + $0x358] sm:$0xff]  ;;  %v718_v26 = vld [vmem:[#allocation2 + $0x48] sm:$0xff] }
 0x140   : > { %v2891_v32 = vperm.slane %v680_v29, %v683_v27  ;;  %v2917_v60 = vperm.slane %v690_v54, %v683_v27  ;;  %v707_v62 = vrot.slane %v2915_v55, 4  ;;  %v780_v28 = vld [vmem:[#allocation2 + $0x238] sm:$0xff]  ;;  %v814_v29 = vld [vmem:[#allocation2 + $0x348] sm:$0xff] }
 0x141   : > { %v678_v34 = vsel %vm653_vm2, %v677_v30, %v660_v16  ;;  %v786_v16 = vld [vmem:[#allocation2 + $0x268] sm:$0xff]  ;;  %v716_v30 = vld [vmem:[#allocation2 + $0x38] sm:$0xff] }
 0x142   : > { %1027 = vmatmul.f32.vlgmr.msra.gmra.mxu2 %v2891_v32  ;;  %v2900_v36 = vperm.slane %v678_v34, %v683_v27  ;;  %v703_v37 = vrot.slane %v2891_v32, 4  ;;  %v705_v2 = vrot.slane %v2917_v60, 4  ;;  %v752_v27 = vld [vmem:[#allocation2 + $0x158] sm:$0xff]  ;;  %v810_v41 = vld [vmem:[#allocation2 + $0x328] sm:$0xff] }
 0x143   : > { %1171 = vmatpush.msra.mxu2 %v804_v33  ;;  %v778_v33 = vld [vmem:[#allocation2 + $0x228] sm:$0xff]  ;;  %v812_v34 = vld [vmem:[#allocation2 + $0x338] sm:$0xff] }
 0x144   : > { %987 = vmatmul.f32.vlgmr.msra.gmra.mxu0 %v2900_v36  ;;  %2304 = vmatmul.msk.f32.vlgmr.msra.gmra.mxu3 %vm2895_vm3, %v703_v37  ;;  %v701_v43 = vrot.slane %v2900_v36, 4  ;;  %v712_v42 = vld [vmem:[#allocation2 + $0x18] sm:$0xff] }
 0x145   : > { %1131 = vmatpush.msra.mxu0 %v740_v38  ;;  %1172 = vmatpush.msra.mxu2 %v802_v39  ;;  %v714_v38 = vld [vmem:[#allocation2 + $0x28] sm:$0xff]  ;;  %v748_v39 = vld [vmem:[#allocation2 + $0x138] sm:$0xff] }
 0x146   : > { %1191 = vmatpush.msra.mxu3 %v836_v40  ;;  %2302 = vmatmul.msk.f32.vlgmr.msra.gmra.mxu1 %vm2895_vm3, %v701_v43  ;;  %v776_v40 = vld [vmem:[#allocation2 + $0x218] sm:$0xff] }
 0x147   : > { %1132 = vmatpush.msra.mxu0 %v738_v44  ;;  %1151 = vmatpush.msra.mxu1 %v772_v45  ;;  %v746_v44 = vld [vmem:[#allocation2 + $0x128] sm:$0xff]  ;;  %v964_v54 = vld [vmem:[#allocation2 + $0x7f8] sm:$0xff] }
 0x148   : > { %1173 = vmatpush.msra.mxu2 %v800_v46  ;;  %1192 = vmatpush.msra.mxu3 %v834_v47  ;;  %v774_v45 = vld [vmem:[#allocation2 + $0x208] sm:$0xff]  ;;  %v808_v46 = vld [vmem:[#allocation2 + $0x318] sm:$0xff] }
 0x149   : > { %1133 = vmatpush.msra.mxu0 %v736_v49  ;;  %1152 = vmatpush.msra.mxu1 %v770_v50  ;;  %v710_v47 = vld [vmem:[#allocation2 + $0x8] sm:$0xff]  ;;  %v744_v49 = vld [vmem:[#allocation2 + $0x118] sm:$0xff] }
 0x14a   : > { %1174 = vmatpush.msra.mxu2 %v798_v52  ;;  %1193 = vmatpush.msra.mxu3 %v832_v53  ;;  %v806_v50 = vld [vmem:[#allocation2 + $0x308] sm:$0xff]  ;;  %v868_v52 = vld [vmem:[#allocation2 + $0x4f8] sm:$0xff] }
 0x14b   : > { %1107 = vmatmul.f32.vlgmr.msrb.gmra.mxu2 %v2915_v55  ;;  %1134 = vmatpush.msra.mxu0 %v734_v56  ;;  %v930_v53 = vld [vmem:[#allocation2 + $0x6e8] sm:$0xff] }
 0x14c   : > { %1153 = vmatpush.msra.mxu1 %v768_v57  ;;  %1175 = vmatpush.msra.mxu2 %v796_v58  ;;  %v742_v56 = vld [vmem:[#allocation2 + $0x108] sm:$0xff]  ;;  %v928_v58 = vld [vmem:[#allocation2 + $0x6d8] sm:$0xff] }
 0x14d   : > { %1194 = vmatpush.msra.mxu3 %v830_v59  ;;  %1067 = vmatmul.f32.vlgmr.msrb.gmra.mxu0 %v2917_v60  ;;  %v866_v57 = vld [vmem:[#allocation2 + $0x4e8] sm:$0xff]  ;;  %v900_v59 = vld [vmem:[#allocation2 + $0x5f8] sm:$0xff] }
 0x14e   : > { %2308 = vmatmul.msk.f32.vlgmr.msrb.gmra.mxu3 %vm2895_vm3, %v707_v62  ;;  %1135 = vmatpush.msra.mxu0 %v732_v61  ;;  %v962_v61 = vld [vmem:[#allocation2 + $0x7e8] sm:$0xff] }
 0x14f   : > { %1154 = vmatpush.msra.mxu1 %v766_v63  ;;  %1176 = vmatpush.msra.mxu2 %v794_v0  ;;  %v864_v63 = vld [vmem:[#allocation2 + $0x4d8] sm:$0xff]  ;;  %v926_v0 = vld [vmem:[#allocation2 + $0x6c8] sm:$0xff] }
 0x150   : > { %1195 = vmatpush.msra.mxu3 %v828_v1  ;;  %2306 = vmatmul.msk.f32.vlgmr.msrb.gmra.mxu1 %vm2895_vm3, %v705_v2  ;;  %v960_v1 = vld [vmem:[#allocation2 + $0x7d8] sm:$0xff] }
 0x151   : > { %1136 = vmatpush.msra.mxu0 %v730_v3  ;;  %1155 = vmatpush.msra.mxu1 %v764_v4  ;;  %v924_v3 = vld [vmem:[#allocation2 + $0x6b8] sm:$0xff] }
 0x152   : > { %1177 = vmatpush.msra.mxu2 %v792_v5  ;;  %1196 = vmatpush.msra.mxu3 %v826_v6  ;;  %v896_v4 = vld [vmem:[#allocation2 + $0x5d8] sm:$0xff]  ;;  %v958_v5 = vld [vmem:[#allocation2 + $0x7c8] sm:$0xff] }
 0x153   : > { %1137 = vmatpush.msra.mxu0 %v728_v7  ;;  %1156 = vmatpush.msra.mxu1 %v762_v51  ;;  %v860_v6 = vld [vmem:[#allocation2 + $0x4b8] sm:$0xff]  ;;  %v922_v7 = vld [vmem:[#allocation2 + $0x6a8] sm:$0xff] }
 0x154   : > { %1178 = vmatpush.msra.mxu2 %v790_v8  ;;  %1197 = vmatpush.msra.mxu3 %v824_v10  ;;  %v956_v51 = vld [vmem:[#allocation2 + $0x7b8] sm:$0xff] }
 0x155   : > { %1138 = vmatpush.msra.mxu0 %v726_v11  ;;  %1157 = vmatpush.msra.mxu1 %v760_v12  ;;  %v920_v8 = vld [vmem:[#allocation2 + $0x698] sm:$0xff]  ;;  %v954_v11 = vld [vmem:[#allocation2 + $0x7a8] sm:$0xff] }
 0x156   : > { %1179 = vmatpush.msra.mxu2 %v788_v13  ;;  %1198 = vmatpush.msra.mxu3 %v822_v9  ;;  %v892_v10 = vld [vmem:[#allocation2 + $0x5b8] sm:$0xff]  ;;  %v918_v13 = vld [vmem:[#allocation2 + $0x688] sm:$0xff] }
 0x157   : > { %1139 = vmatpush.msra.mxu0 %v724_v14  ;;  %1158 = vmatpush.msra.mxu1 %v758_v15  ;;  %v856_v12 = vld [vmem:[#allocation2 + $0x498] sm:$0xff]  ;;  %v890_v9 = vld [vmem:[#allocation2 + $0x5a8] sm:$0xff] }
 0x158   : > { %1180 = vmatpush.msra.mxu2 %v786_v16  ;;  %1199 = vmatpush.msra.mxu3 %v820_v17  ;;  %v952_v14 = vld [vmem:[#allocation2 + $0x798] sm:$0xff]  ;;  %v854_v15 = vld [vmem:[#allocation2 + $0x488] sm:$0xff] }
 0x159   : > { %1140 = vmatpush.msra.mxu0 %v722_v18  ;;  %1159 = vmatpush.msra.mxu1 %v756_v19  ;;  %v916_v16 = vld [vmem:[#allocation2 + $0x678] sm:$0xff]  ;;  %v950_v18 = vld [vmem:[#allocation2 + $0x788] sm:$0xff] }
 0x15a   : > { %1181 = vmatpush.msra.mxu2 %v784_v20  ;;  %1200 = vmatpush.msra.mxu3 %v818_v21  ;;  %v888_v17 = vld [vmem:[#allocation2 + $0x598] sm:$0xff]  ;;  %v914_v20 = vld [vmem:[#allocation2 + $0x668] sm:$0xff] }
 0x15b   : > { %1141 = vmatpush.msra.mxu0 %v720_v22  ;;  %1160 = vmatpush.msra.mxu1 %v754_v23  ;;  %v852_v19 = vld [vmem:[#allocation2 + $0x478] sm:$0xff]  ;;  %v886_v21 = vld [vmem:[#allocation2 + $0x588] sm:$0xff] }
 0x15c   : > { %1182 = vmatpush.msra.mxu2 %v782_v24  ;;  %1201 = vmatpush.msra.mxu3 %v816_v25  ;;  %v948_v22 = vld [vmem:[#allocation2 + $0x778] sm:$0xff]  ;;  %v850_v23 = vld [vmem:[#allocation2 + $0x468] sm:$0xff] }
 0x15d   : > { %1142 = vmatpush.msra.mxu0 %v718_v26  ;;  %1161 = vmatpush.msra.mxu1 %v752_v27  ;;  %v912_v24 = vld [vmem:[#allocation2 + $0x658] sm:$0xff]  ;;  %v946_v26 = vld [vmem:[#allocation2 + $0x768] sm:$0xff] }
 0x15e   : > { %1183 = vmatpush.msra.mxu2 %v780_v28  ;;  %1202 = vmatpush.msra.mxu3 %v814_v29  ;;  %v884_v25 = vld [vmem:[#allocation2 + $0x578] sm:$0xff]  ;;  %v910_v28 = vld [vmem:[#allocation2 + $0x648] sm:$0xff] }
 0x15f   : > { %1143 = vmatpush.msra.mxu0 %v716_v30  ;;  %1162 = vmatpush.msra.mxu1 %v750_v31  ;;  %v848_v27 = vld [vmem:[#allocation2 + $0x458] sm:$0xff]  ;;  %v882_v29 = vld [vmem:[#allocation2 + $0x568] sm:$0xff] }
 0x160   : > { %1184 = vmatpush.msra.mxu2 %v778_v33  ;;  %1203 = vmatpush.msra.mxu3 %v812_v34  ;;  %v944_v30 = vld [vmem:[#allocation2 + $0x758] sm:$0xff]  ;;  %v846_v31 = vld [vmem:[#allocation2 + $0x448] sm:$0xff] }
 0x161   : > { %1144 = vmatpush.msra.mxu0 %v714_v38  ;;  %1163 = vmatpush.msra.mxu1 %v748_v39  ;;  %v908_v33 = vld [vmem:[#allocation2 + $0x638] sm:$0xff]  ;;  %v942_v38 = vld [vmem:[#allocation2 + $0x748] sm:$0xff] }
 0x162   : > { %1185 = vmatpush.msra.mxu2 %v776_v40  ;;  %1204 = vmatpush.msra.mxu3 %v810_v41  ;;  %v880_v34 = vld [vmem:[#allocation2 + $0x558] sm:$0xff]  ;;  %v906_v40 = vld [vmem:[#allocation2 + $0x628] sm:$0xff] }
 0x163   : > { %1145 = vmatpush.msra.mxu0 %v712_v42  ;;  %1164 = vmatpush.msra.mxu1 %v746_v44  ;;  %v844_v39 = vld [vmem:[#allocation2 + $0x438] sm:$0xff]  ;;  %v878_v41 = vld [vmem:[#allocation2 + $0x548] sm:$0xff] }
 0x164   : > { %1186 = vmatpush.msra.mxu2 %v774_v45  ;;  %1205 = vmatpush.msra.mxu3 %v808_v46  ;;  %v940_v42 = vld [vmem:[#allocation2 + $0x738] sm:$0xff]  ;;  %v842_v44 = vld [vmem:[#allocation2 + $0x428] sm:$0xff] }
 0x165   : > { %1187 = vmatmul.f32.vlgmr.msra.gmra.mxu2 %v2891_v32  ;;  %1146 = vmatpush.msra.mxu0 %v710_v47  ;;  %v898_v32 = vld [vmem:[#allocation2 + $0x5e8] sm:$0xff]  ;;  %v904_v45 = vld [vmem:[#allocation2 + $0x618] sm:$0xff] }
 0x166   : > { %1251 = vmatpush.msrb.mxu2 %v932_v48  ;;  %1165 = vmatpush.msra.mxu1 %v744_v49  ;;  %v876_v46 = vld [vmem:[#allocation2 + $0x538] sm:$0xff]  ;;  %v938_v47 = vld [vmem:[#allocation2 + $0x728] sm:$0xff] }
 0x167   : > { %1206 = vmatpush.msra.mxu3 %v806_v50  ;;  %1147 = vmatmul.f32.vlgmr.msra.gmra.mxu0 %v2900_v36  ;;  %v894_v36 = vld [vmem:[#allocation2 + $0x5c8] sm:$0xff]  ;;  %v840_v48 = vld [vmem:[#allocation2 + $0x418] sm:$0xff] }
 0x168   : > { %2312 = vmatmul.msk.f32.vlgmr.msra.gmra.mxu3 %vm2895_vm3, %v703_v37  ;;  %1211 = vmatpush.msrb.mxu0 %v868_v52  ;;  %v862_v37 = vld [vmem:[#allocation2 + $0x4c8] sm:$0xff]  ;;  %v936_v52 = vld [vmem:[#allocation2 + $0x718] sm:$0xff] }
 0x169   : > { %1252 = vmatpush.msrb.mxu2 %v930_v53  ;;  %1271 = vmatpush.msrb.mxu3 %v964_v54  ;;  %v902_v49 = vld [vmem:[#allocation2 + $0x608] sm:$0xff]  ;;  %v872_v54 = vld [vmem:[#allocation2 + $0x518] sm:$0xff] }
 0x16a   : > { %1166 = vmatpush.msra.mxu1 %v742_v56  ;;  %1212 = vmatpush.msrb.mxu0 %v866_v57  ;;  %v874_v50 = vld [vmem:[#allocation2 + $0x528] sm:$0xff] }
 0x16b   : > { %2310 = vmatmul.msk.f32.vlgmr.msra.gmra.mxu1 %vm2895_vm3, %v701_v43  ;;  %1253 = vmatpush.msrb.mxu2 %v928_v58  ;;  %v858_v43 = vld [vmem:[#allocation2 + $0x4a8] sm:$0xff]  ;;  %v2942_v58 = vld [vmem:[#allocation5 + $0xf0] sm:$0xff] }
 0x16c   : > { %1231 = vmatpush.msrb.mxu1 %v900_v59  ;;  %1272 = vmatpush.msrb.mxu3 %v962_v61  ;;  %v838_v53 = vld [vmem:[#allocation2 + $0x408] sm:$0xff]  ;;  %v2944_v59 = vld [vmem:[#allocation5 + $0xf8] sm:$0xff]  ;;  %v2951_v61 = vld [vmem:[#allocation5 + $0xe0] sm:$0xff] }
 0x16d   : > { %1213 = vmatpush.msrb.mxu0 %v864_v63  ;;  %1254 = vmatpush.msrb.mxu2 %v926_v0  ;;  %v934_v56 = vld [vmem:[#allocation2 + $0x708] sm:$0xff]  ;;  %v2961_v0 = vld [vmem:[#allocation5 + $0xd0] sm:$0xff] }
 0x16e   : > { %1232 = vmatpush.msrb.mxu1 %v898_v32  ;;  %1273 = vmatpush.msrb.mxu3 %v960_v1  ;;  %v870_v57 = vld [vmem:[#allocation2 + $0x508] sm:$0xff] }
 0x16f   : > { %1214 = vmatpush.msrb.mxu0 %v862_v37  ;;  %1255 = vmatpush.msrb.mxu2 %v924_v3  ;;  %v2954_v63 = vld [vmem:[#allocation5 + $0xe8] sm:$0xff]  ;;  %v2985_v37 = vld [vmem:[#allocation5 + $0x90] sm:$0xff]  ;;  %v2988_v3 = vld [vmem:[#allocation5 + $0x98] sm:$0xff] }
 0x170   : > { %1233 = vmatpush.msrb.mxu1 %v896_v4  ;;  %1274 = vmatpush.msrb.mxu3 %v958_v5  ;;  %v2970_v32 = vld [vmem:[#allocation5 + $0xc8] sm:$0xff]  ;;  %v2993_v4 = vld [vmem:[#allocation5 + $0x80] sm:$0xff] }
 0x171   : > { %1215 = vmatpush.msrb.mxu0 %v860_v6  ;;  %1256 = vmatpush.msrb.mxu2 %v922_v7  ;;  %v2982_v1 = vld [vmem:[#allocation5 + $0xa8] sm:$0xff]  ;;  %v2999_v6 = vld [vmem:[#allocation5 + $0x70] sm:$0xff]  ;;  %v3001_v7 = vld [vmem:[#allocation5 + $0x78] sm:$0xff] }
 0x172   : > { %1234 = vmatpush.msrb.mxu1 %v894_v36  ;;  %1275 = vmatpush.msrb.mxu3 %v956_v51  ;;  %v2995_v5 = vld [vmem:[#allocation5 + $0x88] sm:$0xff]  ;;  %v3005_v36 = vld [vmem:[#allocation5 + $0x60] sm:$0xff] }
 0x173   : > { %1216 = vmatpush.msrb.mxu0 %v858_v43  ;;  %1257 = vmatpush.msrb.mxu2 %v920_v8  ;;  %v3007_v51 = vld [vmem:[#allocation5 + $0x68] sm:$0xff]  ;;  %v3011_v43 = vld [vmem:[#allocation5 + $0x50] sm:$0xff]  ;;  %v3013_v8 = vld [vmem:[#allocation5 + $0x58] sm:$0xff] }
 0x174   : > { %1235 = vmatpush.msrb.mxu1 %v892_v10  ;;  %1276 = vmatpush.msrb.mxu3 %v954_v11  ;;  %4069 = vst [vmem:[#allocation18_spill] sm:$0xff] %v3011_v43  ;;  %v3017_v10 = vld [vmem:[#allocation5 + $0x40] sm:$0xff]  ;;  %v3019_v11 = vld [vmem:[#allocation5 + $0x48] sm:$0xff] }
 0x175   : > { %1217 = vmatpush.msrb.mxu0 %v856_v12  ;;  %1258 = vmatpush.msrb.mxu2 %v918_v13  ;;  %4070 = vst [vmem:[#allocation19_spill] sm:$0xff] %v3013_v8  ;;  %v3023_v12 = vld [vmem:[#allocation5 + $0x30] sm:$0xff]  ;;  %v3025_v13 = vld [vmem:[#allocation5 + $0x38] sm:$0xff] }
 0x176   : > { %1236 = vmatpush.msrb.mxu1 %v890_v9  ;;  %1277 = vmatpush.msrb.mxu3 %v952_v14  ;;  %4071 = vst [vmem:[#allocation20_spill] sm:$0xff] %v3017_v10  ;;  %v3029_v9 = vld [vmem:[#allocation5 + $0x20] sm:$0xff]  ;;  %v3031_v14 = vld [vmem:[#allocation5 + $0x28] sm:$0xff] }
 0x177   : > { %1218 = vmatpush.msrb.mxu0 %v854_v15  ;;  %1259 = vmatpush.msrb.mxu2 %v916_v16  ;;  %4072 = vst [vmem:[#allocation21_spill] sm:$0xff] %v3019_v11  ;;  %v3035_v15 = vld [vmem:[#allocation5 + $0x10] sm:$0xff]  ;;  %v3037_v16 = vld [vmem:[#allocation5 + $0x18] sm:$0xff] }
 0x178   : > { %1237 = vmatpush.msrb.mxu1 %v888_v17  ;;  %1278 = vmatpush.msrb.mxu3 %v950_v18  ;;  %4073 = vst [vmem:[#allocation22_spill] sm:$0xff] %v3023_v12  ;;  %v3039_v17 = vld [vmem:[#allocation5] sm:$0xff]  ;;  %v3043_v18 = vld [vmem:[#allocation5 + $0x8] sm:$0xff] }
 0x179   : > { %1219 = vmatpush.msrb.mxu0 %v852_v19  ;;  %1260 = vmatpush.msrb.mxu2 %v914_v20  ;;  %4074 = vst [vmem:[#allocation23_spill] sm:$0xff] %v3025_v13  ;;  %v3050_v19 = vld [vmem:[%s3859_s7] sm:$0x3] }
 0x17a   : > { %1238 = vmatpush.msrb.mxu1 %v886_v21  ;;  %1279 = vmatpush.msrb.mxu3 %v948_v22  ;;  %4075 = vst [vmem:[#allocation24_spill] sm:$0xff] %v3029_v9  ;;  %v967_v20 = vperm.slane %v3050_v19, 0 }
 0x17b   : > { %1220 = vmatpush.msrb.mxu0 %v850_v23  ;;  %1261 = vmatpush.msrb.mxu2 %v912_v24  ;;  %4076 = vst [vmem:[#allocation25_spill] sm:$0xff] %v3031_v14 }
 0x17c   : > { %1239 = vmatpush.msrb.mxu1 %v884_v25  ;;  %1280 = vmatpush.msrb.mxu3 %v946_v26  ;;  %4077 = vst [vmem:[#allocation26_spill] sm:$0xff] %v3035_v15 }
 0x17d   : > { %1221 = vmatpush.msrb.mxu0 %v848_v27  ;;  %1262 = vmatpush.msrb.mxu2 %v910_v28  ;;  %4078 = vst [vmem:[#allocation27_spill] sm:$0xff] %v3037_v16 }
 0x17e   : > { %1240 = vmatpush.msrb.mxu1 %v882_v29  ;;  %1281 = vmatpush.msrb.mxu3 %v944_v30  ;;  %4079 = vst [vmem:[#allocation28_spill] sm:$0xff] %v3039_v17 }
 0x17f   : > { %1222 = vmatpush.msrb.mxu0 %v846_v31  ;;  %1263 = vmatpush.msrb.mxu2 %v908_v33  ;;  %4080 = vst [vmem:[#allocation29_spill] sm:$0xff] %v3043_v18  ;;  %v3053_v33 = vld [vmem:[#allocation5 + $0x1f0] sm:$0xff] }
 0x180   : > { %1241 = vmatpush.msrb.mxu1 %v880_v34  ;;  %1282 = vmatpush.msrb.mxu3 %v942_v38  ;;  %v3055_v34 = vld [vmem:[#allocation5 + $0x1f8] sm:$0xff]  ;;  %v3057_v38 = vld [vmem:[#allocation5 + $0x1e0] sm:$0xff] }
 0x181   : > { %1223 = vmatpush.msrb.mxu0 %v844_v39  ;;  %1264 = vmatpush.msrb.mxu2 %v906_v40 }
 0x182   : > { %1242 = vmatpush.msrb.mxu1 %v878_v41  ;;  %1283 = vmatpush.msrb.mxu3 %v940_v42  ;;  %v3061_v41 = vld [vmem:[#allocation5 + $0x1e8] sm:$0xff]  ;;  %v3063_v42 = vld [vmem:[#allocation5 + $0x1d0] sm:$0xff] }
 0x183   : > { %1224 = vmatpush.msrb.mxu0 %v842_v44  ;;  %1265 = vmatpush.msrb.mxu2 %v904_v45  ;;  %v3065_v44 = vld [vmem:[#allocation5 + $0x1d8] sm:$0xff] }
 0x184   : > { %1243 = vmatpush.msrb.mxu1 %v876_v46  ;;  %1284 = vmatpush.msrb.mxu3 %v938_v47 }
 0x185   : > { %1225 = vmatpush.msrb.mxu0 %v840_v48  ;;  %1266 = vmatpush.msrb.mxu2 %v902_v49  ;;  %v3073_v48 = vld [vmem:[#allocation5 + $0x1c0] sm:$0xff]  ;;  %v3075_v49 = vld [vmem:[#allocation5 + $0x1c8] sm:$0xff] }
 0x186   : > { %1244 = vmatpush.msrb.mxu1 %v874_v50  ;;  %1285 = vmatpush.msrb.mxu3 %v936_v52  ;;  %4082 = vst [vmem:[#allocation31_spill] sm:$0xff] %v3075_v49  ;;  %v3079_v50 = vld [vmem:[#allocation5 + $0x1b0] sm:$0xff]  ;;  %v3081_v52 = vld [vmem:[#allocation5 + $0x1b8] sm:$0xff] }
 0x187   : > { %1267 = vmatmul.f32.vlgmr.msrb.gmra.mxu2 %v2915_v55  ;;  %1226 = vmatpush.msrb.mxu0 %v838_v53  ;;  %v2964_v55 = vld [vmem:[#allocation5 + $0xd8] sm:$0xff]  ;;  %v3085_v53 = vld [vmem:[#allocation5 + $0x1a0] sm:$0xff] }
 0x188   : > { %1245 = vmatpush.msrb.mxu1 %v872_v54  ;;  %1286 = vmatpush.msrb.mxu3 %v934_v56  ;;  %4083 = vst [vmem:[#allocation32_spill] sm:$0xff] %v3085_v53  ;;  %v3087_v54 = vld [vmem:[#allocation5 + $0x1a8] sm:$0xff]  ;;  %v3091_v56 = vld [vmem:[#allocation5 + $0x190] sm:$0xff] }
 0x189   : > { %1227 = vmatmul.f32.vlgmr.msrb.gmra.mxu0 %v2917_v60  ;;  %2316 = vmatmul.msk.f32.vlgmr.msrb.gmra.mxu3 %vm2895_vm3, %v707_v62  ;;  %v2967_v62 = vld [vmem:[#allocation5 + $0xc0] sm:$0xff]  ;;  %v2976_v60 = vld [vmem:[#allocation5 + $0xb8] sm:$0xff]  ;;  %4084 = vst [vmem:[#allocation33_spill] sm:$0xff] %v3087_v54 }
 0x18a   : > { %1246 = vmatpush.msrb.mxu1 %v870_v57  ;;  %1361 = vmatpush.msra.mxu0 %v2942_v58  ;;  %v3093_v57 = vld [vmem:[#allocation5 + $0x198] sm:$0xff] }
 0x18b   : > { %2314 = vmatmul.msk.f32.vlgmr.msrb.gmra.mxu1 %vm2895_vm3, %v705_v2  ;;  %1401 = vmatpush.msra.mxu2 %v2944_v59  ;;  %v2979_v2 = vld [vmem:[#allocation5 + $0xa0] sm:$0xff]  ;;  %4085 = vst [vmem:[#allocation34_spill] sm:$0xff] %v3093_v57 }
 0x18c   : > { %1362 = vmatpush.msra.mxu0 %v2951_v61  ;;  %1381 = vmatpush.msra.mxu1 %v3053_v33 }
 0x18d   : > { %1402 = vmatpush.msra.mxu2 %v2954_v63  ;;  %1421 = vmatpush.msra.mxu3 %v3055_v34 }
 0x18e   : > { %1363 = vmatpush.msra.mxu0 %v2961_v0  ;;  %1382 = vmatpush.msra.mxu1 %v3057_v38 }
 0x18f   : > { %1403 = vmatpush.msra.mxu2 %v2964_v55  ;;  %1422 = vmatpush.msra.mxu3 %v3061_v41 }
 0x190   : > { %1364 = vmatpush.msra.mxu0 %v2967_v62  ;;  %1383 = vmatpush.msra.mxu1 %v3063_v42 }
 0x191   : > { %1404 = vmatpush.msra.mxu2 %v2970_v32  ;;  %1423 = vmatpush.msra.mxu3 %v3065_v44 }
 0x192   : > { %1365 = vmatpush.msra.mxu0 %v2973_v35  ;;  %1384 = vmatpush.msra.mxu1 %v3073_v48 }
 0x193   : > { %1405 = vmatpush.msra.mxu2 %v2976_v60  ;;  %1424 = vmatpush.msra.mxu3 %v3075_v49 }
 0x194   : > { %1366 = vmatpush.msra.mxu0 %v2979_v2  ;;  %1385 = vmatpush.msra.mxu1 %v3079_v50 }
 0x195   : > { %1406 = vmatpush.msra.mxu2 %v2982_v1  ;;  %1425 = vmatpush.msra.mxu3 %v3081_v52 }
 0x196   : > { %1367 = vmatpush.msra.mxu0 %v2985_v37  ;;  %1386 = vmatpush.msra.mxu1 %v3085_v53 }
 0x197   : > { %1407 = vmatpush.msra.mxu2 %v2988_v3  ;;  %1426 = vmatpush.msra.mxu3 %v3087_v54 }
 0x198   : > { %1368 = vmatpush.msra.mxu0 %v2993_v4  ;;  %1387 = vmatpush.msra.mxu1 %v3091_v56 }
 0x199   : > { %1408 = vmatpush.msra.mxu2 %v2995_v5  ;;  %1427 = vmatpush.msra.mxu3 %v3093_v57 }
 0x19a   : > { %1369 = vmatpush.msra.mxu0 %v2999_v6 }
 0x19b   : > { %1409 = vmatpush.msra.mxu2 %v3001_v7 }
 0x19c   : > { %1370 = vmatpush.msra.mxu0 %v3005_v36 }
 0x19d   : > { %1410 = vmatpush.msra.mxu2 %v3007_v51 }
 0x19e   : > { %1371 = vmatpush.msra.mxu0 %v3011_v43 }
 0x19f   : > { %1411 = vmatpush.msra.mxu2 %v3013_v8 }
 0x1a0   : > { %1372 = vmatpush.msra.mxu0 %v3017_v10 }
 0x1a1   : > { %1412 = vmatpush.msra.mxu2 %v3019_v11 }
 0x1a2   : > { %1373 = vmatpush.msra.mxu0 %v3023_v12 }
 0x1a3   : > { %1413 = vmatpush.msra.mxu2 %v3025_v13 }
 0x1a4   : > { %1374 = vmatpush.msra.mxu0 %v3029_v9 }
 0x1a5   : > { %1414 = vmatpush.msra.mxu2 %v3031_v14 }
 0x1a6   : > { %1375 = vmatpush.msra.mxu0 %v3035_v15 }
 0x1a7   : > { %1415 = vmatpush.msra.mxu2 %v3037_v16 }
 0x1a8   : > { %1376 = vmatpush.msra.mxu0 %v3039_v17 }
 0x1a9   : > { %1416 = vmatpush.msra.mxu2 %v3043_v18  ;;  %v3149_v18 = vld [vmem:[#allocation5 + $0x108] sm:$0xff] }
 0x1c1   : > { %v988_v21 = vpop.f32.mrf.mxu0 }
 0x1c2   : > { %v989_v22 = vadd.f32 %v988_v21, %v967_v20  ;;  %v3097_v20 = vld [vmem:[#allocation5 + $0x180] sm:$0xff]  ;;  %v3099_v21 = vld [vmem:[#allocation5 + $0x188] sm:$0xff] }
 0x1c3   : > { %v1008_v23 = vpop.f32.mrf.mxu1  ;;  %4086 = vst [vmem:[#allocation35_spill] sm:$0xff] %v3097_v20  ;;  %1388 = vmatpush.msra.mxu1 %v3097_v20  ;;  %1428 = vmatpush.msra.mxu3 %v3099_v21 }
 0x1c4   : > { %v1009_v24 = vadd.f32 %v1008_v23, %v989_v22  ;;  %4087 = vst [vmem:[#allocation36_spill] sm:$0xff] %v3099_v21  ;;  %v3103_v22 = vld [vmem:[#allocation5 + $0x170] sm:$0xff]  ;;  %v3105_v23 = vld [vmem:[#allocation5 + $0x178] sm:$0xff] }
 0x1c5   : > { %v1028_v25 = vpop.f32.mrf.mxu2  ;;  %4088 = vst [vmem:[#allocation37_spill] sm:$0xff] %v3103_v22  ;;  %1389 = vmatpush.msra.mxu1 %v3103_v22  ;;  %1429 = vmatpush.msra.mxu3 %v3105_v23 }
 0x1c6   : > { %v1029_v26 = vadd.f32 %v1028_v25, %v1009_v24  ;;  %4089 = vst [vmem:[#allocation38_spill] sm:$0xff] %v3105_v23  ;;  %v3109_v24 = vld [vmem:[#allocation5 + $0x160] sm:$0xff]  ;;  %v3111_v25 = vld [vmem:[#allocation5 + $0x168] sm:$0xff] }
 0x1c7   : > { %v1048_v27 = vpop.f32.mrf.mxu3  ;;  %4090 = vst [vmem:[#allocation39_spill] sm:$0xff] %v3109_v24  ;;  %1390 = vmatpush.msra.mxu1 %v3109_v24  ;;  %1430 = vmatpush.msra.mxu3 %v3111_v25 }
 0x1c8   : > { %v1049_v28 = vadd.f32 %v1048_v27, %v1029_v26  ;;  %4091 = vst [vmem:[#allocation40_spill] sm:$0xff] %v3111_v25  ;;  %v3115_v26 = vld [vmem:[#allocation5 + $0x150] sm:$0xff]  ;;  %v3117_v27 = vld [vmem:[#allocation5 + $0x158] sm:$0xff] }
 0x1c9   : > { %4092 = vst [vmem:[#allocation41_spill] sm:$0xff] %v3115_v26  ;;  %1391 = vmatpush.msra.mxu1 %v3115_v26  ;;  %1431 = vmatpush.msra.mxu3 %v3117_v27 }
 0x1ca   : > { %v1068_v29 = vpop.f32.mrf.mxu0  ;;  %4093 = vst [vmem:[#allocation42_spill] sm:$0xff] %v3117_v27 }
 0x1cb   : > { %v1069_v30 = vadd.f32 %v1068_v29, %v1049_v28  ;;  %v3123_v28 = vld [vmem:[#allocation5 + $0x140] sm:$0xff]  ;;  %v3125_v29 = vld [vmem:[#allocation5 + $0x148] sm:$0xff] }
 0x1cc   : > { %4094 = vst [vmem:[#allocation43_spill] sm:$0xff] %v3123_v28  ;;  %1392 = vmatpush.msra.mxu1 %v3123_v28  ;;  %1432 = vmatpush.msra.mxu3 %v3125_v29 }
 0x1cd   : > { %v1088_v31 = vpop.f32.mrf.mxu1  ;;  %4095 = vst [vmem:[#allocation44_spill] sm:$0xff] %v3125_v29 }
 0x1ce   : > { %v1089_v39 = vadd.f32 %v1088_v31, %v1069_v30  ;;  %v1108_v40 = vpop.f32.mrf.mxu2  ;;  %v3129_v30 = vld [vmem:[#allocation5 + $0x130] sm:$0xff]  ;;  %v3131_v31 = vld [vmem:[#allocation5 + $0x138] sm:$0xff] }
 0x1cf   : > { %4096 = vst [vmem:[#allocation45_spill] sm:$0xff] %v3129_v30  ;;  %1393 = vmatpush.msra.mxu1 %v3129_v30  ;;  %1433 = vmatpush.msra.mxu3 %v3131_v31 }
 0x1d0   : > { %v1109_v45 = vadd.f32 %v1108_v40, %v1089_v39  ;;  %4097 = vst [vmem:[#allocation46_spill] sm:$0xff] %v3131_v31  ;;  %v3135_v39 = vld [vmem:[#allocation5 + $0x120] sm:$0xff]  ;;  %v3137_v40 = vld [vmem:[#allocation5 + $0x128] sm:$0xff] }
 0x1d1   : > { %v1128_v46 = vpop.f32.mrf.mxu3  ;;  %4098 = vst [vmem:[#allocation47_spill] sm:$0xff] %v3135_v39  ;;  %1394 = vmatpush.msra.mxu1 %v3135_v39  ;;  %1434 = vmatpush.msra.mxu3 %v3137_v40  ;;  %v968_v39 = vperm.slane %v3050_v19, 1  ;;  %v3158_v19 = vld [vmem:[#allocation7 + $0xf0] sm:$0xff] }
 0x1d2   : > { %v3069_v47 = vadd.f32 %v1128_v46, %v1109_v45  ;;  %4099 = vst [vmem:[#allocation48_spill] sm:$0xff] %v3137_v40  ;;  %v3141_v45 = vld [vmem:[#allocation5 + $0x110] sm:$0xff]  ;;  %v3143_v46 = vld [vmem:[#allocation5 + $0x118] sm:$0xff]  ;;  %1513 = vmatpush.msrb.mxu0 %v3158_v19 }
 0x1d3   : > { %4100 = vst [vmem:[#allocation49_spill] sm:$0xff] %v3141_v45  ;;  %1395 = vmatpush.msra.mxu1 %v3141_v45  ;;  %1435 = vmatpush.msra.mxu3 %v3143_v46 }
 0x1d4   : > { %4081 = vst [vmem:[#allocation30_spill] sm:$0xff] %v3069_v47  ;;  %1377 = vmatmul.f32.vlgmr.msra.gmra.mxu0 %v3069_v47  ;;  %1417 = vmatmul.f32.vlgmr.msra.gmra.mxu2 %v3069_v47  ;;  %v3147_v47 = vld [vmem:[#allocation5 + $0x100] sm:$0xff] }
 0x1d5   : > { %4101 = vst [vmem:[#allocation50_spill] sm:$0xff] %v3143_v46  ;;  %1396 = vmatpush.msra.mxu1 %v3147_v47  ;;  %1436 = vmatpush.msra.mxu3 %v3149_v18 }
 0x1d6   : > { %4102 = vst [vmem:[#allocation51_spill] sm:$0xff] %v3147_v47 }
 0x1d7   : > { %4104 = vst [vmem:[#allocation53_spill] sm:$0xff] %v3158_v19 }
 0x1e4   : > { %v1148_v31 = vpop.f32.mrf.mxu0 }
 0x1e5   : > { %v1149_v40 = vadd.f32 %v1148_v31, %v968_v39  ;;  %v3190_v31 = vld [vmem:[#allocation7 + $0x1d0] sm:$0xff]  ;;  %v3192_v39 = vld [vmem:[#allocation7 + $0x1d8] sm:$0xff] }
 0x1e6   : > { %4116 = vst [vmem:[#allocation65_spill] sm:$0xff] %v3190_v31 }
 0x1e7   : > { %4117 = vst [vmem:[#allocation66_spill] sm:$0xff] %v3192_v39 }
 0x1e8   : > { %v1168_v30 = vpop.f32.mrf.mxu1  ;;  %v1188_v29 = vpop.f32.mrf.mxu2 }
 0x1e9   : > { %v1169_v17 = vadd.f32 %v1168_v30, %v1149_v40  ;;  %v3160_v30 = vld [vmem:[#allocation7 + $0xf8] sm:$0xff]  ;;  %v3194_v40 = vld [vmem:[#allocation7 + $0xb0] sm:$0xff] }
 0x1ea   : > { %4105 = vst [vmem:[#allocation54_spill] sm:$0xff] %v3160_v30  ;;  %1553 = vmatpush.msrb.mxu2 %v3160_v30 }
 0x1eb   : > { %v1189_v16 = vadd.f32 %v1188_v29, %v1169_v17  ;;  %v1208_v28 = vpop.f32.mrf.mxu3  ;;  %v3162_v17 = vld [vmem:[#allocation7 + $0xe0] sm:$0xff]  ;;  %v3186_v29 = vld [vmem:[#allocation7 + $0x1e8] sm:$0xff]  ;;  %4118 = vst [vmem:[#allocation67_spill] sm:$0xff] %v3194_v40 }
 0x1ec   : > { %4106 = vst [vmem:[#allocation55_spill] sm:$0xff] %v3162_v17  ;;  %1514 = vmatpush.msrb.mxu0 %v3162_v17 }
 0x1ed   : > { %v1209_v45 = vadd.f32 %v1208_v28, %v1189_v16  ;;  %v3172_v16 = vld [vmem:[#allocation7 + $0x1f0] sm:$0xff]  ;;  %v3183_v28 = vld [vmem:[#allocation7 + $0xc8] sm:$0xff]  ;;  %4115 = vst [vmem:[#allocation64_spill] sm:$0xff] %v3186_v29 }
 0x1ee   : > { %4110 = vst [vmem:[#allocation59_spill] sm:$0xff] %v3172_v16  ;;  %1533 = vmatpush.msrb.mxu1 %v3172_v16  ;;  %v3209_v16 = vld [vmem:[#allocation7 + $0xa8] sm:$0xff] }
 0x1ef   : > { %4114 = vst [vmem:[#allocation63_spill] sm:$0xff] %v3183_v28 }
 0x1f0   : > { %4123 = vst [vmem:[#allocation72_spill] sm:$0xff] %v3209_v16 }
 0x206   : > { %v1228_v15 = vpop.f32.mrf.mxu0 }
 0x207   : > { %v1229_v46 = vadd.f32 %v1228_v15, %v1209_v45  ;;  %v3166_v15 = vld [vmem:[#allocation7 + $0xe8] sm:$0xff]  ;;  %v3197_v45 = vld [vmem:[#allocation7 + $0xb8] sm:$0xff] }
 0x208   : > { %v1248_v27 = vpop.f32.mrf.mxu1  ;;  %4107 = vst [vmem:[#allocation56_spill] sm:$0xff] %v3166_v15  ;;  %1554 = vmatpush.msrb.mxu2 %v3166_v15 }
 0x209   : > { %v1249_v14 = vadd.f32 %v1248_v27, %v1229_v46  ;;  %v3180_v27 = vld [vmem:[#allocation7 + $0xc0] sm:$0xff]  ;;  %4119 = vst [vmem:[#allocation68_spill] sm:$0xff] %v3197_v45 }
 0x20a   : > { %v1268_v26 = vpop.f32.mrf.mxu2  ;;  %4113 = vst [vmem:[#allocation62_spill] sm:$0xff] %v3180_v27  ;;  %v3202_v46 = vld [vmem:[#allocation7 + $0x1c0] sm:$0xff] }
 0x20b   : > { %v1269_v9 = vadd.f32 %v1268_v26, %v1249_v14  ;;  %v3168_v14 = vld [vmem:[#allocation7 + $0xd0] sm:$0xff]  ;;  %v3178_v26 = vld [vmem:[#allocation7 + $0x1e0] sm:$0xff]  ;;  %4120 = vst [vmem:[#allocation69_spill] sm:$0xff] %v3202_v46 }
 0x20c   : > { %v1288_v25 = vpop.f32.mrf.mxu3  ;;  %4108 = vst [vmem:[#allocation57_spill] sm:$0xff] %v3168_v14  ;;  %1515 = vmatpush.msrb.mxu0 %v3168_v14  ;;  %1534 = vmatpush.msrb.mxu1 %v3178_v26 }
 0x20d   : > { %v3154_v47 = vadd.f32 %v1288_v25, %v1269_v9  ;;  %v3170_v9 = vld [vmem:[#allocation7 + $0xd8] sm:$0xff]  ;;  %4112 = vst [vmem:[#allocation61_spill] sm:$0xff] %v3178_v26 }
 0x20e   : > { %4109 = vst [vmem:[#allocation58_spill] sm:$0xff] %v3170_v9  ;;  %v3176_v25 = vld [vmem:[#allocation7 + $0x1f8] sm:$0xff]  ;;  %1555 = vmatpush.msrb.mxu2 %v3170_v9  ;;  %1516 = vmatpush.msrb.mxu0 %v3180_v27 }
 0x20f   : > { %4103 = vst [vmem:[#allocation52_spill] sm:$0xff] %v3154_v47  ;;  %1397 = vmatmul.f32.vlgmr.msra.gmra.mxu1 %v3154_v47  ;;  %1437 = vmatmul.f32.vlgmr.msra.gmra.mxu3 %v3154_v47  ;;  %v3204_v47 = vld [vmem:[#allocation7 + $0x1c8] sm:$0xff]  ;;  %v3216_v26 = vld [vmem:[#allocation7 + $0x1b8] sm:$0xff] }
 0x210   : > { %4111 = vst [vmem:[#allocation60_spill] sm:$0xff] %v3176_v25  ;;  %1573 = vmatpush.msrb.mxu3 %v3176_v25  ;;  %1556 = vmatpush.msrb.mxu2 %v3183_v28  ;;  %v3206_v25 = vld [vmem:[#allocation7 + $0xa0] sm:$0xff]  ;;  %v3218_v28 = vld [vmem:[#allocation7 + $0x90] sm:$0xff]  ;;  %v3221_v27 = vld [vmem:[#allocation7 + $0x98] sm:$0xff] }
 0x211   : > { %4121 = vst [vmem:[#allocation70_spill] sm:$0xff] %v3204_v47  ;;  %1535 = vmatpush.msrb.mxu1 %v3190_v31  ;;  %1517 = vmatpush.msrb.mxu0 %v3194_v40  ;;  %v3228_v31 = vld [vmem:[#allocation7 + $0x1a8] sm:$0xff] }
 0x212   : > { %1574 = vmatpush.msrb.mxu3 %v3186_v29  ;;  %4122 = vst [vmem:[#allocation71_spill] sm:$0xff] %v3206_v25  ;;  %1557 = vmatpush.msrb.mxu2 %v3197_v45  ;;  %v3214_v29 = vld [vmem:[#allocation7 + $0x1b0] sm:$0xff]  ;;  %v3230_v45 = vld [vmem:[#allocation7 + $0x80] sm:$0xff]  ;;  %v3233_v40 = vld [vmem:[#allocation7 + $0x88] sm:$0xff] }
 0x213   : > { %4124 = vst [vmem:[#allocation73_spill] sm:$0xff] %v3214_v29  ;;  %1536 = vmatpush.msrb.mxu1 %v3202_v46  ;;  %1518 = vmatpush.msrb.mxu0 %v3206_v25  ;;  %v3240_v46 = vld [vmem:[#allocation7 + $0x198] sm:$0xff] }
 0x214   : > { %1575 = vmatpush.msrb.mxu3 %v3192_v39  ;;  %4125 = vst [vmem:[#allocation74_spill] sm:$0xff] %v3216_v26  ;;  %1558 = vmatpush.msrb.mxu2 %v3209_v16  ;;  %v3226_v39 = vld [vmem:[#allocation7 + $0x1a0] sm:$0xff]  ;;  %v3242_v16 = vld [vmem:[#allocation7 + $0x70] sm:$0xff]  ;;  %v3245_v25 = vld [vmem:[#allocation7 + $0x78] sm:$0xff] }
 0x215   : > { %4126 = vst [vmem:[#allocation75_spill] sm:$0xff] %v3218_v28  ;;  %1537 = vmatpush.msrb.mxu1 %v3214_v29  ;;  %1519 = vmatpush.msrb.mxu0 %v3218_v28  ;;  %v3252_v29 = vld [vmem:[#allocation7 + $0x188] sm:$0xff] }
 0x216   : > { %4127 = vst [vmem:[#allocation76_spill] sm:$0xff] %v3221_v27  ;;  %1576 = vmatpush.msrb.mxu3 %v3204_v47  ;;  %1559 = vmatpush.msrb.mxu2 %v3221_v27  ;;  %v3238_v47 = vld [vmem:[#allocation7 + $0x190] sm:$0xff]  ;;  %v3254_v27 = vld [vmem:[#allocation7 + $0x60] sm:$0xff]  ;;  %v3257_v28 = vld [vmem:[#allocation7 + $0x68] sm:$0xff] }
 0x217   : > { %4128 = vst [vmem:[#allocation77_spill] sm:$0xff] %v3226_v39  ;;  %1538 = vmatpush.msrb.mxu1 %v3226_v39  ;;  %1520 = vmatpush.msrb.mxu0 %v3230_v45  ;;  %v3264_v39 = vld [vmem:[#allocation7 + $0x178] sm:$0xff] }
 0x218   : > { %4129 = vst [vmem:[#allocation78_spill] sm:$0xff] %v3228_v31  ;;  %1577 = vmatpush.msrb.mxu3 %v3216_v26  ;;  %1560 = vmatpush.msrb.mxu2 %v3233_v40  ;;  %v3250_v26 = vld [vmem:[#allocation7 + $0x180] sm:$0xff] }
 0x219   : > { %4130 = vst [vmem:[#allocation79_spill] sm:$0xff] %v3230_v45  ;;  %1539 = vmatpush.msrb.mxu1 %v3238_v47  ;;  %1521 = vmatpush.msrb.mxu0 %v3242_v16  ;;  %v3269_v45 = vld [vmem:[#allocation7 + $0x58] sm:$0xff] }
 0x21a   : > { %4131 = vst [vmem:[#allocation80_spill] sm:$0xff] %v3233_v40  ;;  %1578 = vmatpush.msrb.mxu3 %v3228_v31  ;;  %1561 = vmatpush.msrb.mxu2 %v3245_v25  ;;  %v3262_v31 = vld [vmem:[#allocation7 + $0x170] sm:$0xff] }
 0x21b   : > { %4132 = vst [vmem:[#allocation81_spill] sm:$0xff] %v3238_v47  ;;  %v3266_v40 = vld [vmem:[#allocation7 + $0x50] sm:$0xff]  ;;  %1540 = vmatpush.msrb.mxu1 %v3250_v26  ;;  %1522 = vmatpush.msrb.mxu0 %v3254_v27  ;;  %v3276_v47 = vld [vmem:[#allocation7 + $0x168] sm:$0xff] }
 0x21c   : > { %4133 = vst [vmem:[#allocation82_spill] sm:$0xff] %v3240_v46  ;;  %1579 = vmatpush.msrb.mxu3 %v3240_v46  ;;  %1562 = vmatpush.msrb.mxu2 %v3257_v28  ;;  %v3274_v46 = vld [vmem:[#allocation7 + $0x160] sm:$0xff] }
 0x21d   : > { %4134 = vst [vmem:[#allocation83_spill] sm:$0xff] %v3242_v16  ;;  %1541 = vmatpush.msrb.mxu1 %v3262_v31  ;;  %v3281_v16 = vld [vmem:[#allocation7 + $0x48] sm:$0xff]  ;;  %1523 = vmatpush.msrb.mxu0 %v3266_v40 }
 0x21e   : > { %4135 = vst [vmem:[#allocation84_spill] sm:$0xff] %v3245_v25  ;;  %1580 = vmatpush.msrb.mxu3 %v3252_v29  ;;  %v3278_v25 = vld [vmem:[#allocation7 + $0x40] sm:$0xff]  ;;  %1563 = vmatpush.msrb.mxu2 %v3269_v45 }
 0x21f   : > { %4136 = vst [vmem:[#allocation85_spill] sm:$0xff] %v3250_v26  ;;  %1542 = vmatpush.msrb.mxu1 %v3274_v46  ;;  %v3289_v26 = vld [vmem:[#allocation7 + $0x38] sm:$0xff]  ;;  %1524 = vmatpush.msrb.mxu0 %v3278_v25 }
 0x220   : > { %4137 = vst [vmem:[#allocation86_spill] sm:$0xff] %v3252_v29  ;;  %1581 = vmatpush.msrb.mxu3 %v3264_v39  ;;  %v3286_v29 = vld [vmem:[#allocation7 + $0x30] sm:$0xff]  ;;  %1564 = vmatpush.msrb.mxu2 %v3281_v16 }
 0x221   : > { %4138 = vst [vmem:[#allocation87_spill] sm:$0xff] %v3254_v27  ;;  %1525 = vmatpush.msrb.mxu0 %v3286_v29 }
 0x222   : > { %4139 = vst [vmem:[#allocation88_spill] sm:$0xff] %v3257_v28  ;;  %1582 = vmatpush.msrb.mxu3 %v3276_v47  ;;  %1565 = vmatpush.msrb.mxu2 %v3289_v26 }
 0x223   : > { %4140 = vst [vmem:[#allocation89_spill] sm:$0xff] %v3262_v31  ;;  %v3298_v31 = vld [vmem:[#allocation7 + $0x150] sm:$0xff] }
 0x224   : > { %4141 = vst [vmem:[#allocation90_spill] sm:$0xff] %v3264_v39  ;;  %v3296_v39 = vld [vmem:[#allocation7 + $0x20] sm:$0xff]  ;;  %1543 = vmatpush.msrb.mxu1 %v3298_v31 }
 0x225   : > { %4142 = vst [vmem:[#allocation91_spill] sm:$0xff] %v3266_v40  ;;  %1526 = vmatpush.msrb.mxu0 %v3296_v39 }
 0x226   : > { %4143 = vst [vmem:[#allocation92_spill] sm:$0xff] %v3269_v45  ;;  %v3300_v45 = vld [vmem:[#allocation7 + $0x28] sm:$0xff] }
 0x227   : > { %4144 = vst [vmem:[#allocation93_spill] sm:$0xff] %v3274_v46  ;;  %v3304_v46 = vld [vmem:[#allocation7 + $0x158] sm:$0xff]  ;;  %1566 = vmatpush.msrb.mxu2 %v3300_v45 }
 0x228   : > { %4145 = vst [vmem:[#allocation94_spill] sm:$0xff] %v3276_v47  ;;  %1583 = vmatpush.msrb.mxu3 %v3304_v46  ;;  %v3308_v47 = vld [vmem:[#allocation7 + $0x10] sm:$0xff] }
 0x229   : > { %4146 = vst [vmem:[#allocation95_spill] sm:$0xff] %v3281_v16  ;;  %1527 = vmatpush.msrb.mxu0 %v3308_v47  ;;  %v3316_v16 = vld [vmem:[#allocation7 + $0x148] sm:$0xff] }
 0x22a   : > { %4147 = vst [vmem:[#allocation96_spill] sm:$0xff] %v3286_v29  ;;  %v3310_v29 = vld [vmem:[#allocation7 + $0x140] sm:$0xff]  ;;  %1584 = vmatpush.msrb.mxu3 %v3316_v16 }
 0x22b   : > { %4148 = vst [vmem:[#allocation97_spill] sm:$0xff] %v3289_v26  ;;  %v3312_v26 = vld [vmem:[#allocation7 + $0x18] sm:$0xff]  ;;  %1544 = vmatpush.msrb.mxu1 %v3310_v29 }
 0x22c   : > { %4149 = vst [vmem:[#allocation98_spill] sm:$0xff] %v3296_v39  ;;  %1567 = vmatpush.msrb.mxu2 %v3312_v26  ;;  %v3320_v39 = vld [vmem:[#allocation7] sm:$0xff] }
 0x22d   : > { %4150 = vst [vmem:[#allocation99_spill] sm:$0xff] %v3298_v31  ;;  %1528 = vmatpush.msrb.mxu0 %v3320_v39  ;;  %v3328_v31 = vld [vmem:[#allocation7 + $0x138] sm:$0xff] }
 0x22e   : > { %4151 = vst [vmem:[#allocation100_spill] sm:$0xff] %v3300_v45  ;;  %v3322_v45 = vld [vmem:[#allocation7 + $0x130] sm:$0xff]  ;;  %1585 = vmatpush.msrb.mxu3 %v3328_v31 }
 0x22f   : > { %4152 = vst [vmem:[#allocation101_spill] sm:$0xff] %v3304_v46  ;;  %v3324_v46 = vld [vmem:[#allocation7 + $0x8] sm:$0xff]  ;;  %1545 = vmatpush.msrb.mxu1 %v3322_v45  ;;  %1597 = vmatpush.msra.mxu0 %v2942_v58 }
 0x230   : > { %4153 = vst [vmem:[#allocation102_spill] sm:$0xff] %v3308_v47  ;;  %1568 = vmatpush.msrb.mxu2 %v3324_v46  ;;  %v3332_v47 = vld [vmem:[#allocation7 + $0x120] sm:$0xff] }
 0x231   : > { %4154 = vst [vmem:[#allocation103_spill] sm:$0xff] %v3310_v29  ;;  %1546 = vmatpush.msrb.mxu1 %v3332_v47  ;;  %1598 = vmatpush.msra.mxu0 %v2951_v61 }
 0x232   : > { %4155 = vst [vmem:[#allocation104_spill] sm:$0xff] %v3312_v26  ;;  %v3334_v26 = vld [vmem:[#allocation7 + $0x128] sm:$0xff]  ;;  %1637 = vmatpush.msra.mxu2 %v2944_v59 }
 0x233   : > { %4156 = vst [vmem:[#allocation105_spill] sm:$0xff] %v3316_v16  ;;  %1586 = vmatpush.msrb.mxu3 %v3334_v26  ;;  %v3339_v16 = vld [vmem:[#allocation7 + $0x110] sm:$0xff]  ;;  %1599 = vmatpush.msra.mxu0 %v2961_v0 }
 0x234   : > { %4157 = vst [vmem:[#allocation106_spill] sm:$0xff] %v3320_v39  ;;  %v3341_v39 = vld [vmem:[#allocation7 + $0x118] sm:$0xff]  ;;  %1547 = vmatpush.msrb.mxu1 %v3339_v16  ;;  %1638 = vmatpush.msra.mxu2 %v2954_v63 }
 0x235   : > { %4158 = vst [vmem:[#allocation107_spill] sm:$0xff] %v3322_v45  ;;  %1587 = vmatpush.msrb.mxu3 %v3341_v39  ;;  %1600 = vmatpush.msra.mxu0 %v2967_v62 }
 0x236   : > { %4159 = vst [vmem:[#allocation108_spill] sm:$0xff] %v3324_v46  ;;  %v3347_v46 = vld [vmem:[#allocation7 + $0x100] sm:$0xff]  ;;  %1639 = vmatpush.msra.mxu2 %v2964_v55 }
 0x237   : > { %4160 = vst [vmem:[#allocation109_spill] sm:$0xff] %v3328_v31  ;;  %v3349_v31 = vld [vmem:[#allocation7 + $0x108] sm:$0xff]  ;;  %1548 = vmatpush.msrb.mxu1 %v3347_v46  ;;  %1601 = vmatpush.msra.mxu0 %v2973_v35 }
 0x238   : > { %4161 = vst [vmem:[#allocation110_spill] sm:$0xff] %v3332_v47  ;;  %1588 = vmatpush.msrb.mxu3 %v3349_v31  ;;  %1640 = vmatpush.msra.mxu2 %v2970_v32 }
 0x239   : > { %4162 = vst [vmem:[#allocation111_spill] sm:$0xff] %v3334_v26  ;;  %1617 = vmatpush.msra.mxu1 %v3053_v33  ;;  %1602 = vmatpush.msra.mxu0 %v2979_v2 }
 0x23a   : > { %4163 = vst [vmem:[#allocation112_spill] sm:$0xff] %v3339_v16  ;;  %1657 = vmatpush.msra.mxu3 %v3055_v34  ;;  %1641 = vmatpush.msra.mxu2 %v2976_v60 }
 0x23b   : > { %4164 = vst [vmem:[#allocation113_spill] sm:$0xff] %v3341_v39  ;;  %1618 = vmatpush.msra.mxu1 %v3057_v38  ;;  %1603 = vmatpush.msra.mxu0 %v2985_v37 }
 0x23c   : > { %4165 = vst [vmem:[#allocation114_spill] sm:$0xff] %v3347_v46  ;;  %1658 = vmatpush.msra.mxu3 %v3061_v41  ;;  %1642 = vmatpush.msra.mxu2 %v2982_v1 }
 0x23d   : > { %4166 = vst [vmem:[#allocation115_spill] sm:$0xff] %v3349_v31  ;;  %1619 = vmatpush.msra.mxu1 %v3063_v42  ;;  %1604 = vmatpush.msra.mxu0 %v2993_v4 }
 0x23e   : > { %1659 = vmatpush.msra.mxu3 %v3065_v44  ;;  %1643 = vmatpush.msra.mxu2 %v2988_v3 }
 0x23f   : > { %1620 = vmatpush.msra.mxu1 %v3073_v48  ;;  %1605 = vmatpush.msra.mxu0 %v2999_v6 }
 0x240   : > { %1660 = vmatpush.msra.mxu3 %v3075_v49  ;;  %1644 = vmatpush.msra.mxu2 %v2995_v5  ;;  %v1355_v49 = vld [vmem:[%s3861_s9] sm:$0x3] }
 0x241   : > { %1621 = vmatpush.msra.mxu1 %v3079_v50  ;;  %1606 = vmatpush.msra.mxu0 %v3005_v36 }
 0x242   : > { %1661 = vmatpush.msra.mxu3 %v3081_v52  ;;  %1645 = vmatpush.msra.mxu2 %v3001_v7 }
 0x243   : > { %1622 = vmatpush.msra.mxu1 %v3085_v53  ;;  %1607 = vmatpush.msra.mxu0 %v3011_v43  ;;  %v3389_v53 = vperm.slane %v1355_v49, 0  ;;  %v4169_v43 = vld [vmem:[#allocation24_spill] sm:$0xff] }
 0x244   : > { %1662 = vmatpush.msra.mxu3 %v3087_v54  ;;  %1646 = vmatpush.msra.mxu2 %v3007_v51 }
 0x245   : > { %1623 = vmatpush.msra.mxu1 %v3091_v56  ;;  %4167 = vst [vmem:[#allocation116_spill] sm:$0xff] %v3389_v53  ;;  %1608 = vmatpush.msra.mxu0 %v3017_v10  ;;  %v4170_v10 = vld [vmem:[#allocation41_spill] sm:$0xff] }
 0x246   : > { %1663 = vmatpush.msra.mxu3 %v3093_v57  ;;  %1647 = vmatpush.msra.mxu2 %v3013_v8  ;;  %v4168_v8 = vld [vmem:[#allocation40_spill] sm:$0xff]  ;;  %v4172_v57 = vld [vmem:[#allocation25_spill] sm:$0xff] }
 0x247   : > { %1624 = vmatpush.msra.mxu1 %v3097_v20  ;;  %1609 = vmatpush.msra.mxu0 %v3023_v12 }
 0x248   : > { %1664 = vmatpush.msra.mxu3 %v3099_v21  ;;  %1648 = vmatpush.msra.mxu2 %v3019_v11 }
 0x249   : > { %1625 = vmatpush.msra.mxu1 %v3103_v22  ;;  %1610 = vmatpush.msra.mxu0 %v4169_v43  ;;  %v3404_v22 = vperm.slane %v1355_v49, 1  ;;  %v4178_v43 = vld [vmem:[#allocation28_spill] sm:$0xff] }
 0x24a   : > { %1665 = vmatpush.msra.mxu3 %v3105_v23  ;;  %1649 = vmatpush.msra.mxu2 %v3025_v13  ;;  %v4173_v23 = vld [vmem:[#allocation42_spill] sm:$0xff]  ;;  %v4176_v13 = vld [vmem:[#allocation27_spill] sm:$0xff] }
 0x24b   : > { %1626 = vmatpush.msra.mxu1 %v3109_v24  ;;  %4171 = vst [vmem:[#allocation117_spill] sm:$0xff] %v3404_v22  ;;  %v4174_v24 = vld [vmem:[#allocation26_spill] sm:$0xff] }
 0x24c   : > { %1666 = vmatpush.msra.mxu3 %v4168_v8  ;;  %1650 = vmatpush.msra.mxu2 %v4172_v57  ;;  %v4177_v8 = vld [vmem:[#allocation44_spill] sm:$0xff] }
 0x24d   : > { %1627 = vmatpush.msra.mxu1 %v4170_v10  ;;  %1611 = vmatpush.msra.mxu0 %v4174_v24  ;;  %v4179_v10 = vld [vmem:[#allocation45_spill] sm:$0xff] }
 0x24e   : > { %1667 = vmatpush.msra.mxu3 %v4173_v23  ;;  %1651 = vmatpush.msra.mxu2 %v4176_v13  ;;  %v4181_v23 = vld [vmem:[#allocation46_spill] sm:$0xff] }
 0x24f   : > { %1612 = vmatpush.msra.mxu0 %v4178_v43 }
 0x250   : > { %1668 = vmatpush.msra.mxu3 %v4177_v8 }
 0x251   : > { %v1378_v54 = vpop.f32.mrf.mxu0 }
 0x252   : > { %v1379_v20 = vadd.f32 %v1378_v54, %v3389_v53  ;;  %v4175_v54 = vld [vmem:[#allocation43_spill] sm:$0xff]  ;;  %1669 = vmatpush.msra.mxu3 %v4181_v23 }
 0x253   : > { %1628 = vmatpush.msra.mxu1 %v4175_v54  ;;  %v4182_v54 = vld [vmem:[#allocation47_spill] sm:$0xff] }
 0x255   : > { %1629 = vmatpush.msra.mxu1 %v4179_v10  ;;  %v4184_v10 = vld [vmem:[#allocation49_spill] sm:$0xff] }
 0x257   : > { %v1418_v12 = vpop.f32.mrf.mxu2  ;;  %1630 = vmatpush.msra.mxu1 %v4182_v54 }
 0x258   : > { %v1419_v49 = vadd.f32 %v1418_v12, %v3404_v22  ;;  %v4185_v12 = vld [vmem:[#allocation50_spill] sm:$0xff]  ;;  %v4195_v22 = vld [vmem:[#allocation65_spill] sm:$0xff] }
 0x259   : > { %1631 = vmatpush.msra.mxu1 %v4184_v10 }
 0x28c   : > { %v1398_v21 = vpop.f32.mrf.mxu1 }
 0x28d   : > { %v1399_v11 = vadd.f32 %v1398_v21, %v1379_v20  ;;  %v4180_v21 = vld [vmem:[#allocation29_spill] sm:$0xff] }
 0x28e   : > { %1652 = vmatpush.msra.mxu2 %v4180_v21 }
 0x28f   : > { %v1441_v53 = vmax.f32 %v1399_v11, 0.0  ;;  %v4183_v11 = vld [vmem:[#allocation48_spill] sm:$0xff] }
 0x290   : > { %1670 = vmatpush.msra.mxu3 %v4183_v11 }
 0x291   : > { %1529 = vmatmul.f32.vlgmr.msrb.gmra.mxu0 %v1441_v53  ;;  %1569 = vmatmul.f32.vlgmr.msrb.gmra.mxu2 %v1441_v53  ;;  %v4186_v53 = vld [vmem:[#allocation51_spill] sm:$0xff] }
 0x292   : > { %v1438_v20 = vpop.f32.mrf.mxu3  ;;  %1679 = vmatpush.msrb.mxu0 %v3158_v19  ;;  %1719 = vmatpush.msrb.mxu2 %v3160_v30  ;;  %v4191_v30 = vld [vmem:[#allocation61_spill] sm:$0xff]  ;;  %v4194_v19 = vld [vmem:[#allocation68_spill] sm:$0xff] }
 0x293   : > { %v1439_v24 = vadd.f32 %v1438_v20, %v1419_v49  ;;  %1671 = vmatpush.msra.mxu3 %v4185_v12  ;;  %1632 = vmatpush.msra.mxu1 %v4186_v53  ;;  %v4187_v49 = vld [vmem:[#allocation59_spill] sm:$0xff]  ;;  %v4189_v20 = vld [vmem:[#allocation62_spill] sm:$0xff] }
 0x294   : > { %1680 = vmatpush.msrb.mxu0 %v3162_v17  ;;  %1720 = vmatpush.msrb.mxu2 %v3166_v15  ;;  %v4190_v17 = vld [vmem:[#allocation63_spill] sm:$0xff]  ;;  %v4192_v15 = vld [vmem:[#allocation64_spill] sm:$0xff] }
 0x295   : > { %v1442_v43 = vmax.f32 %v1439_v24, 0.0  ;;  %1672 = vmatpush.msra.mxu3 %v3149_v18  ;;  %v4188_v24 = vld [vmem:[#allocation60_spill] sm:$0xff] }
 0x296   : > { %1681 = vmatpush.msrb.mxu0 %v3168_v14  ;;  %1721 = vmatpush.msrb.mxu2 %v3170_v9  ;;  %v4196_v14 = vld [vmem:[#allocation66_spill] sm:$0xff]  ;;  %v4197_v9 = vld [vmem:[#allocation71_spill] sm:$0xff] }
 0x297   : > { %1549 = vmatmul.f32.vlgmr.msrb.gmra.mxu1 %v1442_v43  ;;  %1589 = vmatmul.f32.vlgmr.msrb.gmra.mxu3 %v1442_v43  ;;  %v4193_v43 = vld [vmem:[#allocation67_spill] sm:$0xff] }
 0x298   : > { %1699 = vmatpush.msrb.mxu1 %v4187_v49  ;;  %1739 = vmatpush.msrb.mxu3 %v4188_v24  ;;  %v4198_v49 = vld [vmem:[#allocation72_spill] sm:$0xff]  ;;  %v4199_v24 = vld [vmem:[#allocation69_spill] sm:$0xff] }
 0x299   : > { %1682 = vmatpush.msrb.mxu0 %v4189_v20  ;;  %1722 = vmatpush.msrb.mxu2 %v4190_v17  ;;  %v4200_v20 = vld [vmem:[#allocation70_spill] sm:$0xff]  ;;  %v4201_v17 = vld [vmem:[#allocation75_spill] sm:$0xff] }
 0x29a   : > { %1700 = vmatpush.msrb.mxu1 %v4191_v30  ;;  %1740 = vmatpush.msrb.mxu3 %v4192_v15  ;;  %v4202_v30 = vld [vmem:[#allocation76_spill] sm:$0xff]  ;;  %v4203_v15 = vld [vmem:[#allocation73_spill] sm:$0xff] }
 0x29b   : > { %1683 = vmatpush.msrb.mxu0 %v4193_v43  ;;  %1723 = vmatpush.msrb.mxu2 %v4194_v19  ;;  %v4204_v43 = vld [vmem:[#allocation74_spill] sm:$0xff]  ;;  %v4205_v19 = vld [vmem:[#allocation79_spill] sm:$0xff] }
 0x29c   : > { %1701 = vmatpush.msrb.mxu1 %v4195_v22  ;;  %1741 = vmatpush.msrb.mxu3 %v4196_v14  ;;  %v4206_v22 = vld [vmem:[#allocation80_spill] sm:$0xff]  ;;  %v4207_v14 = vld [vmem:[#allocation77_spill] sm:$0xff] }
 0x29d   : > { %1684 = vmatpush.msrb.mxu0 %v4197_v9  ;;  %1724 = vmatpush.msrb.mxu2 %v4198_v49  ;;  %v4208_v9 = vld [vmem:[#allocation78_spill] sm:$0xff]  ;;  %v4209_v49 = vld [vmem:[#allocation83_spill] sm:$0xff] }
 0x29e   : > { %1702 = vmatpush.msrb.mxu1 %v4199_v24  ;;  %1742 = vmatpush.msrb.mxu3 %v4200_v20  ;;  %v4210_v24 = vld [vmem:[#allocation84_spill] sm:$0xff]  ;;  %v4211_v20 = vld [vmem:[#allocation81_spill] sm:$0xff] }
 0x29f   : > { %1685 = vmatpush.msrb.mxu0 %v4201_v17  ;;  %1725 = vmatpush.msrb.mxu2 %v4202_v30  ;;  %v4212_v17 = vld [vmem:[#allocation82_spill] sm:$0xff] }
 0x2a0   : > { %1703 = vmatpush.msrb.mxu1 %v4203_v15  ;;  %1743 = vmatpush.msrb.mxu3 %v4204_v43  ;;  %v4213_v43 = vld [vmem:[#allocation85_spill] sm:$0xff]  ;;  %v4214_v15 = vld [vmem:[#allocation86_spill] sm:$0xff] }
 0x2a1   : > { %1686 = vmatpush.msrb.mxu0 %v4205_v19  ;;  %1726 = vmatpush.msrb.mxu2 %v4206_v22 }
 0x2a2   : > { %1704 = vmatpush.msrb.mxu1 %v4207_v14  ;;  %1744 = vmatpush.msrb.mxu3 %v4208_v9  ;;  %v4215_v14 = vld [vmem:[#allocation92_spill] sm:$0xff]  ;;  %v4216_v9 = vld [vmem:[#allocation89_spill] sm:$0xff] }
 0x2a3   : > { %1687 = vmatpush.msrb.mxu0 %v4209_v49  ;;  %1727 = vmatpush.msrb.mxu2 %v4210_v24  ;;  %v4217_v49 = vld [vmem:[#allocation90_spill] sm:$0xff] }
 0x2a4   : > { %1705 = vmatpush.msrb.mxu1 %v4211_v20  ;;  %1745 = vmatpush.msrb.mxu3 %v4212_v17  ;;  %v4218_v20 = vld [vmem:[#allocation95_spill] sm:$0xff]  ;;  %v4219_v17 = vld [vmem:[#allocation93_spill] sm:$0xff] }
 0x2a5   : > { %1688 = vmatpush.msrb.mxu0 %v3254_v27  ;;  %1728 = vmatpush.msrb.mxu2 %v3257_v28  ;;  %v4220_v27 = vld [vmem:[#allocation94_spill] sm:$0xff]  ;;  %v4221_v28 = vld [vmem:[#allocation96_spill] sm:$0xff] }
 0x2a6   : > { %1706 = vmatpush.msrb.mxu1 %v4213_v43  ;;  %1746 = vmatpush.msrb.mxu3 %v4214_v15  ;;  %v4222_v43 = vld [vmem:[#allocation97_spill] sm:$0xff]  ;;  %v4223_v15 = vld [vmem:[#allocation99_spill] sm:$0xff] }
 0x2a7   : > { %1689 = vmatpush.msrb.mxu0 %v3266_v40  ;;  %1729 = vmatpush.msrb.mxu2 %v4215_v14  ;;  %v4224_v40 = vld [vmem:[#allocation101_spill] sm:$0xff]  ;;  %v4225_v14 = vld [vmem:[#allocation98_spill] sm:$0xff] }
 0x2a8   : > { %1707 = vmatpush.msrb.mxu1 %v4216_v9  ;;  %1747 = vmatpush.msrb.mxu3 %v4217_v49  ;;  %v4226_v9 = vld [vmem:[#allocation100_spill] sm:$0xff]  ;;  %v4227_v49 = vld [vmem:[#allocation105_spill] sm:$0xff] }
 0x2a9   : > { %1690 = vmatpush.msrb.mxu0 %v3278_v25  ;;  %1730 = vmatpush.msrb.mxu2 %v4218_v20  ;;  %v4228_v20 = vld [vmem:[#allocation102_spill] sm:$0xff] }
 0x2aa   : > { %1708 = vmatpush.msrb.mxu1 %v4219_v17  ;;  %1748 = vmatpush.msrb.mxu3 %v4220_v27  ;;  %v4229_v17 = vld [vmem:[#allocation104_spill] sm:$0xff]  ;;  %v4230_v27 = vld [vmem:[#allocation109_spill] sm:$0xff] }
 0x2ab   : > { %1691 = vmatpush.msrb.mxu0 %v4221_v28  ;;  %1731 = vmatpush.msrb.mxu2 %v4222_v43  ;;  %v4231_v43 = vld [vmem:[#allocation106_spill] sm:$0xff] }
 0x2ac   : > { %1709 = vmatpush.msrb.mxu1 %v4223_v15  ;;  %1749 = vmatpush.msrb.mxu3 %v4224_v40  ;;  %v4232_v15 = vld [vmem:[#allocation108_spill] sm:$0xff] }
 0x2ad   : > { %1692 = vmatpush.msrb.mxu0 %v4225_v14  ;;  %1732 = vmatpush.msrb.mxu2 %v4226_v9 }
 0x2ae   : > { %1710 = vmatpush.msrb.mxu1 %v3310_v29  ;;  %1750 = vmatpush.msrb.mxu3 %v4227_v49 }
 0x2af   : > { %1693 = vmatpush.msrb.mxu0 %v4228_v20  ;;  %1733 = vmatpush.msrb.mxu2 %v4229_v17 }
 0x2b0   : > { %1711 = vmatpush.msrb.mxu1 %v3322_v45  ;;  %1751 = vmatpush.msrb.mxu3 %v4230_v27  ;;  %v1507_v27 = vld [vmem:[%s3863_s11] sm:$0x3] }
 0x2b1   : > { %1694 = vmatpush.msrb.mxu0 %v4231_v43  ;;  %1734 = vmatpush.msrb.mxu2 %v4232_v15  ;;  %v3490_v45 = vperm.slane %v1507_v27, 0 }
 0x2b2   : > { %1712 = vmatpush.msrb.mxu1 %v3332_v47  ;;  %1752 = vmatpush.msrb.mxu3 %v3334_v26  ;;  %v3495_v26 = vperm.slane %v1507_v27, 1 }
 0x2b4   : > { %1713 = vmatpush.msrb.mxu1 %v3339_v16  ;;  %1753 = vmatpush.msrb.mxu3 %v3341_v39 }
 0x2b6   : > { %1714 = vmatpush.msrb.mxu1 %v3347_v46  ;;  %1754 = vmatpush.msrb.mxu3 %v3349_v31  ;;  %v4233_v46 = vld [vmem:[#allocation30_spill] sm:$0xff] }
 0x30e   : > { %v1530_v43 = vpop.f32.mrf.mxu0 }
 0x30f   : > { %v1531_v15 = vadd.f32 %v1530_v43, %v3490_v45  ;;  %v4270_v43 = vld [vmem:[#allocation67_spill] sm:$0xff] }
 0x314   : > { %v1550_v47 = vpop.f32.mrf.mxu1  ;;  %v1570_v16 = vpop.f32.mrf.mxu2 }
 0x315   : > { %v3493_v49 = vadd.f32 %v1550_v47, %v1531_v15  ;;  %v1571_v17 = vadd.f32 %v1570_v16, %v3495_v26  ;;  %v4234_v15 = vld [vmem:[#allocation52_spill] sm:$0xff]  ;;  %v4262_v16 = vld [vmem:[#allocation55_spill] sm:$0xff] }
 0x317   : > { %v3498_v39 = vmul.f32 0.33333334, %v3493_v49 }
 0x319   : > { %v1595_v31 = vadd.f32 %v3498_v39, %v4233_v46 }
 0x31a   : > { %v1590_v29 = vpop.f32.mrf.mxu3 }
 0x31b   : > { %v3503_v20 = vadd.f32 %v1590_v29, %v1571_v17  ;;  %1613 = vmatmul.f32.vlgmr.msra.gmra.mxu0 %v1595_v31  ;;  %1653 = vmatmul.f32.vlgmr.msra.gmra.mxu2 %v1595_v31  ;;  %v4264_v31 = vld [vmem:[#allocation57_spill] sm:$0xff] }
 0x31c   : > { %1763 = vmatpush.msra.mxu0 %v2942_v58  ;;  %1803 = vmatpush.msra.mxu2 %v2944_v59  ;;  %v4235_v58 = vld [vmem:[#allocation31_spill] sm:$0xff]  ;;  %v4236_v59 = vld [vmem:[#allocation32_spill] sm:$0xff] }
 0x31d   : > { %v3508_v47 = vmul.f32 0.33333334, %v3503_v20 }
 0x31e   : > { %1764 = vmatpush.msra.mxu0 %v2951_v61  ;;  %1804 = vmatpush.msra.mxu2 %v2954_v63  ;;  %v4237_v61 = vld [vmem:[#allocation33_spill] sm:$0xff]  ;;  %v4238_v63 = vld [vmem:[#allocation34_spill] sm:$0xff] }
 0x31f   : > { %v1596_v27 = vadd.f32 %v3508_v47, %v4234_v15 }
 0x320   : > { %1765 = vmatpush.msra.mxu0 %v2961_v0  ;;  %1805 = vmatpush.msra.mxu2 %v2964_v55  ;;  %v4239_v0 = vld [vmem:[#allocation18_spill] sm:$0xff]  ;;  %v4240_v55 = vld [vmem:[#allocation35_spill] sm:$0xff] }
 0x321   : > { %1633 = vmatmul.f32.vlgmr.msra.gmra.mxu1 %v1596_v27  ;;  %1673 = vmatmul.f32.vlgmr.msra.gmra.mxu3 %v1596_v27  ;;  %v4271_v27 = vld [vmem:[#allocation61_spill] sm:$0xff] }
 0x322   : > { %1766 = vmatpush.msra.mxu0 %v2967_v62  ;;  %1783 = vmatpush.msra.mxu1 %v3053_v33  ;;  %v4241_v62 = vld [vmem:[#allocation19_spill] sm:$0xff] }
 0x323   : > { %1806 = vmatpush.msra.mxu2 %v2970_v32  ;;  %1823 = vmatpush.msra.mxu3 %v3055_v34  ;;  %v4242_v32 = vld [vmem:[#allocation36_spill] sm:$0xff]  ;;  %v4255_v33 = vld [vmem:[#allocation43_spill] sm:$0xff] }
 0x324   : > { %1767 = vmatpush.msra.mxu0 %v2973_v35  ;;  %1784 = vmatpush.msra.mxu1 %v3057_v38  ;;  %v4243_v35 = vld [vmem:[#allocation20_spill] sm:$0xff]  ;;  %v4257_v38 = vld [vmem:[#allocation45_spill] sm:$0xff] }
 0x325   : > { %1807 = vmatpush.msra.mxu2 %v2976_v60  ;;  %1824 = vmatpush.msra.mxu3 %v3061_v41  ;;  %v4244_v60 = vld [vmem:[#allocation37_spill] sm:$0xff]  ;;  %v4256_v34 = vld [vmem:[#allocation28_spill] sm:$0xff] }
 0x326   : > { %1768 = vmatpush.msra.mxu0 %v2979_v2  ;;  %1785 = vmatpush.msra.mxu1 %v3063_v42  ;;  %v4245_v2 = vld [vmem:[#allocation21_spill] sm:$0xff] }
 0x327   : > { %1808 = vmatpush.msra.mxu2 %v2982_v1  ;;  %1825 = vmatpush.msra.mxu3 %v3065_v44  ;;  %v4246_v1 = vld [vmem:[#allocation38_spill] sm:$0xff] }
 0x328   : > { %1769 = vmatpush.msra.mxu0 %v2985_v37  ;;  %1786 = vmatpush.msra.mxu1 %v3073_v48  ;;  %v4247_v37 = vld [vmem:[#allocation22_spill] sm:$0xff] }
 0x329   : > { %1809 = vmatpush.msra.mxu2 %v2988_v3  ;;  %1826 = vmatpush.msra.mxu3 %v4235_v58  ;;  %v4248_v3 = vld [vmem:[#allocation39_spill] sm:$0xff]  ;;  %v4272_v58 = vld [vmem:[#allocation68_spill] sm:$0xff] }
 0x32a   : > { %1770 = vmatpush.msra.mxu0 %v2993_v4  ;;  %1787 = vmatpush.msra.mxu1 %v3079_v50  ;;  %v4249_v4 = vld [vmem:[#allocation23_spill] sm:$0xff] }
 0x32b   : > { %1810 = vmatpush.msra.mxu2 %v2995_v5  ;;  %1827 = vmatpush.msra.mxu3 %v3081_v52  ;;  %v4250_v5 = vld [vmem:[#allocation40_spill] sm:$0xff]  ;;  %v4259_v52 = vld [vmem:[#allocation117_spill] sm:$0xff] }
 0x32c   : > { %1771 = vmatpush.msra.mxu0 %v2999_v6  ;;  %1788 = vmatpush.msra.mxu1 %v4236_v59  ;;  %v4251_v6 = vld [vmem:[#allocation24_spill] sm:$0xff] }
 0x32d   : > { %1811 = vmatpush.msra.mxu2 %v3001_v7  ;;  %1828 = vmatpush.msra.mxu3 %v4237_v61  ;;  %v4252_v7 = vld [vmem:[#allocation41_spill] sm:$0xff]  ;;  %v4273_v59 = vld [vmem:[#allocation64_spill] sm:$0xff]  ;;  %v4274_v61 = vld [vmem:[#allocation71_spill] sm:$0xff] }
 0x32e   : > { %1772 = vmatpush.msra.mxu0 %v3005_v36  ;;  %1789 = vmatpush.msra.mxu1 %v3091_v56  ;;  %v4253_v36 = vld [vmem:[#allocation42_spill] sm:$0xff] }
 0x32f   : > { %1812 = vmatpush.msra.mxu2 %v3007_v51  ;;  %1829 = vmatpush.msra.mxu3 %v4238_v63  ;;  %v4254_v51 = vld [vmem:[#allocation26_spill] sm:$0xff]  ;;  %v4275_v63 = vld [vmem:[#allocation65_spill] sm:$0xff] }
 0x330   : > { %1773 = vmatpush.msra.mxu0 %v4239_v0  ;;  %1790 = vmatpush.msra.mxu1 %v4240_v55  ;;  %v4276_v0 = vld [vmem:[#allocation72_spill] sm:$0xff]  ;;  %v4277_v55 = vld [vmem:[#allocation66_spill] sm:$0xff] }
 0x331   : > { %1813 = vmatpush.msra.mxu2 %v4241_v62  ;;  %1830 = vmatpush.msra.mxu3 %v4242_v32  ;;  %v4278_v62 = vld [vmem:[#allocation75_spill] sm:$0xff]  ;;  %v4279_v32 = vld [vmem:[#allocation69_spill] sm:$0xff] }
 0x332   : > { %1774 = vmatpush.msra.mxu0 %v4243_v35  ;;  %1791 = vmatpush.msra.mxu1 %v4244_v60  ;;  %v4280_v35 = vld [vmem:[#allocation70_spill] sm:$0xff]  ;;  %v4281_v60 = vld [vmem:[#allocation73_spill] sm:$0xff] }
 0x333   : > { %1814 = vmatpush.msra.mxu2 %v4245_v2  ;;  %1831 = vmatpush.msra.mxu3 %v4246_v1  ;;  %v4282_v2 = vld [vmem:[#allocation74_spill] sm:$0xff]  ;;  %v4283_v1 = vld [vmem:[#allocation83_spill] sm:$0xff] }
 0x334   : > { %1775 = vmatpush.msra.mxu0 %v4247_v37  ;;  %1792 = vmatpush.msra.mxu1 %v4248_v3  ;;  %v4284_v37 = vld [vmem:[#allocation77_spill] sm:$0xff]  ;;  %v4285_v3 = vld [vmem:[#allocation78_spill] sm:$0xff] }
 0x335   : > { %1815 = vmatpush.msra.mxu2 %v4249_v4  ;;  %1832 = vmatpush.msra.mxu3 %v4250_v5  ;;  %v4286_v4 = vld [vmem:[#allocation87_spill] sm:$0xff]  ;;  %v4287_v5 = vld [vmem:[#allocation81_spill] sm:$0xff] }
 0x336   : > { %1776 = vmatpush.msra.mxu0 %v4251_v6  ;;  %1793 = vmatpush.msra.mxu1 %v4252_v7  ;;  %v4288_v6 = vld [vmem:[#allocation88_spill] sm:$0xff]  ;;  %v4289_v7 = vld [vmem:[#allocation82_spill] sm:$0xff] }
 0x337   : > { %1816 = vmatpush.msra.mxu2 %v4172_v57  ;;  %1833 = vmatpush.msra.mxu3 %v4253_v36  ;;  %v4290_v36 = vld [vmem:[#allocation91_spill] sm:$0xff] }
 0x338   : > { %1777 = vmatpush.msra.mxu0 %v4254_v51  ;;  %1794 = vmatpush.msra.mxu1 %v4255_v33  ;;  %v4291_v51 = vld [vmem:[#allocation85_spill] sm:$0xff]  ;;  %v4292_v33 = vld [vmem:[#allocation92_spill] sm:$0xff] }
 0x339   : > { %1817 = vmatpush.msra.mxu2 %v4176_v13  ;;  %1834 = vmatpush.msra.mxu3 %v4177_v8  ;;  %v4258_v13 = vld [vmem:[#allocation116_spill] sm:$0xff] }
 0x33a   : > { %1778 = vmatpush.msra.mxu0 %v4256_v34  ;;  %1795 = vmatpush.msra.mxu1 %v4257_v38  ;;  %v4293_v34 = vld [vmem:[#allocation86_spill] sm:$0xff]  ;;  %v4294_v38 = vld [vmem:[#allocation89_spill] sm:$0xff] }
 0x33b   : > { %1818 = vmatpush.msra.mxu2 %v4180_v21  ;;  %1835 = vmatpush.msra.mxu3 %v4181_v23  ;;  %v4260_v23 = vld [vmem:[#allocation53_spill] sm:$0xff]  ;;  %v4266_v21 = vld [vmem:[#allocation62_spill] sm:$0xff] }
 0x33c   : > { %1796 = vmatpush.msra.mxu1 %v4182_v54  ;;  %v4265_v54 = vld [vmem:[#allocation58_spill] sm:$0xff] }
 0x33d   : > { %1836 = vmatpush.msra.mxu3 %v4183_v11  ;;  %v4267_v11 = vld [vmem:[#allocation59_spill] sm:$0xff] }
 0x33e   : > { %1797 = vmatpush.msra.mxu1 %v4184_v10  ;;  %v4261_v10 = vld [vmem:[#allocation54_spill] sm:$0xff] }
 0x33f   : > { %1837 = vmatpush.msra.mxu3 %v4185_v12  ;;  %v4268_v12 = vld [vmem:[#allocation63_spill] sm:$0xff] }
 0x340   : > { %1798 = vmatpush.msra.mxu1 %v4186_v53  ;;  %v4269_v53 = vld [vmem:[#allocation60_spill] sm:$0xff] }
 0x341   : > { %1838 = vmatpush.msra.mxu3 %v3149_v18  ;;  %v4263_v18 = vld [vmem:[#allocation56_spill] sm:$0xff] }
 0x398   : > { %v1614_v8 = vpop.f32.mrf.mxu0 }
 0x399   : > { %v1615_v41 = vadd.f32 %v1614_v8, %v4258_v13  ;;  %v4295_v8 = vld [vmem:[#allocation95_spill] sm:$0xff] }
 0x39e   : > { %v1634_v42 = vpop.f32.mrf.mxu1  ;;  %v1654_v48 = vpop.f32.mrf.mxu2 }
 0x39f   : > { %v1635_v44 = vadd.f32 %v1634_v42, %v1615_v41  ;;  %v1655_v56 = vadd.f32 %v1654_v48, %v4259_v52  ;;  %v4296_v41 = vld [vmem:[#allocation90_spill] sm:$0xff]  ;;  %v4297_v42 = vld [vmem:[#allocation93_spill] sm:$0xff] }
 0x3a0   : > { %v4299_v48 = vld [vmem:[#allocation94_spill] sm:$0xff] }
 0x3a1   : > { %v1677_v50 = vmax.f32 %v1635_v44, 0.0  ;;  %v4298_v44 = vld [vmem:[#allocation97_spill] sm:$0xff] }
 0x3a3   : > { %1695 = vmatmul.f32.vlgmr.msrb.gmra.mxu0 %v1677_v50  ;;  %1735 = vmatmul.f32.vlgmr.msrb.gmra.mxu2 %v1677_v50  ;;  %v4300_v50 = vld [vmem:[#allocation99_spill] sm:$0xff] }
 0x3a4   : > { %v1674_v57 = vpop.f32.mrf.mxu3  ;;  %1845 = vmatpush.msrb.mxu0 %v4260_v23  ;;  %1885 = vmatpush.msrb.mxu2 %v4261_v10  ;;  %v4303_v23 = vld [vmem:[#allocation104_spill] sm:$0xff]  ;;  %v4304_v10 = vld [vmem:[#allocation105_spill] sm:$0xff] }
 0x3a5   : > { %v1675_v17 = vadd.f32 %v1674_v57, %v1655_v56  ;;  %v4301_v56 = vld [vmem:[#allocation102_spill] sm:$0xff]  ;;  %v4302_v57 = vld [vmem:[#allocation103_spill] sm:$0xff] }
 0x3a6   : > { %1846 = vmatpush.msrb.mxu0 %v4262_v16  ;;  %1886 = vmatpush.msrb.mxu2 %v4263_v18  ;;  %v4306_v16 = vld [vmem:[#allocation107_spill] sm:$0xff]  ;;  %v4307_v18 = vld [vmem:[#allocation108_spill] sm:$0xff] }
 0x3a7   : > { %v1678_v29 = vmax.f32 %v1675_v17, 0.0  ;;  %v4305_v17 = vld [vmem:[#allocation106_spill] sm:$0xff] }
 0x3a8   : > { %1847 = vmatpush.msrb.mxu0 %v4264_v31  ;;  %1887 = vmatpush.msrb.mxu2 %v4265_v54  ;;  %v4309_v31 = vld [vmem:[#allocation110_spill] sm:$0xff]  ;;  %v4310_v54 = vld [vmem:[#allocation111_spill] sm:$0xff] }
 0x3a9   : > { %1715 = vmatmul.f32.vlgmr.msrb.gmra.mxu1 %v1678_v29  ;;  %1755 = vmatmul.f32.vlgmr.msrb.gmra.mxu3 %v1678_v29  ;;  %v4308_v29 = vld [vmem:[#allocation109_spill] sm:$0xff] }
 0x3aa   : > { %1848 = vmatpush.msrb.mxu0 %v4266_v21  ;;  %1865 = vmatpush.msrb.mxu1 %v4267_v11  ;;  %v4311_v21 = vld [vmem:[#allocation112_spill] sm:$0xff]  ;;  %v4312_v11 = vld [vmem:[#allocation113_spill] sm:$0xff] }
 0x3ab   : > { %1888 = vmatpush.msrb.mxu2 %v4268_v12  ;;  %1905 = vmatpush.msrb.mxu3 %v4269_v53  ;;  %v4313_v12 = vld [vmem:[#allocation114_spill] sm:$0xff]  ;;  %v4314_v53 = vld [vmem:[#allocation115_spill] sm:$0xff] }
 0x3ac   : > { %1849 = vmatpush.msrb.mxu0 %v4270_v43  ;;  %1866 = vmatpush.msrb.mxu1 %v4271_v27 }
 0x3ad   : > { %1889 = vmatpush.msrb.mxu2 %v4272_v58  ;;  %1906 = vmatpush.msrb.mxu3 %v4273_v59 }
 0x3ae   : > { %1850 = vmatpush.msrb.mxu0 %v4274_v61  ;;  %1867 = vmatpush.msrb.mxu1 %v4275_v63 }
 0x3af   : > { %1890 = vmatpush.msrb.mxu2 %v4276_v0  ;;  %1907 = vmatpush.msrb.mxu3 %v4277_v55 }
 0x3b0   : > { %1851 = vmatpush.msrb.mxu0 %v4278_v62  ;;  %1868 = vmatpush.msrb.mxu1 %v4279_v32 }
 0x3b1   : > { %1891 = vmatpush.msrb.mxu2 %v4202_v30  ;;  %1908 = vmatpush.msrb.mxu3 %v4280_v35 }
 0x3b2   : > { %1852 = vmatpush.msrb.mxu0 %v4205_v19  ;;  %1869 = vmatpush.msrb.mxu1 %v4281_v60  ;;  %v2413_v60 = vld [vmem:[#allocation5 + $0xf0] sm:$0xff] }
 0x3b3   : > { %1892 = vmatpush.msrb.mxu2 %v4206_v22  ;;  %1909 = vmatpush.msrb.mxu3 %v4282_v2  ;;  %v2414_v2 = vld [vmem:[#allocation5 + $0xf8] sm:$0xff] }
 0x3b4   : > { %1853 = vmatpush.msrb.mxu0 %v4283_v1  ;;  %1870 = vmatpush.msrb.mxu1 %v4284_v37 }
 0x3b5   : > { %1893 = vmatpush.msrb.mxu2 %v4210_v24  ;;  %1910 = vmatpush.msrb.mxu3 %v4285_v3 }
 0x3b6   : > { %1854 = vmatpush.msrb.mxu0 %v4286_v4  ;;  %1871 = vmatpush.msrb.mxu1 %v4287_v5 }
 0x3b7   : > { %1894 = vmatpush.msrb.mxu2 %v4288_v6  ;;  %1911 = vmatpush.msrb.mxu3 %v4289_v7 }
 0x3b8   : > { %1855 = vmatpush.msrb.mxu0 %v4290_v36  ;;  %1872 = vmatpush.msrb.mxu1 %v4291_v51 }
 0x3b9   : > { %1895 = vmatpush.msrb.mxu2 %v4292_v33  ;;  %1912 = vmatpush.msrb.mxu3 %v4293_v34 }
 0x3ba   : > { %1856 = vmatpush.msrb.mxu0 %v3278_v25  ;;  %1873 = vmatpush.msrb.mxu1 %v4294_v38 }
 0x3bb   : > { %1896 = vmatpush.msrb.mxu2 %v4295_v8  ;;  %1913 = vmatpush.msrb.mxu3 %v4296_v41 }
 0x3bc   : > { %1857 = vmatpush.msrb.mxu0 %v4221_v28  ;;  %1874 = vmatpush.msrb.mxu1 %v4297_v42 }
 0x3bd   : > { %1897 = vmatpush.msrb.mxu2 %v4298_v44  ;;  %1914 = vmatpush.msrb.mxu3 %v4299_v48 }
 0x3be   : > { %1858 = vmatpush.msrb.mxu0 %v4225_v14  ;;  %1875 = vmatpush.msrb.mxu1 %v4300_v50 }
 0x3bf   : > { %1898 = vmatpush.msrb.mxu2 %v4226_v9  ;;  %1915 = vmatpush.msrb.mxu3 %v4224_v40 }
 0x3c0   : > { %1859 = vmatpush.msrb.mxu0 %v4301_v56  ;;  %1876 = vmatpush.msrb.mxu1 %v4302_v57 }
 0x3c1   : > { %1899 = vmatpush.msrb.mxu2 %v4303_v23  ;;  %1916 = vmatpush.msrb.mxu3 %v4304_v10 }
 0x3c2   : > { %1860 = vmatpush.msrb.mxu0 %v4305_v17  ;;  %1877 = vmatpush.msrb.mxu1 %v4306_v16 }
 0x3c3   : > { %1900 = vmatpush.msrb.mxu2 %v4307_v18  ;;  %1917 = vmatpush.msrb.mxu3 %v4308_v29 }
 0x3c4   : > { %1878 = vmatpush.msrb.mxu1 %v4309_v31 }
 0x3c5   : > { %1918 = vmatpush.msrb.mxu3 %v4310_v54 }
 0x3c6   : > { %1879 = vmatpush.msrb.mxu1 %v4311_v21 }
 0x3c7   : > { %1919 = vmatpush.msrb.mxu3 %v4312_v11 }
 0x3c8   : > { %1880 = vmatpush.msrb.mxu1 %v4313_v12 }
 0x3c9   : > { %1920 = vmatpush.msrb.mxu3 %v4314_v53 }
 0x420   : > { %v1696_v43 = vpop.f32.mrf.mxu0 }
 0x421   : > { %v1697_v27 = vadd.f32 %v1696_v43, %v3490_v45  ;;  %v2415_v43 = vld [vmem:[#allocation5 + $0xe0] sm:$0xff] }
 0x426   : > { %v1716_v58 = vpop.f32.mrf.mxu1  ;;  %v1736_v61 = vpop.f32.mrf.mxu2 }
 0x427   : > { %v3641_v59 = vadd.f32 %v1716_v58, %v1697_v27  ;;  %v1737_v55 = vadd.f32 %v1736_v61, %v3495_v26  ;;  %v2416_v27 = vld [vmem:[#allocation5 + $0xe8] sm:$0xff]  ;;  %v2417_v58 = vld [vmem:[#allocation5 + $0xd0] sm:$0xff]  ;;  %v2418_v61 = vld [vmem:[#allocation5 + $0xd8] sm:$0xff] }
 0x429   : > { %v1759_v63 = vsub.f32 %v3641_v59, %v3498_v39 }
 0x42b   : > { %v1761_v0 = vadd.f32 %v1759_v63, %v4233_v46  ;;  %v2419_v63 = vld [vmem:[#allocation5 + $0xc0] sm:$0xff] }
 0x42c   : > { %v1756_v32 = vpop.f32.mrf.mxu3 }
 0x42d   : > { %v3647_v35 = vadd.f32 %v1756_v32, %v1737_v55  ;;  %1779 = vmatmul.f32.vlgmr.msra.gmra.mxu0 %v1761_v0  ;;  %1819 = vmatmul.f32.vlgmr.msra.gmra.mxu2 %v1761_v0  ;;  %v2420_v0 = vld [vmem:[#allocation5 + $0x1f0] sm:$0xff]  ;;  %v2421_v55 = vld [vmem:[#allocation5 + $0xc8] sm:$0xff]  ;;  %v2422_v32 = vld [vmem:[#allocation5 + $0x1f8] sm:$0xff] }
 0x42e   : > { %1931 = vmatpush.msra.mxu0 %v2413_v60  ;;  %1971 = vmatpush.msra.mxu2 %v2414_v2  ;;  %v2424_v60 = vld [vmem:[#allocation5 + $0x1e0] sm:$0xff]  ;;  %v2425_v2 = vld [vmem:[#allocation5 + $0xb8] sm:$0xff] }
 0x42f   : > { %v1760_v3 = vsub.f32 %v3647_v35, %v3508_v47  ;;  %v2423_v47 = vld [vmem:[#allocation5 + $0xb0] sm:$0xff] }
 0x430   : > { %1932 = vmatpush.msra.mxu0 %v2415_v43  ;;  %1972 = vmatpush.msra.mxu2 %v2416_v27  ;;  %v2427_v43 = vld [vmem:[#allocation5 + $0xa0] sm:$0xff]  ;;  %v2428_v27 = vld [vmem:[#allocation5 + $0x1d0] sm:$0xff] }
 0x431   : > { %v1762_v39 = vadd.f32 %v1760_v3, %v4234_v15  ;;  %v2426_v3 = vld [vmem:[#allocation5 + $0x1e8] sm:$0xff] }
 0x432   : > { %1933 = vmatpush.msra.mxu0 %v2417_v58  ;;  %1973 = vmatpush.msra.mxu2 %v2418_v61  ;;  %v2430_v58 = vld [vmem:[#allocation5 + $0x1d8] sm:$0xff]  ;;  %v2431_v61 = vld [vmem:[#allocation5 + $0x90] sm:$0xff] }
 0x433   : > { %1799 = vmatmul.f32.vlgmr.msra.gmra.mxu1 %v1762_v39  ;;  %1839 = vmatmul.f32.vlgmr.msra.gmra.mxu3 %v1762_v39  ;;  %v2429_v39 = vld [vmem:[#allocation5 + $0xa8] sm:$0xff] }
 0x434   : > { %1934 = vmatpush.msra.mxu0 %v2419_v63  ;;  %1951 = vmatpush.msra.mxu1 %v2420_v0  ;;  %v2432_v63 = vld [vmem:[#allocation5 + $0x1c0] sm:$0xff]  ;;  %v2433_v0 = vld [vmem:[#allocation5 + $0x98] sm:$0xff] }
 0x435   : > { %1974 = vmatpush.msra.mxu2 %v2421_v55  ;;  %1991 = vmatpush.msra.mxu3 %v2422_v32  ;;  %v2434_v55 = vld [vmem:[#allocation5 + $0x1c8] sm:$0xff]  ;;  %v2435_v32 = vld [vmem:[#allocation5 + $0x80] sm:$0xff] }
 0x436   : > { %1935 = vmatpush.msra.mxu0 %v2423_v47  ;;  %1952 = vmatpush.msra.mxu1 %v2424_v60  ;;  %v2436_v47 = vld [vmem:[#allocation5 + $0x1b0] sm:$0xff]  ;;  %v2437_v60 = vld [vmem:[#allocation5 + $0x88] sm:$0xff] }
 0x437   : > { %1975 = vmatpush.msra.mxu2 %v2425_v2  ;;  %1992 = vmatpush.msra.mxu3 %v2426_v3  ;;  %v2438_v2 = vld [vmem:[#allocation5 + $0x1b8] sm:$0xff]  ;;  %v2439_v3 = vld [vmem:[#allocation5 + $0x70] sm:$0xff] }
 0x438   : > { %1936 = vmatpush.msra.mxu0 %v2427_v43  ;;  %1953 = vmatpush.msra.mxu1 %v2428_v27  ;;  %v2440_v43 = vld [vmem:[#allocation5 + $0x1a0] sm:$0xff]  ;;  %v2441_v27 = vld [vmem:[#allocation5 + $0x78] sm:$0xff] }
 0x439   : > { %1976 = vmatpush.msra.mxu2 %v2429_v39  ;;  %1993 = vmatpush.msra.mxu3 %v2430_v58  ;;  %v2442_v39 = vld [vmem:[#allocation5 + $0x1a8] sm:$0xff]  ;;  %v2443_v58 = vld [vmem:[#allocation5 + $0x60] sm:$0xff] }
 0x43a   : > { %1937 = vmatpush.msra.mxu0 %v2431_v61  ;;  %1954 = vmatpush.msra.mxu1 %v2432_v63  ;;  %v2444_v61 = vld [vmem:[#allocation5 + $0x190] sm:$0xff]  ;;  %v2445_v63 = vld [vmem:[#allocation5 + $0x68] sm:$0xff] }
 0x43b   : > { %1977 = vmatpush.msra.mxu2 %v2433_v0  ;;  %1994 = vmatpush.msra.mxu3 %v2434_v55  ;;  %v2446_v0 = vld [vmem:[#allocation5 + $0x198] sm:$0xff]  ;;  %v2447_v55 = vld [vmem:[#allocation5 + $0x50] sm:$0xff] }
 0x43c   : > { %1938 = vmatpush.msra.mxu0 %v2435_v32  ;;  %1955 = vmatpush.msra.mxu1 %v2436_v47  ;;  %v2448_v32 = vld [vmem:[#allocation5 + $0x180] sm:$0xff]  ;;  %v2449_v47 = vld [vmem:[#allocation5 + $0x58] sm:$0xff] }
 0x43d   : > { %1978 = vmatpush.msra.mxu2 %v2437_v60  ;;  %1995 = vmatpush.msra.mxu3 %v2438_v2  ;;  %v2450_v60 = vld [vmem:[#allocation5 + $0x188] sm:$0xff]  ;;  %v2451_v2 = vld [vmem:[#allocation5 + $0x40] sm:$0xff] }
 0x43e   : > { %1939 = vmatpush.msra.mxu0 %v2439_v3  ;;  %1956 = vmatpush.msra.mxu1 %v2440_v43  ;;  %v2452_v3 = vld [vmem:[#allocation5 + $0x170] sm:$0xff]  ;;  %v2453_v43 = vld [vmem:[#allocation5 + $0x48] sm:$0xff] }
 0x43f   : > { %1979 = vmatpush.msra.mxu2 %v2441_v27  ;;  %1996 = vmatpush.msra.mxu3 %v2442_v39  ;;  %v2454_v27 = vld [vmem:[#allocation5 + $0x178] sm:$0xff]  ;;  %v2455_v39 = vld [vmem:[#allocation5 + $0x30] sm:$0xff] }
 0x440   : > { %1940 = vmatpush.msra.mxu0 %v2443_v58  ;;  %1957 = vmatpush.msra.mxu1 %v2444_v61  ;;  %v2456_v58 = vld [vmem:[#allocation5 + $0x160] sm:$0xff]  ;;  %v2457_v61 = vld [vmem:[#allocation5 + $0x38] sm:$0xff] }
 0x441   : > { %1980 = vmatpush.msra.mxu2 %v2445_v63  ;;  %1997 = vmatpush.msra.mxu3 %v2446_v0  ;;  %v2458_v63 = vld [vmem:[#allocation5 + $0x168] sm:$0xff]  ;;  %v2459_v0 = vld [vmem:[#allocation5 + $0x20] sm:$0xff] }
 0x442   : > { %1941 = vmatpush.msra.mxu0 %v2447_v55  ;;  %1958 = vmatpush.msra.mxu1 %v2448_v32  ;;  %v2460_v55 = vld [vmem:[#allocation5 + $0x150] sm:$0xff]  ;;  %v2461_v32 = vld [vmem:[#allocation5 + $0x28] sm:$0xff] }
 0x443   : > { %1981 = vmatpush.msra.mxu2 %v2449_v47  ;;  %1998 = vmatpush.msra.mxu3 %v2450_v60  ;;  %v2462_v47 = vld [vmem:[#allocation5 + $0x158] sm:$0xff]  ;;  %v2463_v60 = vld [vmem:[#allocation5 + $0x10] sm:$0xff] }
 0x444   : > { %1942 = vmatpush.msra.mxu0 %v2451_v2  ;;  %1959 = vmatpush.msra.mxu1 %v2452_v3  ;;  %v2464_v2 = vld [vmem:[#allocation5 + $0x140] sm:$0xff]  ;;  %v2465_v3 = vld [vmem:[#allocation5 + $0x18] sm:$0xff] }
 0x445   : > { %1982 = vmatpush.msra.mxu2 %v2453_v43  ;;  %1999 = vmatpush.msra.mxu3 %v2454_v27  ;;  %v2466_v43 = vld [vmem:[#allocation5 + $0x148] sm:$0xff]  ;;  %v2467_v27 = vld [vmem:[#allocation5] sm:$0xff] }
 0x446   : > { %1943 = vmatpush.msra.mxu0 %v2455_v39  ;;  %1960 = vmatpush.msra.mxu1 %v2456_v58  ;;  %v2468_v39 = vld [vmem:[#allocation5 + $0x130] sm:$0xff]  ;;  %v2469_v58 = vld [vmem:[#allocation5 + $0x8] sm:$0xff] }
 0x447   : > { %1983 = vmatpush.msra.mxu2 %v2457_v61  ;;  %2000 = vmatpush.msra.mxu3 %v2458_v63  ;;  %v2470_v61 = vld [vmem:[#allocation5 + $0x138] sm:$0xff]  ;;  %v2471_v63 = vld [vmem:[#allocation5 + $0x120] sm:$0xff] }
 0x448   : > { %1944 = vmatpush.msra.mxu0 %v2459_v0  ;;  %1961 = vmatpush.msra.mxu1 %v2460_v55  ;;  %v2472_v0 = vld [vmem:[#allocation5 + $0x128] sm:$0xff]  ;;  %v2473_v55 = vld [vmem:[#allocation5 + $0x110] sm:$0xff] }
 0x449   : > { %1984 = vmatpush.msra.mxu2 %v2461_v32  ;;  %2001 = vmatpush.msra.mxu3 %v2462_v47  ;;  %v2474_v32 = vld [vmem:[#allocation5 + $0x118] sm:$0xff]  ;;  %v2475_v47 = vld [vmem:[#allocation5 + $0x100] sm:$0xff] }
 0x44a   : > { %1945 = vmatpush.msra.mxu0 %v2463_v60  ;;  %1962 = vmatpush.msra.mxu1 %v2464_v2  ;;  %v2476_v60 = vld [vmem:[#allocation5 + $0x108] sm:$0xff] }
 0x44b   : > { %1985 = vmatpush.msra.mxu2 %v2465_v3  ;;  %2002 = vmatpush.msra.mxu3 %v2466_v43 }
 0x44c   : > { %1946 = vmatpush.msra.mxu0 %v2467_v27  ;;  %1963 = vmatpush.msra.mxu1 %v2468_v39 }
 0x44d   : > { %1986 = vmatpush.msra.mxu2 %v2469_v58  ;;  %2003 = vmatpush.msra.mxu3 %v2470_v61 }
 0x44e   : > { %1964 = vmatpush.msra.mxu1 %v2471_v63 }
 0x44f   : > { %2004 = vmatpush.msra.mxu3 %v2472_v0  ;;  %v2477_v0 = vld [vmem:[#allocation7 + $0xf0] sm:$0xff] }
 0x450   : > { %1965 = vmatpush.msra.mxu1 %v2473_v55  ;;  %v2478_v55 = vld [vmem:[#allocation7 + $0xf8] sm:$0xff] }
 0x451   : > { %2005 = vmatpush.msra.mxu3 %v2474_v32 }
 0x452   : > { %1966 = vmatpush.msra.mxu1 %v2475_v47  ;;  %v2479_v47 = vld [vmem:[#allocation7 + $0xe0] sm:$0xff] }
 0x453   : > { %2006 = vmatpush.msra.mxu3 %v2476_v60  ;;  %v2480_v60 = vld [vmem:[#allocation7 + $0xe8] sm:$0xff] }
 0x4aa   : > { %v1780_v2 = vpop.f32.mrf.mxu0 }
 0x4ab   : > { %v1781_v3 = vadd.f32 %v1780_v2, %v4258_v13  ;;  %v2481_v2 = vld [vmem:[#allocation7 + $0xd0] sm:$0xff] }
 0x4b0   : > { %v1800_v43 = vpop.f32.mrf.mxu1  ;;  %v1820_v39 = vpop.f32.mrf.mxu2 }
 0x4b1   : > { %v1801_v27 = vadd.f32 %v1800_v43, %v1781_v3  ;;  %v1821_v61 = vadd.f32 %v1820_v39, %v4259_v52  ;;  %v2482_v3 = vld [vmem:[#allocation7 + $0xd8] sm:$0xff]  ;;  %v2483_v43 = vld [vmem:[#allocation7 + $0xc0] sm:$0xff]  ;;  %v2485_v39 = vld [vmem:[#allocation7 + $0xc8] sm:$0xff] }
 0x4b3   : > { %v1843_v58 = vmax.f32 %v1801_v27, 0.0  ;;  %v2484_v27 = vld [vmem:[#allocation7 + $0x1f0] sm:$0xff] }
 0x4b5   : > { %1861 = vmatmul.f32.vlgmr.msrb.gmra.mxu0 %v1843_v58  ;;  %1901 = vmatmul.f32.vlgmr.msrb.gmra.mxu2 %v1843_v58  ;;  %v2486_v58 = vld [vmem:[#allocation7 + $0x1f8] sm:$0xff] }
 0x4b6   : > { %v1840_v63 = vpop.f32.mrf.mxu3  ;;  %2013 = vmatpush.msrb.mxu0 %v2477_v0  ;;  %2053 = vmatpush.msrb.mxu2 %v2478_v55  ;;  %v2489_v0 = vld [vmem:[#allocation7 + $0xb8] sm:$0xff]  ;;  %v2490_v55 = vld [vmem:[#allocation7 + $0x1e8] sm:$0xff] }
 0x4b7   : > { %v1841_v32 = vadd.f32 %v1840_v63, %v1821_v61  ;;  %v2487_v61 = vld [vmem:[#allocation7 + $0xb0] sm:$0xff]  ;;  %v2488_v63 = vld [vmem:[#allocation7 + $0x1e0] sm:$0xff] }
 0x4b8   : > { %2014 = vmatpush.msrb.mxu0 %v2479_v47  ;;  %2054 = vmatpush.msrb.mxu2 %v2480_v60  ;;  %v2492_v47 = vld [vmem:[#allocation7 + $0x1d0] sm:$0xff]  ;;  %v2494_v60 = vld [vmem:[#allocation7 + $0x1d8] sm:$0xff] }
 0x4b9   : > { %v1844_v15 = vmax.f32 %v1841_v32, 0.0  ;;  %v2491_v32 = vld [vmem:[#allocation7 + $0xa0] sm:$0xff] }
 0x4ba   : > { %2015 = vmatpush.msrb.mxu0 %v2481_v2  ;;  %2055 = vmatpush.msrb.mxu2 %v2482_v3  ;;  %v2495_v2 = vld [vmem:[#allocation7 + $0x1c0] sm:$0xff]  ;;  %v2496_v3 = vld [vmem:[#allocation7 + $0x1c8] sm:$0xff] }
 0x4bb   : > { %1881 = vmatmul.f32.vlgmr.msrb.gmra.mxu1 %v1844_v15  ;;  %1921 = vmatmul.f32.vlgmr.msrb.gmra.mxu3 %v1844_v15  ;;  %v2493_v15 = vld [vmem:[#allocation7 + $0xa8] sm:$0xff] }
 0x4bc   : > { %2016 = vmatpush.msrb.mxu0 %v2483_v43  ;;  %2033 = vmatpush.msrb.mxu1 %v2484_v27  ;;  %v2497_v43 = vld [vmem:[#allocation7 + $0x1b0] sm:$0xff]  ;;  %v2498_v27 = vld [vmem:[#allocation7 + $0x1b8] sm:$0xff] }
 0x4bd   : > { %2056 = vmatpush.msrb.mxu2 %v2485_v39  ;;  %2073 = vmatpush.msrb.mxu3 %v2486_v58  ;;  %v2110_v39 = vld [vmem:[%s3864_s12 + $0x28] sm:$0xff]  ;;  %v2129_v58 = vld [vmem:[%s3864_s12 + $0xc0] sm:$0xff] }
 0x4be   : > { %2017 = vmatpush.msrb.mxu0 %v2487_v61  ;;  %2034 = vmatpush.msrb.mxu1 %v2488_v63  ;;  %v2109_v61 = vld [vmem:[%s3864_s12 + $0x20] sm:$0xff]  ;;  %v2128_v63 = vld [vmem:[%s3864_s12 + $0xb8] sm:$0xff] }
 0x4bf   : > { %2057 = vmatpush.msrb.mxu2 %v2489_v0  ;;  %2074 = vmatpush.msrb.mxu3 %v2490_v55  ;;  %v2108_v0 = vld [vmem:[%s3864_s12 + $0x18] sm:$0xff]  ;;  %v2127_v55 = vld [vmem:[%s3864_s12 + $0xb0] sm:$0xff] }
 0x4c0   : > { %2018 = vmatpush.msrb.mxu0 %v2491_v32  ;;  %2035 = vmatpush.msrb.mxu1 %v2492_v47  ;;  %v2107_v32 = vld [vmem:[%s3864_s12 + $0x10] sm:$0xff]  ;;  %v2126_v47 = vld [vmem:[%s3864_s12 + $0xa8] sm:$0xff] }
 0x4c1   : > { %2058 = vmatpush.msrb.mxu2 %v2493_v15  ;;  %2075 = vmatpush.msrb.mxu3 %v2494_v60  ;;  %v2106_v15 = vld [vmem:[%s3864_s12 + $0x8] sm:$0xff]  ;;  %v2125_v60 = vld [vmem:[%s3864_s12 + $0xa0] sm:$0xff] }
 0x4c2   : > { %2019 = vmatpush.msrb.mxu0 %v4278_v62  ;;  %2036 = vmatpush.msrb.mxu1 %v2495_v2  ;;  %v2499_v62 = vld [vmem:[#allocation7 + $0x1a8] sm:$0xff]  ;;  %v2105_v2 = vld [vmem:[%s3864_s12] sm:$0xff] }
 0x4c3   : > { %2059 = vmatpush.msrb.mxu2 %v4202_v30  ;;  %2076 = vmatpush.msrb.mxu3 %v2496_v3  ;;  %v2124_v3 = vld [vmem:[%s3864_s12 + $0x98] sm:$0xff] }
 0x4c4   : > { %2020 = vmatpush.msrb.mxu0 %v4205_v19  ;;  %2037 = vmatpush.msrb.mxu1 %v2497_v43  ;;  %v2123_v43 = vld [vmem:[%s3864_s12 + $0x90] sm:$0xff] }
 0x4c5   : > { %2060 = vmatpush.msrb.mxu2 %v4206_v22  ;;  %2077 = vmatpush.msrb.mxu3 %v2498_v27  ;;  %v2122_v27 = vld [vmem:[%s3864_s12 + $0x88] sm:$0xff] }
 0x4c6   : > { %2021 = vmatpush.msrb.mxu0 %v4283_v1  ;;  %2038 = vmatpush.msrb.mxu1 %v4284_v37 }
 0x4c7   : > { %2061 = vmatpush.msrb.mxu2 %v4210_v24  ;;  %2078 = vmatpush.msrb.mxu3 %v2499_v62  ;;  %v2121_v62 = vld [vmem:[%s3864_s12 + $0x80] sm:$0xff] }
 0x4c8   : > { %2022 = vmatpush.msrb.mxu0 %v4286_v4  ;;  %2039 = vmatpush.msrb.mxu1 %v4287_v5  ;;  %v1926_v4 = vsub.f32 %v3503_v20, %v3647_v35 }
 0x4c9   : > { %2062 = vmatpush.msrb.mxu2 %v4288_v6  ;;  %2079 = vmatpush.msrb.mxu3 %v4289_v7  ;;  %v4315_v6 = vld [vmem:[#allocation52_spill] sm:$0xff] }
 0x4ca   : > { %2023 = vmatpush.msrb.mxu0 %v4290_v36  ;;  %2040 = vmatpush.msrb.mxu1 %v4291_v51  ;;  %v2120_v36 = vld [vmem:[%s3864_s12 + $0x78] sm:$0xff]  ;;  %v2119_v51 = vld [vmem:[%s3864_s12 + $0x70] sm:$0xff] }
 0x4cb   : > { %2063 = vmatpush.msrb.mxu2 %v4292_v33  ;;  %2080 = vmatpush.msrb.mxu3 %v4293_v34  ;;  %v2136_v33 = vld [vmem:[%s3864_s12 + $0xf8] sm:$0xff]  ;;  %v2118_v34 = vld [vmem:[%s3864_s12 + $0x68] sm:$0xff] }
 0x4cc   : > { %2024 = vmatpush.msrb.mxu0 %v3278_v25  ;;  %2041 = vmatpush.msrb.mxu1 %v4294_v38  ;;  %v2135_v38 = vld [vmem:[%s3864_s12 + $0xf0] sm:$0xff] }
 0x4cd   : > { %2064 = vmatpush.msrb.mxu2 %v4295_v8  ;;  %2081 = vmatpush.msrb.mxu3 %v4296_v41  ;;  %v2134_v8 = vld [vmem:[%s3864_s12 + $0xe8] sm:$0xff]  ;;  %v2117_v41 = vld [vmem:[%s3864_s12 + $0x60] sm:$0xff] }
 0x4ce   : > { %2025 = vmatpush.msrb.mxu0 %v4221_v28  ;;  %2042 = vmatpush.msrb.mxu1 %v4297_v42  ;;  %v2133_v42 = vld [vmem:[%s3864_s12 + $0xe0] sm:$0xff] }
 0x4cf   : > { %2065 = vmatpush.msrb.mxu2 %v4298_v44  ;;  %2082 = vmatpush.msrb.mxu3 %v4299_v48  ;;  %v2116_v44 = vld [vmem:[%s3864_s12 + $0x58] sm:$0xff] }
 0x4d0   : > { %2026 = vmatpush.msrb.mxu0 %v4225_v14  ;;  %2043 = vmatpush.msrb.mxu1 %v4300_v50  ;;  %v2132_v48 = vld [vmem:[%s3864_s12 + $0xd8] sm:$0xff]  ;;  %v2115_v50 = vld [vmem:[%s3864_s12 + $0x50] sm:$0xff] }
 0x4d1   : > { %2066 = vmatpush.msrb.mxu2 %v4226_v9  ;;  %2083 = vmatpush.msrb.mxu3 %v4224_v40  ;;  %v1925_v9 = vsub.f32 %v3493_v49, %v3641_v59 }
 0x4d2   : > { %2027 = vmatpush.msrb.mxu0 %v4301_v56  ;;  %2044 = vmatpush.msrb.mxu1 %v4302_v57  ;;  %v2114_v56 = vld [vmem:[%s3864_s12 + $0x48] sm:$0xff]  ;;  %v2113_v57 = vld [vmem:[%s3864_s12 + $0x40] sm:$0xff] }
 0x4d3   : > { %2067 = vmatpush.msrb.mxu2 %v4303_v23  ;;  %2084 = vmatpush.msrb.mxu3 %v4304_v10 }
 0x4d4   : > { %2028 = vmatpush.msrb.mxu0 %v4305_v17  ;;  %2045 = vmatpush.msrb.mxu1 %v4306_v16 }
 0x4d5   : > { %2068 = vmatpush.msrb.mxu2 %v4307_v18  ;;  %2085 = vmatpush.msrb.mxu3 %v4308_v29 }
 0x4d6   : > { %2046 = vmatpush.msrb.mxu1 %v4309_v31 }
 0x4d7   : > { %2086 = vmatpush.msrb.mxu3 %v4310_v54 }
 0x4d8   : > { %2047 = vmatpush.msrb.mxu1 %v4311_v21 }
 0x4d9   : > { %2087 = vmatpush.msrb.mxu3 %v4312_v11 }
 0x4da   : > { %2048 = vmatpush.msrb.mxu1 %v4313_v12  ;;  %v2112_v12 = vld [vmem:[%s3864_s12 + $0x38] sm:$0xff] }
 0x4db   : > { %2088 = vmatpush.msrb.mxu3 %v4314_v53  ;;  %v2130_v53 = vld [vmem:[%s3864_s12 + $0xc8] sm:$0xff] }
 0x532   : > { %v1862_v22 = vpop.f32.mrf.mxu0 }
 0x533   : > { %v1863_v19 = vadd.f32 %v1862_v22, %v3490_v45 }
 0x538   : > { %v1882_v30 = vpop.f32.mrf.mxu1  ;;  %v1902_v25 = vpop.f32.mrf.mxu2 }
 0x539   : > { %v3696_v14 = vadd.f32 %v1882_v30, %v1863_v19  ;;  %v1903_v24 = vadd.f32 %v1902_v25, %v3495_v26 }
 0x53b   : > { %v1927_v28 = vadd.f32 %v1925_v9, %v3696_v14  ;;  %v2093_v22 = vadd.f32 %v3696_v14, %v3641_v59 }
 0x53d   : > { %v1929_v40 = vadd.f32 %v1927_v28, %v4233_v46  ;;  %v2095_v30 = vmul.f32 3.0, %v2093_v22 }
 0x53e   : > { %v1922_v1 = vpop.f32.mrf.mxu3 }
 0x53f   : > { %v3703_v37 = vadd.f32 %v1922_v1, %v1903_v24  ;;  %1947 = vmatmul.f32.vlgmr.msra.gmra.mxu0 %v1929_v40  ;;  %1987 = vmatmul.f32.vlgmr.msra.gmra.mxu2 %v1929_v40  ;;  %v2097_v24 = vadd.f32 %v2095_v30, %v3493_v49  ;;  %v2410_v49 = vld [vmem:[%s3865_s13] ss:$0 sm:$0xff] }
 0x540   : > { %2141 = vmatpush.msra.mxu0 %v2120_v36 }
 0x541   : > { %v1928_v5 = vadd.f32 %v1926_v4, %v3703_v37  ;;  %v2094_v9 = vadd.f32 %v3703_v37, %v3647_v35 }
 0x542   : > { %2142 = vmatpush.msra.mxu0 %v2119_v51 }
 0x543   : > { %v1930_v7 = vadd.f32 %v1928_v5, %v4315_v6  ;;  %v2096_v4 = vmul.f32 3.0, %v2094_v9 }
 0x544   : > { %2143 = vmatpush.msra.mxu0 %v2118_v34 }
 0x545   : > { %1967 = vmatmul.f32.vlgmr.msra.gmra.mxu1 %v1930_v7  ;;  %2007 = vmatmul.f32.vlgmr.msra.gmra.mxu3 %v1930_v7  ;;  %v2098_v35 = vadd.f32 %v2096_v4, %v3503_v20 }
 0x546   : > { %2161 = vmatpush.msra.mxu1 %v2136_v33  ;;  %2144 = vmatpush.msra.mxu0 %v2117_v41 }
 0x548   : > { %2162 = vmatpush.msra.mxu1 %v2135_v38  ;;  %2145 = vmatpush.msra.mxu0 %v2116_v44 }
 0x54a   : > { %2163 = vmatpush.msra.mxu1 %v2134_v8  ;;  %2146 = vmatpush.msra.mxu0 %v2115_v50 }
 0x54c   : > { %2164 = vmatpush.msra.mxu1 %v2133_v42  ;;  %2147 = vmatpush.msra.mxu0 %v2114_v56 }
 0x54e   : > { %2165 = vmatpush.msra.mxu1 %v2132_v48  ;;  %2148 = vmatpush.msra.mxu0 %v2113_v57 }
 0x550   : > { %2149 = vmatpush.msra.mxu0 %v2112_v12 }
 0x5bc   : > { %v1948_v23 = vpop.f32.mrf.mxu0 }
 0x5bd   : > { %v1949_v10 = vadd.f32 %v1948_v23, %v4258_v13  ;;  %v2131_v13 = vld [vmem:[%s3864_s12 + $0xd0] sm:$0xff] }
 0x5be   : > { %2166 = vmatpush.msra.mxu1 %v2131_v13 }
 0x5c0   : > { %2167 = vmatpush.msra.mxu1 %v2130_v53 }
 0x5c2   : > { %v1968_v17 = vpop.f32.mrf.mxu1  ;;  %v1988_v18 = vpop.f32.mrf.mxu2  ;;  %2168 = vmatpush.msra.mxu1 %v2129_v58 }
 0x5c3   : > { %v1969_v16 = vadd.f32 %v1968_v17, %v1949_v10  ;;  %v1989_v31 = vadd.f32 %v1988_v18, %v4259_v52  ;;  %v2111_v52 = vld [vmem:[%s3864_s12 + $0x30] sm:$0xff] }
 0x5c4   : > { %2150 = vmatpush.msra.mxu0 %v2111_v52  ;;  %2169 = vmatpush.msra.mxu1 %v2128_v63 }
 0x5c5   : > { %v2011_v29 = vmax.f32 %v1969_v16, 0.0 }
 0x5c6   : > { %2151 = vmatpush.msra.mxu0 %v2110_v39  ;;  %2170 = vmatpush.msra.mxu1 %v2127_v55 }
 0x5c7   : > { %2029 = vmatmul.f32.vlgmr.msrb.gmra.mxu0 %v2011_v29  ;;  %2069 = vmatmul.f32.vlgmr.msrb.gmra.mxu2 %v2011_v29 }
 0x5c8   : > { %v2008_v54 = vpop.f32.mrf.mxu3  ;;  %2152 = vmatpush.msra.mxu0 %v2109_v61  ;;  %2171 = vmatpush.msra.mxu1 %v2126_v47 }
 0x5c9   : > { %v2009_v21 = vadd.f32 %v2008_v54, %v1989_v31 }
 0x5ca   : > { %2153 = vmatpush.msra.mxu0 %v2108_v0  ;;  %2172 = vmatpush.msra.mxu1 %v2125_v60 }
 0x5cb   : > { %v2012_v11 = vmax.f32 %v2009_v21, 0.0 }
 0x5cc   : > { %2154 = vmatpush.msra.mxu0 %v2107_v32  ;;  %2173 = vmatpush.msra.mxu1 %v2124_v3 }
 0x5cd   : > { %2049 = vmatmul.f32.vlgmr.msrb.gmra.mxu1 %v2012_v11  ;;  %2089 = vmatmul.f32.vlgmr.msrb.gmra.mxu3 %v2012_v11 }
 0x5ce   : > { %2155 = vmatpush.msra.mxu0 %v2106_v15  ;;  %2174 = vmatpush.msra.mxu1 %v2123_v43 }
 0x5d0   : > { %2156 = vmatpush.msra.mxu0 %v2105_v2  ;;  %2175 = vmatpush.msra.mxu1 %v2122_v27 }
 0x5d2   : > { %2176 = vmatpush.msra.mxu1 %v2121_v62 }
 0x644   : > { %v2030_v19 = vpop.f32.mrf.mxu0 }
 0x645   : > { %v2031_v25 = vadd.f32 %v2030_v19, %v3490_v45 }
 0x64a   : > { %v2050_v28 = vpop.f32.mrf.mxu1  ;;  %v2070_v1 = vpop.f32.mrf.mxu2 }
 0x64b   : > { %v2051_v40 = vadd.f32 %v2050_v28, %v2031_v25  ;;  %v2071_v36 = vadd.f32 %v2070_v1, %v3495_v26 }
 0x64d   : > { %v2099_v5 = vadd.f32 %v2097_v24, %v2051_v40 }
 0x64f   : > { %v2101_v7 = vmul.f32 0.125, %v2099_v5 }
 0x650   : > { %v2090_v59 = vpop.f32.mrf.mxu3 }
 0x651   : > { %v2103_v14 = vadd.f32 %v2101_v7, %v4233_v46  ;;  %v2091_v51 = vadd.f32 %v2090_v59, %v2071_v36 }
 0x653   : > { %v2100_v37 = vadd.f32 %v2098_v35, %v2091_v51  ;;  %2157 = vmatmul.f32.vlgmr.msra.gmra.mxu0 %v2103_v14 }
 0x655   : > { %v2102_v45 = vmul.f32 0.125, %v2100_v37 }
 0x657   : > { %v2104_v33 = vadd.f32 %v2102_v45, %v4315_v6 }
 0x659   : > { %2177 = vmatmul.f32.vlgmr.msra.gmra.mxu1 %v2104_v33 }
 0x6d0   : > { %v2158_v26 = vpop.f32.mrf.mxu0 }
 0x6d1   : > { %v2159_v46 = vadd.f32 %v2410_v49, %v2158_v26 }
 0x6d6   : > { %v2178_v20 = vpop.f32.mrf.mxu1 }
 0x6d7   : > { %v2179_v6 = vadd.f32 %v2178_v20, %v2159_v46 }
 0x6d9   : > { %2182 = vst.msk [vmem:[%s508_s15] sm:$0xf] %vm2181_vm4, %v2179_v6 }
 0x6da   : > { %2617 = shalt.err (!%p2614_p8)
}
 0x6db   : > { %2333 = dma.vmem_to_hbm [thread:$0]  (%p2787_p5), %s2197_s16, 64, %s2199_s19, %s2184_s17  }
 0x6dc PF: > { %s4316_s21 = sld [smem:[#allocation14_spill]] }
 0x6dd   : > { %s4317_s20 = sld [smem:[#allocation12_spill]] }
 0x6e2   : > { %p2355_p9 = scmp.ge.s32.totalorder %s4316_s21, 2 }
 0x6e3   : > { %s2210_s8 = sand.u32 1, %s4317_s20  }
 0x6e4   : > { %p2346_p10 = pnand %p2355_p9, %p2791_p6  ;;  %s2211_s29 = scalar_lea.sflag [#allocation4], %s2210_s8 }
 0x6e6   : > { %p2347_p11 = pneg %p2346_p10 }
 0x6e8   : > { %2643 = dma.done.wait (%p2347_p11), %s2211_s29, 64  }
 0x6e9   : > { %2645 = vsyncadd (%p2347_p11), %s2211_s29, 4294967232  ;;  %s4319_s16 = sld [smem:[#allocation15_spill]]  ;;  %s4322_s29 = smov %s2652_s30 }
 0x6ea   : > { %s4320_s15 = sld [smem:[#allocation13_spill]] }
 0x6eb   : > { %s4321_s22 = sld [smem:[#allocation16_spill]] }
 0x6ef   : > { %p26_p12 = scmp.ge.s32.totalorder %s4319_s16, 4  }
 0x6f0   : > { %s4323_s30 = smov %s4320_s15 }
 0x6f1   : > { %s4324_s15 = smov %s4321_s22  ;;  %28 = sbr.rel (!%p26_p12) target bundleno = 8 (0x8), region = 124 }
 0x6f6   :  { %2217 = vsyncpa [#allocation3], 1 }
 0x6f7   :  { %2219 = vsyncpa [#allocation3 + $0x1], 1 }
 0x6f8   :  { %2220 = vsyncpa [#allocation6], 1 }
 0x6f9   :  { %2221 = vsyncpa [#allocation4], 1 }
 0x6fa   :  { %2223 = vsyncpa [#allocation4 + $0x1], 1 }

</bundles_post_ra>
